<compile_context>
chip_gen: v7x
topology: tpu7x:2x2x1
jax: 0.10.0
libtpu: 0.0.40
codegen_flags: <defaults>
</compile_context>

<pallas_src>
import functools
import numpy as np
import jax
import jax.numpy as jnp
from jax import lax
from jax.experimental import pallas as pl
from jax.experimental.pallas import tpu as pltpu

SR = 24000
N_FFT = 1024
HOP = 256
PAD = 512
N_MEL = 80
N_PAD = 128                 # mel / feature lane dim padded to a full 128-lane vreg
F_USE = 512                 # real-DFT bins 0..511 (Nyquist bin has zero mel weight)
D_HALF = 4                  # delta filter half width
D_LEN = 2 * D_HALF + 1      # 9
N_HOPS = N_FFT // HOP       # 4 hop-rows per analysis frame


def _round_up(x, m):
    return ((x + m - 1) // m) * m


# ---------------------------------------------------------------------------
# deterministic parameter construction (plain numpy glue)
# ---------------------------------------------------------------------------
def _create_delta_filters():
    """Exact Python port of Delta._create_filters -> 3 filters of length 9."""
    scales = [[1.0]]
    for i in range(1, 3):
        prev_offset = (len(scales[i - 1]) - 1) // 2
        offset = prev_offset + 2
        current = [0.0] * (len(scales[i - 1]) + 2 * 2)
        normalizer = 0.0
        for j in range(-2, 2 + 1):
            normalizer += j * j
            for k in range(-prev_offset, prev_offset + 1):
                current[k + offset + j] += j * scales[i - 1][k + prev_offset]
        current = [x / normalizer for x in current]
        scales.append(current)
    max_len = len(scales[-1])
    for i, scale in enumerate(scales[:-1]):
        padding = (max_len - len(scale)) // 2
        scales[i] = [0.0] * padding + scale + [0.0] * padding
    return scales


DELTA_W = _create_delta_filters()      # DELTA_W[0] == identity tap at k = 4


def _fused_dft_basis():
    """Hann-windowed real-DFT [cos | sin] basis, (N_FFT, 2*F_USE), float32."""
    n = np.arange(N_FFT)[:, None].astype(np.float64)
    f = np.arange(F_USE)[None, :].astype(np.float64)
    hann = 0.5 - 0.5 * np.cos(2.0 * np.pi * np.arange(N_FFT) / N_FFT)   # periodic Hann
    ang = 2.0 * np.pi * n * f / N_FFT
    cos_b = hann[:, None] * np.cos(ang)
    sin_b = -hann[:, None] * np.sin(ang)
    return np.concatenate([cos_b, sin_b], axis=1).astype(np.float32)    # (1024, 1024)


def _mel_filterbank():
    """HTK triangular mel filterbank (F_USE, N_PAD); mel columns 80..127 are zero.
    The DC and Nyquist bins carry exactly zero triangle weight for this fmax=SR/2
    construction, so dropping bin 512 does not change the result."""
    def hz_to_mel(f):
        return 2595.0 * np.log10(1.0 + f / 700.0)

    def mel_to_hz(m):
        return 700.0 * (10.0 ** (m / 2595.0) - 1.0)

    mels = np.linspace(hz_to_mel(0.0), hz_to_mel(SR / 2.0), N_MEL + 2)
    hzs = mel_to_hz(mels)
    bins = np.fft.rfftfreq(N_FFT, 1.0 / SR)[:F_USE]
    fb = np.zeros((F_USE, N_PAD), np.float32)
    for m in range(N_MEL):
        lo, ce, hi = hzs[m], hzs[m + 1], hzs[m + 2]
        up = (bins - lo) / max(ce - lo, 1e-12)
        dn = (hi - bins) / max(hi - ce, 1e-12)
        fb[:, m] = np.maximum(0.0, np.minimum(up, dn))
    return fb


def _resize_pad_matrix(scale):
    """(N_PAD, N_PAD) matrix: bilinear resize 80 -> scale (align_corners=False, no
    antialias) followed by edge-pad / truncate back to 80, applied as logmel @ M.
    Rows/columns 80..127 are zero so the padded lanes stay inert."""
    resize = np.zeros((scale, N_MEL), np.float64)
    sf = N_MEL / scale
    for i in range(scale):
        src = max((i + 0.5) * sf - 0.5, 0.0)
        i0 = min(int(np.floor(src)), N_MEL - 1)
        i1 = min(i0 + 1, N_MEL - 1)
        w1 = src - i0
        resize[i, i0] += 1.0 - w1
        resize[i, i1] += w1
    padtrunc = np.zeros((N_MEL, scale), np.float64)
    for i in range(N_MEL):
        padtrunc[i, min(i, scale - 1)] = 1.0        # edge pad (scale<80) / truncate
    m = (padtrunc @ resize).T                       # (80 in, 80 out)
    out = np.zeros((N_PAD, N_PAD), np.float32)
    out[:N_MEL, :N_MEL] = m
    return out


def _tile_config(T, B):
    """Generation-specific time tile, VMEM limit and resize-matmul dtype."""
    kind = jax.devices()[0].device_kind.lower()
    is_v7 = "v7" in kind
    is_v5e = ("v5e" in kind) or ("v5 lite" in kind) or ("v5lite" in kind)
    th_target = 512 if is_v7 else 1024            # v7x has only 64 MiB VMEM / TC
    vmem_bytes = (40 if is_v7 else 64) * 1024 * 1024
    rs_dtype = jnp.bfloat16 if is_v5e else jnp.float32

    tt = th_target - 2 * D_HALF                   # 504 / 1016 -> TH = 512 / 1024
    if is_v7 and B == 1:
        # keep both v7x TensorCores busy at batch=1
        tt = min(tt, max(8, _round_up(-(-T // 2), 8)))
    tt = min(tt, _round_up(T, 8))
    # prefer TH = tt + 8 to be a multiple of 16 (bf16 sublane packing), but never
    # at the cost of changing the number of grid tiles
    tt_aligned = _round_up(tt + 2 * D_HALF, 16) - 2 * D_HALF
    if -(-T // tt_aligned) == -(-T // tt):
        tt = tt_aligned
    return tt, vmem_bytes, rs_dtype


# ---------------------------------------------------------------------------
# Pallas kernel + wrapper
# ---------------------------------------------------------------------------
@functools.partial(jax.jit, static_argnums=(1,))
def feature_extractor(xs, scale):
    """xs: (B, L) float32 audio.  Returns (B, L // HOP, 3 * N_MEL) float32."""
    B, L = xs.shape
    T = L // HOP                                   # melspec frames after [:, :, :-1]
    TT, vmem_bytes, rs_dtype = _tile_config(T, B)
    n_tiles = -(-T // TT)
    TH = TT + 2 * D_HALF                           # frames per tile incl. delta halo
    RH = _round_up(TH + (N_HOPS - 1), 16)          # hop rows per tile (halo + overlap)

    # --- framing glue: one cheap hop-row gather (~1.02x duplication) ----------
    # reflect pad (STFT centering), zero pad so every halo frame's samples exist,
    # view as hop-256 rows; the kernel rebuilds 1024-sample frames as 4 shifted
    # matmuls, so the 4x-duplicated frame tensor never touches HBM.
    xp = jnp.pad(xs, ((0, 0), (PAD, PAD)), mode="reflect").astype(jnp.bfloat16)
    n_rows = (n_tiles - 1) * TT + RH
    left = D_HALF * HOP
    right = n_rows * HOP - left - xp.shape[1]      # always > 0 by construction
    xq = jnp.pad(xp, ((0, 0), (left, right)))
    rows = xq.reshape(B, n_rows, HOP)
    row_idx = (np.arange(n_tiles, dtype=np.int32)[:, None] * TT
               + np.arange(RH, dtype=np.int32)[None, :])           # (n_tiles, RH)
    rows_tiled = rows[:, row_idx]                                   # (B, n_tiles, RH, HOP)

    basis = jnp.asarray(_fused_dft_basis()).astype(jnp.bfloat16)
    basis = basis.reshape(N_HOPS, HOP, 2 * F_USE)                   # (4, 256, 1024)
    melfb = jnp.asarray(_mel_filterbank()).astype(jnp.bfloat16)     # (512, 128)
    rsmat = jnp.asarray(_resize_pad_matrix(scale)).astype(rs_dtype)  # (128, 128)

    def kernel(rows_ref, basis_ref, mel_ref, rt_ref, out_ref):
        t = pl.program_id(1)
        r = rows_ref[0, 0]                                          # (RH, 256) bf16

        # fused Hann-windowed real DFT: frames rebuilt implicitly by summing four
        # hop-shifted matmuls against 256-row slabs of the [cos | sin] basis
        spec = jnp.dot(r[0:TH, :], basis_ref[0],
                       preferred_element_type=jnp.float32)
        for j in range(1, N_HOPS):
            spec = spec + jnp.dot(r[j:j + TH, :], basis_ref[j],
                                  preferred_element_type=jnp.float32)
        re = spec[:, :F_USE]                                        # lane-aligned slices
        im = spec[:, F_USE:]
        power = re * re + im * im                                   # (TH, 512) f32

        # mel filterbank (bf16 x bf16 -> f32 accumulate), log clamp in f32
        mel = jnp.dot(power.astype(jnp.bfloat16), mel_ref[...],
                      preferred_element_type=jnp.float32)           # (TH, 128)
        logmel = jnp.log(jnp.maximum(mel, 1e-5))

        # bilinear resize + edge pad / truncate fused as one small matmul
        # (bf16 operands on v5e, f32 elsewhere)
        resized = jnp.dot(logmel.astype(rt_ref.dtype), rt_ref[...],
                          preferred_element_type=jnp.float32)       # (TH, 128)

        # zero halo rows outside [0, T): reproduces F.conv2d zero padding along time
        row_i = lax.broadcasted_iota(jnp.int32, (TH, 1), 0)
        grow = row_i + (t * TT - D_HALF)
        padded = jnp.where((grow >= 0) & (grow < T),
                           resized[:, :N_MEL], 0.0)                 # (TH, 80)

        # delta conv: channel 0 is the identity tap; channels 1/2 share slices
        ident = padded[D_HALF:D_HALF + TT, :]
        acc1 = jnp.zeros((TT, N_MEL), jnp.float32)
        acc2 = jnp.zeros((TT, N_MEL), jnp.float32)
        for k in range(D_LEN):
            w1, w2 = DELTA_W[1][k], DELTA_W[2][k]
            if w1 == 0.0 and w2 == 0.0:
                continue
            sl = padded[k:k + TT, :]                                # one shift per k
            if w1 != 0.0:
                acc1 = acc1 + jnp.float32(w1) * sl
            if w2 != 0.0:
                acc2 = acc2 + jnp.float32(w2) * sl

        # emit the final (seq, 3*80) layout directly -- no post-kernel repack pass
        out_ref[0] = jnp.concatenate([ident, acc1, acc2], axis=-1)  # (TT, 240)

    return pl.pallas_call(
        kernel,
        out_shape=jax.ShapeDtypeStruct((B, T, 3 * N_MEL), jnp.float32),
        grid_spec=pltpu.PrefetchScalarGridSpec(
            num_scalar_prefetch=0,
            grid=(B, n_tiles),
            in_specs=[
                pl.BlockSpec((1, 1, RH, HOP), lambda b, t: (b, t, 0, 0)),
                pl.BlockSpec((N_HOPS, HOP, 2 * F_USE), lambda b, t: (0, 0, 0)),
                pl.BlockSpec((F_USE, N_PAD), lambda b, t: (0, 0)),
                pl.BlockSpec((N_PAD, N_PAD), lambda b, t: (0, 0)),
            ],
            out_specs=pl.BlockSpec((1, TT, 3 * N_MEL), lambda b, t: (b, t, 0)),
        ),
        compiler_params=pltpu.CompilerParams(
            dimension_semantics=("parallel", "parallel"),
            vmem_limit_bytes=vmem_bytes,
        ),
    )(rows_tiled, basis, melfb, rsmat)


if __name__ == "__main__":
    key = jax.random.PRNGKey(0)
    B, L = 2, 2048                          # -> T = 8 frames
    xs = 0.1 * jax.random.normal(key, (B, L), dtype=jnp.float32)

    ys = feature_extractor(xs, 64)          # scale < 80 exercises the edge-pad branch
    ys = jax.block_until_ready(ys)

    assert ys.shape == (B, L // HOP, 3 * N_MEL), ys.shape
    assert bool(jnp.all(jnp.isfinite(ys)))
    print("KERNEL_OK")
</pallas_src>

<mosaic_0001>
module attributes {stable_mosaic.version = 11 : i64} {
  func.func @kernel(%arg0: i32, %arg1: i32, %arg2: memref<1x1x32x256xbf16, #tpu.memory_space<vmem>>, %arg3: memref<4x256x1024xbf16, #tpu.memory_space<vmem>>, %arg4: memref<512x128xbf16, #tpu.memory_space<vmem>>, %arg5: memref<128x128xf32, #tpu.memory_space<vmem>>, %arg6: memref<1x8x240xf32, #tpu.memory_space<vmem>>) attributes {dimension_semantics = [#tpu.dimension_semantics<parallel>, #tpu.dimension_semantics<parallel>], iteration_bounds = array<i64: 2, 1>, scalar_prefetch = 0 : i64, scratch_operands = 0 : i64, tpu.core_type = #tpu.core_type<tc>, window_params = [{transform_indices = @transform_0, window_bounds = array<i64: 1, 1, 32, 256>}, {pipeline_mode = #tpu.pipeline_mode<synchronous>, transform_indices = @transform_1, window_bounds = array<i64: 4, 256, 1024>}, {pipeline_mode = #tpu.pipeline_mode<synchronous>, transform_indices = @transform_2, window_bounds = array<i64: 512, 128>}, {pipeline_mode = #tpu.pipeline_mode<synchronous>, transform_indices = @transform_3, window_bounds = array<i64: 128, 128>}, {transform_indices = @transform_4, window_bounds = array<i64: 1, 8, 240>}]} {
    %c0 = arith.constant 0 : index
    %c0_0 = arith.constant 0 : index
    %c0_1 = arith.constant 0 : index
    %c0_2 = arith.constant 0 : index
    %0 = vector.load %arg2[%c0, %c0_0, %c0_1, %c0_2] : memref<1x1x32x256xbf16, #tpu.memory_space<vmem>>, vector<1x1x32x256xbf16>
    %1 = vector.shape_cast %0 : vector<1x1x32x256xbf16> to vector<32x256xbf16>
    %2 = vector.extract_strided_slice %1 {offsets = [0, 0], sizes = [16, 256], strides = [1, 1]} : vector<32x256xbf16> to vector<16x256xbf16>
    %c0_3 = arith.constant 0 : index
    %c0_4 = arith.constant 0 : index
    %c0_5 = arith.constant 0 : index
    %3 = vector.load %arg3[%c0_3, %c0_4, %c0_5] : memref<4x256x1024xbf16, #tpu.memory_space<vmem>>, vector<1x256x1024xbf16>
    %4 = vector.shape_cast %3 : vector<1x256x1024xbf16> to vector<256x1024xbf16>
    %cst = arith.constant dense<0.000000e+00> : vector<16x1024xf32>
    %5 = tpu.matmul %2, %4, %cst {dimension_numbers = #tpu.dot_dimension_numbers<[1], [0], [0], [1], [0, 0, 1, 1], [], []>} : vector<16x256xbf16>, vector<256x1024xbf16>, vector<16x1024xf32> -> vector<16x1024xf32>
    %6 = vector.extract_strided_slice %1 {offsets = [1, 0], sizes = [16, 256], strides = [1, 1]} : vector<32x256xbf16> to vector<16x256xbf16>
    %c1 = arith.constant 1 : index
    %c0_6 = arith.constant 0 : index
    %c0_7 = arith.constant 0 : index
    %7 = vector.load %arg3[%c1, %c0_6, %c0_7] : memref<4x256x1024xbf16, #tpu.memory_space<vmem>>, vector<1x256x1024xbf16>
    %8 = vector.shape_cast %7 : vector<1x256x1024xbf16> to vector<256x1024xbf16>
    %cst_8 = arith.constant dense<0.000000e+00> : vector<16x1024xf32>
    %9 = tpu.matmul %6, %8, %cst_8 {dimension_numbers = #tpu.dot_dimension_numbers<[1], [0], [0], [1], [0, 0, 1, 1], [], []>} : vector<16x256xbf16>, vector<256x1024xbf16>, vector<16x1024xf32> -> vector<16x1024xf32>
    %10 = arith.addf %5, %9 : vector<16x1024xf32>
    %11 = vector.extract_strided_slice %1 {offsets = [2, 0], sizes = [16, 256], strides = [1, 1]} : vector<32x256xbf16> to vector<16x256xbf16>
    %c2 = arith.constant 2 : index
    %c0_9 = arith.constant 0 : index
    %c0_10 = arith.constant 0 : index
    %12 = vector.load %arg3[%c2, %c0_9, %c0_10] : memref<4x256x1024xbf16, #tpu.memory_space<vmem>>, vector<1x256x1024xbf16>
    %13 = vector.shape_cast %12 : vector<1x256x1024xbf16> to vector<256x1024xbf16>
    %cst_11 = arith.constant dense<0.000000e+00> : vector<16x1024xf32>
    %14 = tpu.matmul %11, %13, %cst_11 {dimension_numbers = #tpu.dot_dimension_numbers<[1], [0], [0], [1], [0, 0, 1, 1], [], []>} : vector<16x256xbf16>, vector<256x1024xbf16>, vector<16x1024xf32> -> vector<16x1024xf32>
    %15 = arith.addf %10, %14 : vector<16x1024xf32>
    %16 = vector.extract_strided_slice %1 {offsets = [3, 0], sizes = [16, 256], strides = [1, 1]} : vector<32x256xbf16> to vector<16x256xbf16>
    %c3 = arith.constant 3 : index
    %c0_12 = arith.constant 0 : index
    %c0_13 = arith.constant 0 : index
    %17 = vector.load %arg3[%c3, %c0_12, %c0_13] : memref<4x256x1024xbf16, #tpu.memory_space<vmem>>, vector<1x256x1024xbf16>
    %18 = vector.shape_cast %17 : vector<1x256x1024xbf16> to vector<256x1024xbf16>
    %cst_14 = arith.constant dense<0.000000e+00> : vector<16x1024xf32>
    %19 = tpu.matmul %16, %18, %cst_14 {dimension_numbers = #tpu.dot_dimension_numbers<[1], [0], [0], [1], [0, 0, 1, 1], [], []>} : vector<16x256xbf16>, vector<256x1024xbf16>, vector<16x1024xf32> -> vector<16x1024xf32>
    %20 = arith.addf %15, %19 : vector<16x1024xf32>
    %21 = vector.extract_strided_slice %20 {offsets = [0, 0], sizes = [16, 512], strides = [1, 1]} : vector<16x1024xf32> to vector<16x512xf32>
    %22 = vector.extract_strided_slice %20 {offsets = [0, 512], sizes = [16, 512], strides = [1, 1]} : vector<16x1024xf32> to vector<16x512xf32>
    %23 = arith.mulf %21, %21 : vector<16x512xf32>
    %24 = arith.mulf %22, %22 : vector<16x512xf32>
    %25 = arith.addf %23, %24 : vector<16x512xf32>
    %26 = arith.truncf %25 : vector<16x512xf32> to vector<16x512xbf16>
    %c0_15 = arith.constant 0 : index
    %c0_16 = arith.constant 0 : index
    %27 = vector.load %arg4[%c0_15, %c0_16] : memref<512x128xbf16, #tpu.memory_space<vmem>>, vector<512x128xbf16>
    %cst_17 = arith.constant dense<0.000000e+00> : vector<16x128xf32>
    %28 = tpu.matmul %26, %27, %cst_17 {dimension_numbers = #tpu.dot_dimension_numbers<[1], [0], [0], [1], [0, 0, 1, 1], [], []>} : vector<16x512xbf16>, vector<512x128xbf16>, vector<16x128xf32> -> vector<16x128xf32>
    %cst_18 = arith.constant 9.99999974E-6 : f32
    %29 = vector.broadcast %cst_18 : f32 to vector<16x128xf32>
    %30 = arith.maximumf %28, %29 : vector<16x128xf32>
    %31 = math.log %30 : vector<16x128xf32>
    %c0_19 = arith.constant 0 : index
    %c0_20 = arith.constant 0 : index
    %32 = vector.load %arg5[%c0_19, %c0_20] : memref<128x128xf32, #tpu.memory_space<vmem>>, vector<128x128xf32>
    %cst_21 = arith.constant dense<0.000000e+00> : vector<16x128xf32>
    %33 = tpu.matmul %31, %32, %cst_21 {dimension_numbers = #tpu.dot_dimension_numbers<[1], [0], [0], [1], [0, 0, 1, 1], [], []>} : vector<16x128xf32>, vector<128x128xf32>, vector<16x128xf32> -> vector<16x128xf32>
    %34 = tpu.iota {dimensions = array<i32: 0>} : vector<16x1xi32>
    %c8_i32 = arith.constant 8 : i32
    %35 = arith.muli %arg1, %c8_i32 : i32
    %c4_i32 = arith.constant 4 : i32
    %36 = arith.subi %35, %c4_i32 : i32
    %37 = vector.broadcast %36 : i32 to vector<16x1xi32>
    %38 = arith.addi %34, %37 : vector<16x1xi32>
    %c0_i32 = arith.constant 0 : i32
    %39 = vector.broadcast %c0_i32 : i32 to vector<16x1xi32>
    %40 = arith.cmpi sge, %38, %39 : vector<16x1xi32>
    %c8_i32_22 = arith.constant 8 : i32
    %41 = vector.broadcast %c8_i32_22 : i32 to vector<16x1xi32>
    %42 = arith.cmpi slt, %38, %41 : vector<16x1xi32>
    %43 = arith.andi %40, %42 : vector<16x1xi1>
    %44 = vector.extract_strided_slice %33 {offsets = [0, 0], sizes = [16, 80], strides = [1, 1]} : vector<16x128xf32> to vector<16x80xf32>
    %cst_23 = arith.constant 0.000000e+00 : f32
    %45 = vector.shape_cast %43 : vector<16x1xi1> to vector<16x1xi1>
    %46 = vector.broadcast %45 : vector<16x1xi1> to vector<16x80xi1>
    %47 = vector.broadcast %cst_23 : f32 to vector<16x80xf32>
    %48 = arith.select %46, %44, %47 : vector<16x80xi1>, vector<16x80xf32>
    %49 = vector.extract_strided_slice %48 {offsets = [4, 0], sizes = [8, 80], strides = [1, 1]} : vector<16x80xf32> to vector<8x80xf32>
    %cst_24 = arith.constant 0.000000e+00 : f32
    %50 = vector.broadcast %cst_24 : f32 to vector<8x80xf32>
    %cst_25 = arith.constant 0.000000e+00 : f32
    %51 = vector.broadcast %cst_25 : f32 to vector<8x80xf32>
    %52 = vector.extract_strided_slice %48 {offsets = [0, 0], sizes = [8, 80], strides = [1, 1]} : vector<16x80xf32> to vector<8x80xf32>
    %cst_26 = arith.constant 4.000000e-02 : f32
    %53 = vector.broadcast %cst_26 : f32 to vector<8x80xf32>
    %54 = arith.mulf %53, %52 : vector<8x80xf32>
    %55 = arith.addf %51, %54 : vector<8x80xf32>
    %56 = vector.extract_strided_slice %48 {offsets = [1, 0], sizes = [8, 80], strides = [1, 1]} : vector<16x80xf32> to vector<8x80xf32>
    %cst_27 = arith.constant 4.000000e-02 : f32
    %57 = vector.broadcast %cst_27 : f32 to vector<8x80xf32>
    %58 = arith.mulf %57, %56 : vector<8x80xf32>
    %59 = arith.addf %55, %58 : vector<8x80xf32>
    %60 = vector.extract_strided_slice %48 {offsets = [2, 0], sizes = [8, 80], strides = [1, 1]} : vector<16x80xf32> to vector<8x80xf32>
    %cst_28 = arith.constant -2.000000e-01 : f32
    %61 = vector.broadcast %cst_28 : f32 to vector<8x80xf32>
    %62 = arith.mulf %61, %60 : vector<8x80xf32>
    %63 = arith.addf %50, %62 : vector<8x80xf32>
    %cst_29 = arith.constant 0.00999999977 : f32
    %64 = vector.broadcast %cst_29 : f32 to vector<8x80xf32>
    %65 = arith.mulf %64, %60 : vector<8x80xf32>
    %66 = arith.addf %59, %65 : vector<8x80xf32>
    %67 = vector.extract_strided_slice %48 {offsets = [3, 0], sizes = [8, 80], strides = [1, 1]} : vector<16x80xf32> to vector<8x80xf32>
    %cst_30 = arith.constant -1.000000e-01 : f32
    %68 = vector.broadcast %cst_30 : f32 to vector<8x80xf32>
    %69 = arith.mulf %68, %67 : vector<8x80xf32>
    %70 = arith.addf %63, %69 : vector<8x80xf32>
    %cst_31 = arith.constant -4.000000e-02 : f32
    %71 = vector.broadcast %cst_31 : f32 to vector<8x80xf32>
    %72 = arith.mulf %71, %67 : vector<8x80xf32>
    %73 = arith.addf %66, %72 : vector<8x80xf32>
    %74 = vector.extract_strided_slice %48 {offsets = [4, 0], sizes = [8, 80], strides = [1, 1]} : vector<16x80xf32> to vector<8x80xf32>
    %cst_32 = arith.constant -1.000000e-01 : f32
    %75 = vector.broadcast %cst_32 : f32 to vector<8x80xf32>
    %76 = arith.mulf %75, %74 : vector<8x80xf32>
    %77 = arith.addf %73, %76 : vector<8x80xf32>
    %78 = vector.extract_strided_slice %48 {offsets = [5, 0], sizes = [8, 80], strides = [1, 1]} : vector<16x80xf32> to vector<8x80xf32>
    %cst_33 = arith.constant 1.000000e-01 : f32
    %79 = vector.broadcast %cst_33 : f32 to vector<8x80xf32>
    %80 = arith.mulf %79, %78 : vector<8x80xf32>
    %81 = arith.addf %70, %80 : vector<8x80xf32>
    %cst_34 = arith.constant -4.000000e-02 : f32
    %82 = vector.broadcast %cst_34 : f32 to vector<8x80xf32>
    %83 = arith.mulf %82, %78 : vector<8x80xf32>
    %84 = arith.addf %77, %83 : vector<8x80xf32>
    %85 = vector.extract_strided_slice %48 {offsets = [6, 0], sizes = [8, 80], strides = [1, 1]} : vector<16x80xf32> to vector<8x80xf32>
    %cst_35 = arith.constant 2.000000e-01 : f32
    %86 = vector.broadcast %cst_35 : f32 to vector<8x80xf32>
    %87 = arith.mulf %86, %85 : vector<8x80xf32>
    %88 = arith.addf %81, %87 : vector<8x80xf32>
    %cst_36 = arith.constant 0.00999999977 : f32
    %89 = vector.broadcast %cst_36 : f32 to vector<8x80xf32>
    %90 = arith.mulf %89, %85 : vector<8x80xf32>
    %91 = arith.addf %84, %90 : vector<8x80xf32>
    %92 = vector.extract_strided_slice %48 {offsets = [7, 0], sizes = [8, 80], strides = [1, 1]} : vector<16x80xf32> to vector<8x80xf32>
    %cst_37 = arith.constant 4.000000e-02 : f32
    %93 = vector.broadcast %cst_37 : f32 to vector<8x80xf32>
    %94 = arith.mulf %93, %92 : vector<8x80xf32>
    %95 = arith.addf %91, %94 : vector<8x80xf32>
    %96 = vector.extract_strided_slice %48 {offsets = [8, 0], sizes = [8, 80], strides = [1, 1]} : vector<16x80xf32> to vector<8x80xf32>
    %cst_38 = arith.constant 4.000000e-02 : f32
    %97 = vector.broadcast %cst_38 : f32 to vector<8x80xf32>
    %98 = arith.mulf %97, %96 : vector<8x80xf32>
    %99 = arith.addf %95, %98 : vector<8x80xf32>
    %100 = tpu.concatenate %49, %88, %99 in 1 : vector<8x80xf32>, vector<8x80xf32>, vector<8x80xf32> -> vector<8x240xf32>
    %c0_39 = arith.constant 0 : index
    %c0_40 = arith.constant 0 : index
    %c0_41 = arith.constant 0 : index
    %101 = vector.load %arg6[%c0_39, %c0_40, %c0_41] : memref<1x8x240xf32, #tpu.memory_space<vmem>>, vector<1x8x240xf32>
    %102 = vector.shape_cast %101 : vector<1x8x240xf32> to vector<8x240xf32>
    %103 = vector.shape_cast %100 : vector<8x240xf32> to vector<1x8x240xf32>
    tpu.vector_store %arg6[%c0_39, %c0_40, %c0_41], %103 {strides = array<i32>} : memref<1x8x240xf32, #tpu.memory_space<vmem>>, vector<1x8x240xf32>,
    return
  }
  func.func @transform_0(%arg0: i32, %arg1: i32) -> (i32, i32, i32, i32) {
    %c0_i32 = arith.constant 0 : i32
    %c0_i32_0 = arith.constant 0 : i32
    %c0_i32_1 = arith.constant 0 : i32
    return %arg0, %arg1, %c0_i32, %c0_i32_0 : i32, i32, i32, i32
  }
  func.func @transform_1(%arg0: i32, %arg1: i32) -> (i32, i32, i32) {
    %c0_i32 = arith.constant 0 : i32
    %c0_i32_0 = arith.constant 0 : i32
    %c0_i32_1 = arith.constant 0 : i32
    %c0_i32_2 = arith.constant 0 : i32
    return %c0_i32, %c0_i32_0, %c0_i32_1 : i32, i32, i32
  }
  func.func @transform_2(%arg0: i32, %arg1: i32) -> (i32, i32) {
    %c0_i32 = arith.constant 0 : i32
    %c0_i32_0 = arith.constant 0 : i32
    %c0_i32_1 = arith.constant 0 : i32
    return %c0_i32, %c0_i32_0 : i32, i32
  }
  func.func @transform_3(%arg0: i32, %arg1: i32) -> (i32, i32) {
    %c0_i32 = arith.constant 0 : i32
    %c0_i32_0 = arith.constant 0 : i32
    %c0_i32_1 = arith.constant 0 : i32
    return %c0_i32, %c0_i32_0 : i32, i32
  }
  func.func @transform_4(%arg0: i32, %arg1: i32) -> (i32, i32, i32) {
    %c0_i32 = arith.constant 0 : i32
    %c0_i32_0 = arith.constant 0 : i32
    return %arg0, %arg1, %c0_i32 : i32, i32, i32
  }
}

</mosaic_0001>

<bundles_post_ra>
// kernel: feature_extractor.1
= control target key start
LH: loop header
LB: loop body
LE: loop exit
PB: predicated region body
PF: predicated region fallthrough
CT: control target
= control target key end

     0   :  { %s6451_s0 = inlined_call_operand.hbm [shape: bf16[2,1,32,256], index: 0, kind: input, shape index: {}]   ;;  %s6452_s1 = inlined_call_operand.hbm [shape: bf16[4,256,1024], index: 1, kind: input, shape index: {}]   ;;  %s6453_s2 = inlined_call_operand.hbm [shape: bf16[512,128], index: 2, kind: input, shape index: {}]   ;;  %s6454_s3 = inlined_call_operand.hbm [shape: f32[128,128], index: 3, kind: input, shape index: {}]   ;;  %s6455_s4 = inlined_call_operand.hbm [shape: f32[2,8,240], index: 4, kind: output, shape index: {}]  }
   0x1   :  { %6460 = sst [smem:[#allocation15_spill]] %s6452_s1 }
   0x2   :  { %9 = vsyncpa [#allocation3], 0 }
   0x3   :  { %11 = vsyncpa [#allocation3 + $0x1], 0 }
   0x4   :  { %12 = vsyncpa [#allocation6], 0 }
   0x5   :  { %13 = vsyncpa [#allocation9], 0 }
   0x6   :  { %14 = vsyncpa [#allocation4], 0 }
   0x7   :  { %16 = vsyncpa [#allocation4 + $0x1], 0  ;;  %s6028_s15 = smov 0   ;;  %s6030_s16 = smov 0  }
   0x8   :  { %s6032_s17 = smov 0   ;;  %s6034_s18 = smov 0  }
   0x9   :  { %s6036_s19 = smov 0   ;;  %s6038_s20 = smov 0  }
   0xa LB: > { %s4892_s21 = sadd.s32 4294967295, %s5988_s20   ;;  %s4893_s22 = sadd.s32 4294967294, %s5988_s20   ;;  %s5988_s20 = sphi %s6038_s20, %s22_s20   ;;  %s5984_s19 = sphi %s6036_s19, %s6481_s19   ;;  %s5980_s18 = sphi %s6034_s18, %s6480_s18   ;;  %s5976_s17 = sphi %s6032_s17, %s6479_s17   ;;  %s5972_s16 = sphi %s6030_s16, %s6478_s16   ;;  %s5968_s15 = sphi %s6028_s15, %s6477_s15  }
   0xb   : > { %p56_p0 = scmp.ne.s32.totalorder %s5972_s16, %s5968_s15  ;;  %p6062_p1 = scmp.eq.s32.totalorder %s4892_s21, 0 }
   0xc   : > { %p6066_p2 = scmp.eq.s32.totalorder %s4892_s21, 1  ;;  %p151_p3 = scmp.eq.s32.totalorder %s4893_s22, 1 }
   0xd   : > { %s6461_s23 = scalar_select %p6062_p1, 1, 0 }
   0xe   : > { %s6462_s24 = scalar_select %p6066_p2, 1, 0 }
   0xf   : > { %p6072_p4 = por %p6062_p1, %p56_p0  ;;  %p4894_p5 = scmp.ge.s32.totalorder %s5988_s20, 1 }
  0x10   : > { %p6077_p6 = por %p151_p3, %p56_p0  ;;  %p158_p7 = scmp.lt.s32.totalorder %s5988_s20, 3 }
  0x11   : > { %s6463_s25 = scalar_select %p6072_p4, 1, 0 }
  0x12   : > { %s6464_s26 = scalar_select %p6077_p6, 1, 0 }
  0x13   : > { %p6082_p8 = pnand %p4894_p5, %p158_p7  ;;  %s5990_s28 = smov [#allocation5]  }
  0x14   : > { %s170_s29 = sshll.u32 %s5990_s28, 4  ;;  %s5991_s5 = smov [#allocation7]   ;;  %s6086_s29 = int_to_ptr.vmem [resolvable:$true] %s170_s29 }
  0x15   : > { %s6465_s27 = scalar_select %p6082_p8, 1, 0 }
  0x16   : > { %p5656_p9 = pneg %p6082_p8  ;;  %s183_s6 = sshll.u32 %s5991_s5, 4  ;;  %s6097_s6 = int_to_ptr.vmem [resolvable:$true] %s183_s6 }
  0x17   : > { %s6467_s1 = sld [smem:[#allocation15_spill]] }
  0x18   : > { %p6093_p11 = pnand %p5656_p9, %p6062_p1 }
  0x1a   : > { %p6107_p13 = pneg %p6093_p11 }
  0x1d   : > { %s5784_s9 = scalar_lea.hbm %s6467_s1, 65536 }
  0x1e   : > { %p5785_p12 = scmp.ne.s32.totalorder %s6467_s1, %s5784_s9  ;;  %p5791_p5 = scmp.lt.u32.totalorder %s5784_s9, %s6467_s1 }
  0x20   : > { %p5787_p0 = pnand %p6107_p13, %p5785_p12 }
  0x22   : > { %p5788_p3 = pneg %p5787_p0 }
  0x24   : > { %p5793_p7 = pnand %p5791_p5, %p5788_p3 }
  0x26   : > { %5796 = shalt.err (!%p5793_p7)
}
  0x27   : > { %s5797_s21 = scalar_lea.vmem %s6086_s29, 65536  ;;  %p5805_p1 = scmp.lt.s32.totalorder %s6086_s29, %s6086_s29 }
  0x28   : > { %p5798_p9 = scmp.ne.s32.totalorder %s6086_s29, %s5797_s21  ;;  %p5806_p4 = scmp.lt.s32.totalorder %s5797_s21, %s5797_s21 }
  0x2a   : > { %p5800_p10 = pnand %p5798_p9, %p6107_p13  ;;  %p5807_p12 = por %p5806_p4, %p5805_p1 }
  0x2c   : > { %p5801_p6 = pneg %p5800_p10 }
  0x2e   : > { %p5808_p0 = pnand %p5807_p12, %p5801_p6 }
  0x30   : > { %5811 = shalt.err (!%p5808_p0)
}
  0x31   : > { %s5992_s22 = smov 512   ;;  %s5993_s28 = smov 32  }
  0x32   : > { %5659 = dma.hbm_to_vmem [thread:$0]  (!%p6093_p11), %s6467_s1, 65536, %s6086_s29, [#allocation6], %s5992_s22, %s5992_s22, %s5993_s28  }
  0x33   : > { %s5812_s10 = scalar_lea.hbm %s6453_s2, 4096 }
  0x34   : > { %p5813_p1 = scmp.ne.s32.totalorder %s6453_s2, %s5812_s10  ;;  %p5819_p10 = scmp.lt.u32.totalorder %s5812_s10, %s6453_s2 }
  0x36   : > { %p5815_p4 = pnand %p5813_p1, %p6107_p13 }
  0x38   : > { %p5816_p6 = pneg %p5815_p4 }
  0x3a   : > { %p5821_p3 = pnand %p5819_p10, %p5816_p6 }
  0x3c   : > { %5824 = shalt.err (!%p5821_p3)
}
  0x3d   : > { %s5825_s29 = scalar_lea.vmem %s6097_s6, 4096  ;;  %p5833_p12 = scmp.lt.s32.totalorder %s6097_s6, %s6097_s6 }
  0x3e   : > { %p5826_p5 = scmp.ne.s32.totalorder %s6097_s6, %s5825_s29  ;;  %p5834_p0 = scmp.lt.s32.totalorder %s5825_s29, %s5825_s29 }
  0x40   : > { %p5828_p7 = pnand %p5826_p5, %p6107_p13  ;;  %p5835_p1 = por %p5834_p0, %p5833_p12 }
  0x42   : > { %p5829_p9 = pneg %p5828_p7 }
  0x44   : > { %p5836_p4 = pnand %p5835_p1, %p5829_p9 }
  0x46   : > { %5839 = shalt.err (!%p5836_p4)
}
  0x47   : > { %s5994_s22 = smov 64   ;;  %s5995_s28 = smov 4  }
  0x48   : > { %5662 = dma.hbm_to_vmem [thread:$0]  (!%p6093_p11), %s6453_s2, 4096, %s6097_s6, [#allocation6], %s5994_s22, %s5994_s22, %s5995_s28  }
  0x49   : > { %s5996_s8 = smov [#allocation8]   ;;  %s5840_s13 = scalar_lea.hbm %s6454_s3, 2048 }
  0x4a   : > { %s196_s9 = sshll.u32 %s5996_s8, 4  ;;  %p5841_p6 = scmp.ne.s32.totalorder %s6454_s3, %s5840_s13  ;;  %s197_s9 = int_to_ptr.vmem [resolvable:$true] %s196_s9 }
  0x4b   : > { %p5847_p5 = scmp.lt.u32.totalorder %s5840_s13, %s6454_s3 }
  0x4c   : > { %p5843_p10 = pnand %p5841_p6, %p6107_p13 }
  0x4e   : > { %p5844_p3 = pneg %p5843_p10 }
  0x50   : > { %p5849_p7 = pnand %p5847_p5, %p5844_p3 }
  0x52   : > { %5852 = shalt.err (!%p5849_p7)
}
  0x53   : > { %s5853_s6 = scalar_lea.vmem %s197_s9, 2048  ;;  %p5861_p1 = scmp.lt.s32.totalorder %s197_s9, %s197_s9 }
  0x54   : > { %p5854_p9 = scmp.ne.s32.totalorder %s197_s9, %s5853_s6  ;;  %p5862_p4 = scmp.lt.s32.totalorder %s5853_s6, %s5853_s6 }
  0x56   : > { %p5856_p12 = pnand %p5854_p9, %p6107_p13  ;;  %p5863_p8 = por %p5862_p4, %p5861_p1 }
  0x58   : > { %p5857_p0 = pneg %p5856_p12 }
  0x5a   : > { %p5864_p2 = pnand %p5863_p8, %p5857_p0 }
  0x5c   : > { %5867 = shalt.err (!%p5864_p2)
}
  0x5d   : > { %s5997_s22 = smov 128   ;;  %s5998_s1 = smov 8  }
  0x5e   : > { %5665 = dma.hbm_to_vmem [thread:$0]  (!%p6093_p11), %s6454_s3, 2048, %s197_s9, [#allocation9], %s5997_s22, %s5997_s22, %s5998_s1  }
  0x5f   : > { %s43_s5 = sadd.s32 1, %s5976_s17  ;;  %s34_s7 = sadd.s32 1, %s5984_s19 }
  0x60   : > { %p50_p2 = scmp.ne.s32.totalorder %s5976_s17, %s5972_s16  ;;  %p36_p8 = scmp.ge.s32.totalorder %s34_s7, 2 }
  0x61   : > { %p51_p13 = scmp.eq.s32.totalorder %s5988_s20, 0  ;;  %p6469_p6 = scmp.ne.s32.totalorder %s6462_s24, 0 }
  0x62   : > { %p5677_p3 = scmp.lt.s32.totalorder %s5988_s20, 2  ;;  %s6483_s7 = smov (%p36_p8, %s34_s7), 0 }
  0x63   : > { %p6179_p10 = por %p6469_p6, %p50_p2  ;;  %p52_p5 = por %p51_p13, %p50_p2 }
  0x64   : > { %s210_s30 = sand.u32 1, %s5976_s17   ;;  %s38_s10 = ssub.s32 %s5984_s19, %s6483_s7 }
  0x65   : > { %p41_p7 = scmp.eq.s32.totalorder %s38_s10, 0  ;;  %s4899_s9 = sshll.u32 %s210_s30, 5 }
  0x66   : > { %s5461_s11 = sshll.u32 %s5984_s19, 9  ;;  %s214_s29 = scalar_lea.vmem [#allocation2], %s4899_s9 }
  0x67   : > { %s6191_s13 = scalar_select %p41_p7, %s5976_s17, %s43_s5  }
  0x68   : > { %s6196_s24 = scalar_lea.hbm %s6451_s0, %s5461_s11  ;;  %s223_s6 = sshll.u32 %s214_s29, 4  ;;  %s6198_s6 = int_to_ptr.vmem [resolvable:$true] %s223_s6 }
  0x69   : > { %p6202_p11 = pnand %p5677_p3, %p52_p5  ;;  %s6206_s28 = scalar_lea.sflag [#allocation3], %s210_s30 }
  0x6a   : > { %s5868_s5 = scalar_lea.hbm %s6196_s24, 512  ;;  %s5873_s11 = scalar_lea.hbm %s6451_s0, 1024 }
  0x6b   : > { %p5869_p9 = scmp.ne.s32.totalorder %s6196_s24, %s5868_s5  ;;  %p5870_p12 = pneg %p6202_p11 }
  0x6c   : > { %p5874_p4 = scmp.lt.u32.totalorder %s6196_s24, %s6451_s0  ;;  %p5875_p2 = scmp.lt.u32.totalorder %s5873_s11, %s5868_s5 }
  0x6d   : > { %p5871_p0 = pnand %p5870_p12, %p5869_p9  ;;  %p5877_p13 = scmp.lt.u32.totalorder %s5868_s5, %s6196_s24 }
  0x6e   : > { %p5876_p8 = por %p5875_p2, %p5874_p4 }
  0x6f   : > { %p5872_p1 = pneg %p5871_p0 }
  0x70   : > { %p5878_p6 = por %p5877_p13, %p5876_p8 }
  0x72   : > { %p5879_p3 = pnand %p5878_p6, %p5872_p1 }
  0x74   : > { %5882 = shalt.err (!%p5879_p3)
}
  0x75   : > { %s5883_s30 = scalar_lea.vmem %s6198_s6, 512  ;;  %s5999_s29 = smov [#allocation2]  }
  0x76   : > { %p5884_p5 = scmp.ne.s32.totalorder %s6198_s6, %s5883_s30  ;;  %s5888_s10 = sshll.u32 %s5999_s29, 4  ;;  %s5889_s10 = int_to_ptr.vmem [resolvable:$false] %s5888_s10 }
  0x77   : > { %s5890_s9 = scalar_lea.vmem %s5889_s10, 1024  ;;  %p5891_p0 = scmp.lt.s32.totalorder %s6198_s6, %s5889_s10 }
  0x78   : > { %p5886_p7 = pnand %p5884_p5, %p5870_p12  ;;  %p5892_p4 = scmp.lt.s32.totalorder %s5890_s9, %s5883_s30 }
  0x7a   : > { %p5887_p9 = pneg %p5886_p7  ;;  %p5893_p2 = por %p5892_p4, %p5891_p0 }
  0x7c   : > { %p5894_p8 = pnand %p5893_p2, %p5887_p9 }
  0x7e   : > { %5897 = shalt.err (!%p5894_p8)
}
  0x7f   : > { %5669 = dma.hbm_to_vmem [thread:$0]  (!%p6202_p11), %s6196_s24, 512, %s6198_s6, %s6206_s28, %s5997_s22, %s5997_s22, %s5998_s1  }
  0x80   : > { %p6472_p12 = scmp.ne.s32.totalorder %s6465_s27, 0 }
  0x81   : > { %s6240_s5 = sand.u32 (!%p6472_p12), 1, %s5972_s16   ;;  %p6473_p1 = scmp.ne.s32.totalorder (!%p6472_p12), %s6463_s25, 0 }
  0x82   : > { %235 = sbr.rel (%p6472_p12) target bundleno = 1490 (0x5d2), region = 36  ;;  %s4903_s11 = sshll.u32 (!%p6472_p12), %s6240_s5, 5 }
  0x83   : > { %s238_s14 = scalar_lea.sflag (!%p6472_p12), [#allocation3], %s6240_s5  ;;  %s6244_s21 = scalar_lea.vmem (!%p6472_p12), [#allocation2], %s4903_s11 }
  0x89   : > { %5951 = dma.done.wait (%p6473_p1), %s238_s14, 512  }
  0x8a   : > { %5953 = vsyncadd (%p6473_p1), %s238_s14, 4294966784  ;;  %p6474_p11 = scmp.ne.s32.totalorder %s6461_s23, 0 }
  0x8c   : > { %5955 = dma.done.wait (%p6474_p11), [#allocation6], 69632  }
  0x8d   : > { %5957 = vsyncadd (%p6474_p11), [#allocation6], 4294897664 }
  0x8e   : > { %5959 = dma.done.wait (%p6474_p11), [#allocation9], 2048  }
  0x8f   : > { %5961 = vsyncadd (%p6474_p11), [#allocation9], 4294965248  ;;  %v411_v0 = vld [vmem:[#allocation5 + $0x400] sm:$0xff]  ;;  %v412_v2 = vld [vmem:[#allocation5 + $0x408] sm:$0xff]  ;;  %vm552_vm0 = vsmask.f32 7424 }
  0x90   : > { %v415_v1 = vld [vmem:[#allocation5 + $0x420] sm:$0xff]  ;;  %v416_v4 = vld [vmem:[#allocation5 + $0x428] sm:$0xff]  ;;  %v6259_v56 = vld [vmem:[%s6244_s21 + $0x10] sm:$0xff]  ;;  %vm2334_vm1 = vcmask 1046528   ;;  %vm3300_vm2 = vsmask.f32 6400 }
  0x91   : > { %v4913_v3 = vcombine.high %v411_v0, %v415_v1  ;;  %v4912_v5 = vcombine.low %v411_v0, %v415_v1  ;;  %v419_v6 = vld [vmem:[#allocation5 + $0x440] sm:$0xff]  ;;  %v4915_v8 = vcombine.high %v412_v2, %v416_v4  ;;  %v4914_v9 = vcombine.low %v412_v2, %v416_v4  ;;  %v420_v11 = vld [vmem:[#allocation5 + $0x448] sm:$0xff]  ;;  %s6000_s23 = smov 80   ;;  %s6001_s25 = smov 32  }
  0x92   : > { %v423_v7 = vld [vmem:[#allocation5 + $0x460] sm:$0xff]  ;;  %v424_v12 = vld [vmem:[#allocation5 + $0x468] sm:$0xff]  ;;  %v6266_v60 = vcombine.high %v6259_v56, %v6259_v56  ;;  %vm4672_vm5 = vcmask 1044480   ;;  %vm4678_vm6 = vcmask 1043456   ;;  %vm4651_vm7 = vcmask 1045504   ;;  %s4907_s27 = sshll.u32 %s6240_s5, 4 }
  0x93   : > { %v4921_v10 = vcombine.high %v419_v6, %v423_v7  ;;  %v427_v13 = vld [vmem:[#allocation5 + $0x480] sm:$0xff]  ;;  %1219 = vmatprep.subr.bf16.mxu0 %v4913_v3  ;;  %v4923_v14 = vcombine.high %v420_v11, %v424_v12  ;;  %v428_v16 = vld [vmem:[#allocation5 + $0x488] sm:$0xff]  ;;  %1262 = vmatprep.subr.bf16.mxu1 %v4915_v8  ;;  %v4920_v18 = vcombine.low %v419_v6, %v423_v7  ;;  %vm4712_vm8 = vcmask 1041408   ;;  %s277_s22 = scalar_lea.vmem [#allocation10], %s4907_s27  ;;  %s5462_s1 = sshll.u32 %s5980_s18, 8 }
  0x94   : > { %v431_v15 = vld [vmem:[#allocation5 + $0x4a0] sm:$0xff]  ;;  %v432_v17 = vld [vmem:[#allocation5 + $0x4a8] sm:$0xff]  ;;  %1220 = vmatpush1.bf16.msra.mxu0 %v4912_v5  ;;  %1263 = vmatpush1.bf16.msra.mxu1 %v4914_v9  ;;  %v4922_v19 = vcombine.low %v420_v11, %v424_v12  ;;  %v573_v2 = vshll.u32 %v6266_v60, 16  ;;  %vm4695_vm9 = vcmask 1042432   ;;  %vm4718_vm10 = vcmask 1040384   ;;  %s4779_s24 = sshll.u32 %s277_s22, 4  ;;  %s6401_s28 = scalar_lea.hbm %s6455_s4, %s5462_s1  ;;  %s6403_s24 = int_to_ptr.vmem [resolvable:$true] %s4779_s24 }
  0x95   : > { %1221 = vmatprep.subr.bf16.mxu0 %v4921_v10  ;;  %v4929_v20 = vcombine.high %v427_v13, %v431_v15  ;;  %1264 = vmatprep.subr.bf16.mxu1 %v4923_v14  ;;  %v4931_v21 = vcombine.high %v428_v16, %v432_v17  ;;  %v435_v22 = vld [vmem:[#allocation5 + $0x4c0] sm:$0xff]  ;;  %v436_v24 = vld [vmem:[#allocation5 + $0x4c8] sm:$0xff]  ;;  %v4928_v26 = vcombine.low %v427_v13, %v431_v15  ;;  %vm4741_vm11 = vcmask 654336   ;;  %s4763_s18 = scalar_lea.sflag [#allocation4], %s6240_s5  ;;  %s5898_s30 = scalar_lea.vmem %s6403_s24, 256 }
  0x96   : > { %v439_v23 = vld [vmem:[#allocation5 + $0x4e0] sm:$0xff]  ;;  %v440_v25 = vld [vmem:[#allocation5 + $0x4e8] sm:$0xff]  ;;  %v4930_v27 = vcombine.low %v428_v16, %v432_v17  ;;  %v575_v9 = vrot.slane %v573_v2, 1  ;;  %vm4744_vm12 = vcmask 261120   ;;  %vm4760_vm13 = vcmask 916480   ;;  %p5899_p13 = scmp.ne.s32.totalorder %s6403_s24, %s5898_s30  ;;  %s6002_s29 = smov [#allocation10]  }
  0x97   : > { %v4937_v28 = vcombine.high %v435_v22, %v439_v23  ;;  %v4939_v29 = vcombine.high %v436_v24, %v440_v25  ;;  %v443_v30 = vld [vmem:[#allocation5 + $0x500] sm:$0xff]  ;;  %v444_v32 = vld [vmem:[#allocation5 + $0x508] sm:$0xff]  ;;  %v4936_v34 = vcombine.low %v435_v22, %v439_v23  ;;  %v4938_v35 = vcombine.low %v436_v24, %v440_v25  ;;  %s5902_s10 = sshll.u32 %s6002_s29, 4  ;;  %s5903_s10 = int_to_ptr.vmem [resolvable:$false] %s5902_s10 }
  0x98   : > { %1222 = vmatpush1.bf16.msra.mxu0 %v4920_v18  ;;  %1265 = vmatpush1.bf16.msra.mxu1 %v4922_v19  ;;  %v447_v31 = vld [vmem:[#allocation5 + $0x520] sm:$0xff]  ;;  %v448_v33 = vld [vmem:[#allocation5 + $0x528] sm:$0xff]  ;;  %p5900_p6 = pnand %p5899_p13, %p6179_p10  ;;  %s5904_s9 = scalar_lea.vmem %s5903_s10, 512 }
  0x99   : > { %1223 = vmatprep.subr.bf16.mxu0 %v4929_v20  ;;  %1266 = vmatprep.subr.bf16.mxu1 %v4931_v21  ;;  %v4945_v36 = vcombine.high %v443_v30, %v447_v31  ;;  %v4947_v37 = vcombine.high %v444_v32, %v448_v33  ;;  %v451_v38 = vld [vmem:[#allocation5 + $0x540] sm:$0xff]  ;;  %v452_v40 = vld [vmem:[#allocation5 + $0x548] sm:$0xff]  ;;  %v4944_v42 = vcombine.low %v443_v30, %v447_v31  ;;  %p5905_p5 = scmp.lt.s32.totalorder %s6403_s24, %s5903_s10  ;;  %p5906_p7 = scmp.lt.s32.totalorder %s5904_s9, %s5898_s30 }
  0x9a   : > { %v455_v39 = vld [vmem:[#allocation5 + $0x560] sm:$0xff]  ;;  %v456_v41 = vld [vmem:[#allocation5 + $0x568] sm:$0xff]  ;;  %v4946_v43 = vcombine.low %v444_v32, %v448_v33  ;;  %p5901_p3 = pneg %p5900_p6 }
  0x9b   : > { %v4953_v44 = vcombine.high %v451_v38, %v455_v39  ;;  %v4955_v45 = vcombine.high %v452_v40, %v456_v41  ;;  %v459_v46 = vld [vmem:[#allocation5 + $0x580] sm:$0xff]  ;;  %v460_v48 = vld [vmem:[#allocation5 + $0x588] sm:$0xff]  ;;  %v4952_v50 = vcombine.low %v451_v38, %v455_v39  ;;  %v4954_v51 = vcombine.low %v452_v40, %v456_v41  ;;  %p5907_p9 = por %p5906_p7, %p5905_p5 }
  0x9c   : > { %1224 = vmatpush1.bf16.msra.mxu0 %v4928_v26  ;;  %1267 = vmatpush1.bf16.msra.mxu1 %v4930_v27  ;;  %v463_v47 = vld [vmem:[#allocation5 + $0x5a0] sm:$0xff]  ;;  %v464_v49 = vld [vmem:[#allocation5 + $0x5a8] sm:$0xff] }
  0x9d   : > { %1225 = vmatprep.subr.bf16.mxu0 %v4937_v28  ;;  %1268 = vmatprep.subr.bf16.mxu1 %v4939_v29  ;;  %v4961_v52 = vcombine.high %v459_v46, %v463_v47  ;;  %v467_v53 = vld [vmem:[#allocation5 + $0x5c0] sm:$0xff]  ;;  %v4963_v54 = vcombine.high %v460_v48, %v464_v49  ;;  %v468_v58 = vld [vmem:[#allocation5 + $0x5c8] sm:$0xff]  ;;  %v4960_v61 = vcombine.low %v459_v46, %v463_v47  ;;  %p5908_p0 = pnand %p5907_p9, %p5901_p3 }
  0x9e   : > { %v471_v55 = vld [vmem:[#allocation5 + $0x5e0] sm:$0xff]  ;;  %v472_v59 = vld [vmem:[#allocation5 + $0x5e8] sm:$0xff]  ;;  %v4962_v0 = vcombine.low %v460_v48, %v464_v49 }
  0x9f   : > { %v6262_v57 = vld [vmem:[%s6244_s21 + $0x4] ss:$8 sps:$4 sm:$0xff]   ;;  %v4969_v1 = vcombine.high %v467_v53, %v471_v55  ;;  %v4971_v3 = vcombine.high %v468_v58, %v472_v59  ;;  %v4968_v10 = vcombine.low %v467_v53, %v471_v55  ;;  %v4970_v12 = vcombine.low %v468_v58, %v472_v59  ;;  %v6283_v53 = vld [vmem:[%s6244_s21] ss:$8 sps:$4 sm:$0xff]  }
  0xa0   : > { %1226 = vmatpush1.bf16.msra.mxu0 %v4936_v34  ;;  %1269 = vmatpush1.bf16.msra.mxu1 %v4938_v35  ;;  %v566_v62 = vshrl.u32 %v6262_v57, 16  ;;  %v568_v63 = vshll.u32 %v6262_v57, 16  ;;  %v475_v4 = vld [vmem:[#allocation5 + $0x600] sm:$0xff]  ;;  %v476_v7 = vld [vmem:[#allocation5 + $0x608] sm:$0xff] }
  0xa1   : > { %1227 = vmatprep.subr.bf16.mxu0 %v4945_v36  ;;  %1270 = vmatprep.subr.bf16.mxu1 %v4947_v37  ;;  %v479_v5 = vld [vmem:[#allocation5 + $0x620] sm:$0xff]  ;;  %v480_v8 = vld [vmem:[#allocation5 + $0x628] sm:$0xff] }
  0xa2   : > { %v570_v6 = vrot.slane %v568_v63, 1  ;;  %v4977_v13 = vcombine.high %v475_v4, %v479_v5  ;;  %v4979_v14 = vcombine.high %v476_v7, %v480_v8  ;;  %v483_v15 = vld [vmem:[#allocation5 + $0x640] sm:$0xff]  ;;  %v484_v18 = vld [vmem:[#allocation5 + $0x648] sm:$0xff]  ;;  %v4976_v20 = vcombine.low %v475_v4, %v479_v5 }
  0xa3   : > { %v487_v16 = vld [vmem:[#allocation5 + $0x660] sm:$0xff]  ;;  %v488_v19 = vld [vmem:[#allocation5 + $0x668] sm:$0xff]  ;;  %v4978_v21 = vcombine.low %v476_v7, %v480_v8  ;;  %v6287_v4 = vcombine.low %v6259_v56, %v6259_v56  ;;  %v556_v5 = vshll.u32 %v6283_v53, 16 }
  0xa4   : > { %1228 = vmatpush1.bf16.msra.mxu0 %v4944_v42  ;;  %1271 = vmatpush1.bf16.msra.mxu1 %v4946_v43  ;;  %v571_v11 = vor.u32 %v570_v6, %v566_v62  ;;  %v4985_v22 = vcombine.high %v483_v15, %v487_v16  ;;  %v4987_v23 = vcombine.high %v484_v18, %v488_v19  ;;  %v491_v24 = vld [vmem:[#allocation5 + $0x680] sm:$0xff]  ;;  %v492_v26 = vld [vmem:[#allocation5 + $0x688] sm:$0xff] }
  0xa5   : > { %1229 = vmatprep.subr.bf16.mxu0 %v4953_v44  ;;  %1272 = vmatprep.subr.bf16.mxu1 %v4955_v45  ;;  %v495_v25 = vld [vmem:[#allocation5 + $0x6a0] sm:$0xff]  ;;  %v496_v27 = vld [vmem:[#allocation5 + $0x6a8] sm:$0xff]  ;;  %v4984_v28 = vcombine.low %v483_v15, %v487_v16  ;;  %v4986_v29 = vcombine.low %v484_v18, %v488_v19  ;;  %v558_v56 = vrot.slane %v556_v5, 1  ;;  %v561_v15 = vshll.u32 %v6287_v4, 16 }
  0xa6   : > { %v6278_v17 = vsel %vm552_vm0, %v571_v11, %v575_v9  ;;  %v4993_v30 = vcombine.high %v491_v24, %v495_v25  ;;  %v4995_v31 = vcombine.high %v492_v26, %v496_v27  ;;  %v499_v32 = vld [vmem:[#allocation5 + $0x6c0] sm:$0xff]  ;;  %v500_v34 = vld [vmem:[#allocation5 + $0x6c8] sm:$0xff]  ;;  %v4992_v36 = vcombine.low %v491_v24, %v495_v25 }
  0xa7   : > { %1251 = vmatprep.mubr.bf16.mxu0 %v6278_v17  ;;  %1294 = vmatprep.mubr.bf16.mxu1 %v6278_v17  ;;  %v503_v33 = vld [vmem:[#allocation5 + $0x6e0] sm:$0xff]  ;;  %v504_v35 = vld [vmem:[#allocation5 + $0x6e8] sm:$0xff]  ;;  %v4994_v37 = vcombine.low %v492_v26, %v496_v27  ;;  %v563_v26 = vrot.slane %v561_v15, 1 }
  0xa8   : > { %1230 = vmatpush1.bf16.msra.mxu0 %v4952_v50  ;;  %1273 = vmatpush1.bf16.msra.mxu1 %v4954_v51  ;;  %v5001_v38 = vcombine.high %v499_v32, %v503_v33  ;;  %v5003_v39 = vcombine.high %v500_v34, %v504_v35  ;;  %v507_v40 = vld [vmem:[#allocation5 + $0x700] sm:$0xff]  ;;  %v508_v42 = vld [vmem:[#allocation5 + $0x708] sm:$0xff]  ;;  %v5000_v44 = vcombine.low %v499_v32, %v503_v33  ;;  %v422_v32 = vld [vmem:[#allocation5 + $0x458] sm:$0xff] }
  0xa9   : > { %1231 = vmatprep.subr.bf16.mxu0 %v4961_v52  ;;  %1274 = vmatprep.subr.bf16.mxu1 %v4963_v54  ;;  %v511_v41 = vld [vmem:[#allocation5 + $0x720] sm:$0xff]  ;;  %v512_v43 = vld [vmem:[#allocation5 + $0x728] sm:$0xff]  ;;  %v5002_v45 = vcombine.low %v500_v34, %v504_v35  ;;  %v426_v33 = vld [vmem:[#allocation5 + $0x478] sm:$0xff] }
  0xaa   : > { %v5009_v46 = vcombine.high %v507_v40, %v511_v41  ;;  %v5011_v47 = vcombine.high %v508_v42, %v512_v43  ;;  %v515_v48 = vld [vmem:[#allocation5 + $0x740] sm:$0xff]  ;;  %v516_v50 = vld [vmem:[#allocation5 + $0x748] sm:$0xff]  ;;  %v5008_v52 = vcombine.low %v507_v40, %v511_v41  ;;  %v5010_v54 = vcombine.low %v508_v42, %v512_v43  ;;  %v433_v40 = vld [vmem:[#allocation5 + $0x4b0] sm:$0xff] }
  0xab   : > { %v519_v49 = vld [vmem:[#allocation5 + $0x760] sm:$0xff]  ;;  %v520_v51 = vld [vmem:[#allocation5 + $0x768] sm:$0xff]  ;;  %v430_v41 = vld [vmem:[#allocation5 + $0x498] sm:$0xff] }
  0xac   : > { %1232 = vmatpush1.bf16.msra.mxu0 %v4960_v61  ;;  %1275 = vmatpush1.bf16.msra.mxu1 %v4962_v0  ;;  %v5017_v55 = vcombine.high %v515_v48, %v519_v49  ;;  %v5019_v58 = vcombine.high %v516_v50, %v520_v51  ;;  %v523_v59 = vld [vmem:[#allocation5 + $0x780] sm:$0xff]  ;;  %v524_v0 = vld [vmem:[#allocation5 + $0x788] sm:$0xff]  ;;  %v5018_v6 = vcombine.low %v516_v50, %v520_v51  ;;  %v434_v42 = vld [vmem:[#allocation5 + $0x4b8] sm:$0xff] }
  0xad   : > { %1233 = vmatprep.subr.bf16.mxu0 %v4969_v1  ;;  %1276 = vmatprep.subr.bf16.mxu1 %v4971_v3  ;;  %v527_v61 = vld [vmem:[#allocation5 + $0x7a0] sm:$0xff]  ;;  %v528_v1 = vld [vmem:[#allocation5 + $0x7a8] sm:$0xff]  ;;  %v5016_v3 = vcombine.low %v515_v48, %v519_v49  ;;  %v438_v48 = vld [vmem:[#allocation5 + $0x4d8] sm:$0xff]  ;;  %v4935_v49 = vcombine.high %v430_v41, %v434_v42 }
  0xae   : > { %v5025_v7 = vcombine.high %v523_v59, %v527_v61  ;;  %v5027_v8 = vcombine.high %v524_v0, %v528_v1  ;;  %v531_v9 = vld [vmem:[#allocation5 + $0x7c0] sm:$0xff]  ;;  %v532_v11 = vld [vmem:[#allocation5 + $0x7c8] sm:$0xff]  ;;  %v5026_v16 = vcombine.low %v524_v0, %v528_v1  ;;  %v442_v50 = vld [vmem:[#allocation5 + $0x4f8] sm:$0xff] }
  0xaf   : > { %v450_v0 = vld [vmem:[#allocation5 + $0x538] sm:$0xff] }
  0xb0   : > { %1234 = vmatpush1.bf16.msra.mxu0 %v4968_v10  ;;  %1277 = vmatpush1.bf16.msra.mxu1 %v4970_v12  ;;  %v535_v10 = vld [vmem:[#allocation5 + $0x7e0] sm:$0xff]  ;;  %v536_v12 = vld [vmem:[#allocation5 + $0x7e8] sm:$0xff] }
  0xb1   : > { %1235 = vmatprep.subr.bf16.mxu0 %v4977_v13  ;;  %1278 = vmatprep.subr.bf16.mxu1 %v4979_v14  ;;  %v5024_v13 = vcombine.low %v523_v59, %v527_v61  ;;  %v554_v14 = vshrl.u32 %v6283_v53, 16  ;;  %v5033_v18 = vcombine.high %v531_v9, %v535_v10  ;;  %v5035_v19 = vcombine.high %v532_v11, %v536_v12  ;;  %v446_v59 = vld [vmem:[#allocation5 + $0x518] sm:$0xff] }
  0xb2   : > { %v5032_v24 = vcombine.low %v531_v9, %v535_v10  ;;  %v5034_v27 = vcombine.low %v532_v11, %v536_v12  ;;  %v4943_v61 = vcombine.high %v438_v48, %v442_v50  ;;  %v4951_v9 = vcombine.high %v446_v59, %v450_v0  ;;  %v458_v10 = vld [vmem:[#allocation5 + $0x578] sm:$0xff] }
  0xb3   : > { %v559_v25 = vor.u32 %v558_v56, %v554_v14  ;;  %v4950_v12 = vcombine.low %v446_v59, %v450_v0  ;;  %v461_v56 = vld [vmem:[#allocation5 + $0x590] sm:$0xff] }
  0xb4   : > { %1236 = vmatpush1.bf16.msra.mxu0 %v4976_v20  ;;  %1279 = vmatpush1.bf16.msra.mxu1 %v4978_v21  ;;  %v413_v20 = vld [vmem:[#allocation5 + $0x410] sm:$0xff] }
  0xb5   : > { %1237 = vmatprep.subr.bf16.mxu0 %v4985_v22  ;;  %1280 = vmatprep.subr.bf16.mxu1 %v4987_v23  ;;  %v417_v21 = vld [vmem:[#allocation5 + $0x430] sm:$0xff]  ;;  %v414_v22 = vld [vmem:[#allocation5 + $0x418] sm:$0xff]  ;;  %v6299_v35 = vsel %vm552_vm0, %v559_v25, %v563_v26 }
  0xb6   : > { %v418_v23 = vld [vmem:[#allocation5 + $0x438] sm:$0xff]  ;;  %v4916_v34 = vcombine.low %v413_v20, %v417_v21  ;;  %v473_v25 = vld [vmem:[#allocation5 + $0x5f0] sm:$0xff] }
  0xb7   : > { %v470_v26 = vld [vmem:[#allocation5 + $0x5d8] sm:$0xff]  ;;  %v501_v0 = vld [vmem:[#allocation5 + $0x6d0] sm:$0xff] }
  0xb8   : > { %1238 = vmatpush1.bf16.msra.mxu0 %v4984_v28  ;;  %1281 = vmatpush1.bf16.msra.mxu1 %v4986_v29  ;;  %v4917_v28 = vcombine.high %v413_v20, %v417_v21  ;;  %v4919_v29 = vcombine.high %v414_v22, %v418_v23  ;;  %v466_v20 = vld [vmem:[#allocation5 + $0x5b8] sm:$0xff] }
  0xb9   : > { %1239 = vmatprep.subr.bf16.mxu0 %v4993_v30  ;;  %1282 = vmatprep.subr.bf16.mxu1 %v4995_v31  ;;  %v421_v30 = vld [vmem:[#allocation5 + $0x450] sm:$0xff] }
  0xba   : > { %v425_v31 = vld [vmem:[#allocation5 + $0x470] sm:$0xff] }
  0xbb   : > { %v4924_v43 = vcombine.low %v421_v30, %v425_v31 }
  0xbc   : > { %1240 = vmatpush1.bf16.msra.mxu0 %v4992_v36  ;;  %1283 = vmatpush1.bf16.msra.mxu1 %v4994_v37  ;;  %v4918_v36 = vcombine.low %v414_v22, %v418_v23  ;;  %v4925_v37 = vcombine.high %v421_v30, %v425_v31 }
  0xbd   : > { %1241 = vmatprep.subr.bf16.mxu0 %v5001_v38  ;;  %1284 = vmatprep.subr.bf16.mxu1 %v5003_v39  ;;  %v429_v38 = vld [vmem:[#allocation5 + $0x490] sm:$0xff]  ;;  %v4927_v39 = vcombine.high %v422_v32, %v426_v33 }
  0xbe   : > { %v4932_v51 = vcombine.low %v429_v38, %v433_v40 }
  0xc0   : > { %1242 = vmatpush1.bf16.msra.mxu0 %v5000_v44  ;;  %1285 = vmatpush1.bf16.msra.mxu1 %v5002_v45  ;;  %v4926_v44 = vcombine.low %v422_v32, %v426_v33  ;;  %v4933_v45 = vcombine.high %v429_v38, %v433_v40  ;;  %v477_v32 = vld [vmem:[#allocation5 + $0x610] sm:$0xff] }
  0xc1   : > { %1243 = vmatprep.subr.bf16.mxu0 %v5009_v46  ;;  %1286 = vmatprep.subr.bf16.mxu1 %v5011_v47  ;;  %v437_v46 = vld [vmem:[#allocation5 + $0x4d0] sm:$0xff] }
  0xc2   : > { %v441_v47 = vld [vmem:[#allocation5 + $0x4f0] sm:$0xff] }
  0xc3   : > { %v4940_v1 = vcombine.low %v437_v46, %v441_v47  ;;  %v481_v33 = vld [vmem:[#allocation5 + $0x630] sm:$0xff] }
  0xc4   : > { %1244 = vmatpush1.bf16.msra.mxu0 %v5008_v52  ;;  %1287 = vmatpush1.bf16.msra.mxu1 %v5010_v54  ;;  %v4934_v52 = vcombine.low %v430_v41, %v434_v42  ;;  %v4941_v54 = vcombine.high %v437_v46, %v441_v47  ;;  %v4981_v40 = vcombine.high %v477_v32, %v481_v33  ;;  %v485_v41 = vld [vmem:[#allocation5 + $0x650] sm:$0xff] }
  0xc5   : > { %1245 = vmatprep.subr.bf16.mxu0 %v5017_v55  ;;  %1288 = vmatprep.subr.bf16.mxu1 %v5019_v58  ;;  %v445_v55 = vld [vmem:[#allocation5 + $0x510] sm:$0xff]  ;;  %v4980_v46 = vcombine.low %v477_v32, %v481_v33 }
  0xc6   : > { %v449_v58 = vld [vmem:[#allocation5 + $0x530] sm:$0xff] }
  0xc7   : > { %v4948_v11 = vcombine.low %v445_v55, %v449_v58  ;;  %v489_v42 = vld [vmem:[#allocation5 + $0x670] sm:$0xff] }
  0xc8   : > { %1246 = vmatpush1.bf16.msra.mxu0 %v5016_v3  ;;  %1289 = vmatpush1.bf16.msra.mxu1 %v5018_v6  ;;  %v4942_v3 = vcombine.low %v438_v48, %v442_v50  ;;  %v4949_v6 = vcombine.high %v445_v55, %v449_v58  ;;  %v4989_v48 = vcombine.high %v485_v41, %v489_v42 }
  0xc9   : > { %1247 = vmatprep.subr.bf16.mxu0 %v5025_v7  ;;  %1290 = vmatprep.subr.bf16.mxu1 %v5027_v8  ;;  %v453_v7 = vld [vmem:[#allocation5 + $0x550] sm:$0xff]  ;;  %v454_v8 = vld [vmem:[#allocation5 + $0x558] sm:$0xff]  ;;  %v4988_v55 = vcombine.low %v485_v41, %v489_v42 }
  0xca   : > { %v4958_v22 = vcombine.low %v454_v8, %v458_v10 }
  0xcc   : > { %1248 = vmatpush1.bf16.msra.mxu0 %v5024_v13  ;;  %1291 = vmatpush1.bf16.msra.mxu1 %v5026_v16  ;;  %v465_v16 = vld [vmem:[#allocation5 + $0x5b0] sm:$0xff] }
  0xcd   : > { %1249 = vmatprep.subr.bf16.mxu0 %v5033_v18  ;;  %1292 = vmatprep.subr.bf16.mxu1 %v5035_v19  ;;  %v462_v18 = vld [vmem:[#allocation5 + $0x598] sm:$0xff]  ;;  %v4959_v19 = vcombine.high %v454_v8, %v458_v10  ;;  %v4965_v23 = vcombine.high %v461_v56, %v465_v16  ;;  %v509_v10 = vld [vmem:[#allocation5 + $0x710] sm:$0xff] }
  0xce   : > { %v4966_v30 = vcombine.low %v462_v18, %v466_v20 }
  0xd0   : > { %1250 = vmatpush1.bf16.msra.mxu0 %v5032_v24  ;;  %1293 = vmatpush1.bf16.msra.mxu1 %v5034_v27  ;;  %v469_v24 = vld [vmem:[#allocation5 + $0x5d0] sm:$0xff]  ;;  %v4967_v27 = vcombine.high %v462_v18, %v466_v20 }
  0xd1   : > { %1305 = vmatprep.subr.bf16.mxu0 %v4917_v28  ;;  %1348 = vmatprep.subr.bf16.mxu1 %v4919_v29  ;;  %v474_v28 = vld [vmem:[#allocation5 + $0x5f8] sm:$0xff]  ;;  %v4964_v29 = vcombine.low %v461_v56, %v465_v16  ;;  %v4973_v31 = vcombine.high %v469_v24, %v473_v25  ;;  %v4972_v38 = vcombine.low %v469_v24, %v473_v25  ;;  %v517_v20 = vld [vmem:[#allocation5 + $0x750] sm:$0xff] }
  0xd3   : > { %1252 = vmatmul.mubr.bf16.vlgmr.msra.gmra.mrb[0].mxu0 %v6299_v35  ;;  %1295 = vmatmul.mubr.bf16.vlgmr.msra.gmra.mrb[0].mxu1 %v6299_v35 }
  0xd4   : > { %1306 = vmatpush1.bf16.msra.mxu0 %v4916_v34  ;;  %1349 = vmatpush1.bf16.msra.mxu1 %v4918_v36  ;;  %v478_v34 = vld [vmem:[#allocation5 + $0x618] sm:$0xff]  ;;  %v4975_v36 = vcombine.high %v470_v26, %v474_v28 }
  0xd5   : > { %1307 = vmatprep.subr.bf16.mxu0 %v4925_v37  ;;  %1350 = vmatprep.subr.bf16.mxu1 %v4927_v39  ;;  %v482_v37 = vld [vmem:[#allocation5 + $0x638] sm:$0xff]  ;;  %v4974_v39 = vcombine.low %v470_v26, %v474_v28  ;;  %v525_v28 = vld [vmem:[#allocation5 + $0x790] sm:$0xff] }
  0xd6   : > { %1337 = vmatprep.mubr.bf16.mxu0 %v6278_v17  ;;  %1380 = vmatprep.mubr.bf16.mxu1 %v6278_v17  ;;  %v457_v17 = vld [vmem:[#allocation5 + $0x570] sm:$0xff]  ;;  %v4982_v47 = vcombine.low %v478_v34, %v482_v37 }
  0xd7   : > { %v4957_v13 = vcombine.high %v453_v7, %v457_v17  ;;  %v4956_v21 = vcombine.low %v453_v7, %v457_v17 }
  0xd8   : > { %1308 = vmatpush1.bf16.msra.mxu0 %v4924_v43  ;;  %1351 = vmatpush1.bf16.msra.mxu1 %v4926_v44  ;;  %v486_v43 = vld [vmem:[#allocation5 + $0x658] sm:$0xff]  ;;  %v4983_v44 = vcombine.high %v478_v34, %v482_v37  ;;  %v533_v37 = vld [vmem:[#allocation5 + $0x7d0] sm:$0xff] }
  0xd9   : > { %1309 = vmatprep.subr.bf16.mxu0 %v4933_v45  ;;  %1352 = vmatprep.subr.bf16.mxu1 %v4935_v49  ;;  %v490_v45 = vld [vmem:[#allocation5 + $0x678] sm:$0xff]  ;;  %v493_v49 = vld [vmem:[#allocation5 + $0x690] sm:$0xff] }
  0xda   : > { %v4991_v50 = vcombine.high %v486_v43, %v490_v45  ;;  %v4990_v58 = vcombine.low %v486_v43, %v490_v45  ;;  %v282_v45 = vld [vmem:[#allocation5] sm:$0xff] }
  0xdc   : > { %1310 = vmatpush1.bf16.msra.mxu0 %v4932_v51  ;;  %1353 = vmatpush1.bf16.msra.mxu1 %v4934_v52  ;;  %v497_v51 = vld [vmem:[#allocation5 + $0x6b0] sm:$0xff]  ;;  %v494_v52 = vld [vmem:[#allocation5 + $0x698] sm:$0xff] }
  0xdd   : > { %1311 = vmatprep.subr.bf16.mxu0 %v4941_v54  ;;  %1354 = vmatprep.subr.bf16.mxu1 %v4943_v61  ;;  %v498_v54 = vld [vmem:[#allocation5 + $0x6b8] sm:$0xff]  ;;  %v4997_v59 = vcombine.high %v493_v49, %v497_v51  ;;  %v4996_v7 = vcombine.low %v493_v49, %v497_v51 }
  0xde   : > { %v4999_v61 = vcombine.high %v494_v52, %v498_v54  ;;  %v4998_v17 = vcombine.low %v494_v52, %v498_v54  ;;  %v290_v54 = vld [vmem:[#allocation5 + $0x40] sm:$0xff] }
  0xe0   : > { %1312 = vmatpush1.bf16.msra.mxu0 %v4940_v1  ;;  %1355 = vmatpush1.bf16.msra.mxu1 %v4942_v3  ;;  %v505_v1 = vld [vmem:[#allocation5 + $0x6f0] sm:$0xff]  ;;  %v502_v3 = vld [vmem:[#allocation5 + $0x6d8] sm:$0xff] }
  0xe1   : > { %1313 = vmatprep.subr.bf16.mxu0 %v4949_v6  ;;  %1356 = vmatprep.subr.bf16.mxu1 %v4951_v9  ;;  %v506_v6 = vld [vmem:[#allocation5 + $0x6f8] sm:$0xff]  ;;  %v5005_v8 = vcombine.high %v501_v0, %v505_v1  ;;  %v5004_v56 = vcombine.low %v501_v0, %v505_v1 }
  0xe2   : > { %v5007_v9 = vcombine.high %v502_v3, %v506_v6  ;;  %v5006_v16 = vcombine.low %v502_v3, %v506_v6  ;;  %v298_v6 = vld [vmem:[#allocation5 + $0x80] sm:$0xff] }
  0xe4   : > { %1314 = vmatpush1.bf16.msra.mxu0 %v4948_v11  ;;  %1357 = vmatpush1.bf16.msra.mxu1 %v4950_v12  ;;  %v513_v11 = vld [vmem:[#allocation5 + $0x730] sm:$0xff]  ;;  %v510_v12 = vld [vmem:[#allocation5 + $0x718] sm:$0xff] }
  0xe5   : > { %1315 = vmatprep.subr.bf16.mxu0 %v4957_v13  ;;  %1358 = vmatprep.subr.bf16.mxu1 %v4959_v19  ;;  %v514_v13 = vld [vmem:[#allocation5 + $0x738] sm:$0xff]  ;;  %v5013_v18 = vcombine.high %v509_v10, %v513_v11  ;;  %v5012_v24 = vcombine.low %v509_v10, %v513_v11 }
  0xe6   : > { %v5015_v19 = vcombine.high %v510_v12, %v514_v13  ;;  %v5014_v25 = vcombine.low %v510_v12, %v514_v13  ;;  %v306_v13 = vld [vmem:[#allocation5 + $0xc0] sm:$0xff] }
  0xe8   : > { %1316 = vmatpush1.bf16.msra.mxu0 %v4956_v21  ;;  %1359 = vmatpush1.bf16.msra.mxu1 %v4958_v22  ;;  %v521_v21 = vld [vmem:[#allocation5 + $0x770] sm:$0xff]  ;;  %v518_v22 = vld [vmem:[#allocation5 + $0x758] sm:$0xff] }
  0xe9   : > { %1317 = vmatprep.subr.bf16.mxu0 %v4965_v23  ;;  %1360 = vmatprep.subr.bf16.mxu1 %v4967_v27  ;;  %v522_v23 = vld [vmem:[#allocation5 + $0x778] sm:$0xff]  ;;  %v5021_v26 = vcombine.high %v517_v20, %v521_v21  ;;  %v5020_v32 = vcombine.low %v517_v20, %v521_v21 }
  0xea   : > { %v5023_v27 = vcombine.high %v518_v22, %v522_v23  ;;  %v5022_v33 = vcombine.low %v518_v22, %v522_v23  ;;  %v314_v22 = vld [vmem:[#allocation5 + $0x100] sm:$0xff] }
  0xeb   : > { %v318_v23 = vld [vmem:[#allocation5 + $0x120] sm:$0xff] }
  0xec   : > { %1318 = vmatpush1.bf16.msra.mxu0 %v4964_v29  ;;  %1361 = vmatpush1.bf16.msra.mxu1 %v4966_v30  ;;  %v529_v29 = vld [vmem:[#allocation5 + $0x7b0] sm:$0xff]  ;;  %v526_v30 = vld [vmem:[#allocation5 + $0x798] sm:$0xff] }
  0xed   : > { %1319 = vmatprep.subr.bf16.mxu0 %v4973_v31  ;;  %1362 = vmatprep.subr.bf16.mxu1 %v4975_v36  ;;  %v530_v31 = vld [vmem:[#allocation5 + $0x7b8] sm:$0xff]  ;;  %v5029_v34 = vcombine.high %v525_v28, %v529_v29  ;;  %v5028_v41 = vcombine.low %v525_v28, %v529_v29  ;;  %v5073_v28 = vcombine.high %v314_v22, %v318_v23 }
  0xee   : > { %v5031_v36 = vcombine.high %v526_v30, %v530_v31  ;;  %v5030_v42 = vcombine.low %v526_v30, %v530_v31  ;;  %v322_v30 = vld [vmem:[#allocation5 + $0x140] sm:$0xff] }
  0xef   : > { %v326_v31 = vld [vmem:[#allocation5 + $0x160] sm:$0xff] }
  0xf0   : > { %1320 = vmatpush1.bf16.msra.mxu0 %v4972_v38  ;;  %1363 = vmatpush1.bf16.msra.mxu1 %v4974_v39  ;;  %v537_v38 = vld [vmem:[#allocation5 + $0x7f0] sm:$0xff]  ;;  %v534_v39 = vld [vmem:[#allocation5 + $0x7d8] sm:$0xff] }
  0xf1   : > { %1321 = vmatprep.subr.bf16.mxu0 %v4981_v40  ;;  %1364 = vmatprep.subr.bf16.mxu1 %v4983_v44  ;;  %v538_v40 = vld [vmem:[#allocation5 + $0x7f8] sm:$0xff]  ;;  %v5037_v43 = vcombine.high %v533_v37, %v537_v38  ;;  %v5036_v49 = vcombine.low %v533_v37, %v537_v38  ;;  %v5081_v37 = vcombine.high %v322_v30, %v326_v31 }
  0xf2   : > { %v5039_v44 = vcombine.high %v534_v39, %v538_v40 }
  0xf4   : > { %1322 = vmatpush1.bf16.msra.mxu0 %v4980_v46  ;;  %1365 = vmatpush1.bf16.msra.mxu1 %v4982_v47  ;;  %v286_v46 = vld [vmem:[#allocation5 + $0x20] sm:$0xff]  ;;  %v283_v47 = vld [vmem:[#allocation5 + $0x8] sm:$0xff] }
  0xf5   : > { %1323 = vmatprep.subr.bf16.mxu0 %v4989_v48  ;;  %1366 = vmatprep.subr.bf16.mxu1 %v4991_v50  ;;  %v287_v48 = vld [vmem:[#allocation5 + $0x28] sm:$0xff]  ;;  %v5038_v50 = vcombine.low %v534_v39, %v538_v40  ;;  %v5041_v51 = vcombine.high %v282_v45, %v286_v46  ;;  %v330_v39 = vld [vmem:[#allocation5 + $0x180] sm:$0xff] }
  0xf6   : > { %v5043_v52 = vcombine.high %v283_v47, %v287_v48  ;;  %v5042_v0 = vcombine.low %v283_v47, %v287_v48  ;;  %v334_v40 = vld [vmem:[#allocation5 + $0x1a0] sm:$0xff] }
  0xf7   : > { %v338_v47 = vld [vmem:[#allocation5 + $0x1c0] sm:$0xff] }
  0xf8   : > { %1324 = vmatpush1.bf16.msra.mxu0 %v4988_v55  ;;  %1367 = vmatpush1.bf16.msra.mxu1 %v4990_v58  ;;  %v294_v55 = vld [vmem:[#allocation5 + $0x60] sm:$0xff]  ;;  %v291_v58 = vld [vmem:[#allocation5 + $0x48] sm:$0xff] }
  0xf9   : > { %1325 = vmatprep.subr.bf16.mxu0 %v4997_v59  ;;  %1368 = vmatprep.subr.bf16.mxu1 %v4999_v61  ;;  %v295_v59 = vld [vmem:[#allocation5 + $0x68] sm:$0xff]  ;;  %v5040_v61 = vcombine.low %v282_v45, %v286_v46  ;;  %v5049_v1 = vcombine.high %v290_v54, %v294_v55  ;;  %v5089_v45 = vcombine.high %v330_v39, %v334_v40  ;;  %v342_v48 = vld [vmem:[#allocation5 + $0x1e0] sm:$0xff] }
  0xfa   : > { %v5051_v3 = vcombine.high %v291_v58, %v295_v59  ;;  %v5050_v10 = vcombine.low %v291_v58, %v295_v59  ;;  %v346_v58 = vld [vmem:[#allocation5 + $0x200] sm:$0xff] }
  0xfb   : > { %v350_v59 = vld [vmem:[#allocation5 + $0x220] sm:$0xff] }
  0xfc   : > { %1326 = vmatpush1.bf16.msra.mxu0 %v4996_v7  ;;  %1369 = vmatpush1.bf16.msra.mxu1 %v4998_v17  ;;  %v302_v7 = vld [vmem:[#allocation5 + $0xa0] sm:$0xff]  ;;  %v299_v17 = vld [vmem:[#allocation5 + $0x88] sm:$0xff] }
  0xfd   : > { %1327 = vmatprep.subr.bf16.mxu0 %v5005_v8  ;;  %1370 = vmatprep.subr.bf16.mxu1 %v5007_v9  ;;  %v303_v8 = vld [vmem:[#allocation5 + $0xa8] sm:$0xff]  ;;  %v5048_v9 = vcombine.low %v290_v54, %v294_v55  ;;  %v5057_v11 = vcombine.high %v298_v6, %v302_v7  ;;  %v5097_v54 = vcombine.high %v338_v47, %v342_v48 }
  0xfe   : > { %v5059_v12 = vcombine.high %v299_v17, %v303_v8 }
 0x100   : > { %1328 = vmatpush1.bf16.msra.mxu0 %v5004_v56  ;;  %1371 = vmatpush1.bf16.msra.mxu1 %v5006_v16  ;;  %v310_v56 = vld [vmem:[#allocation5 + $0xe0] sm:$0xff]  ;;  %v307_v16 = vld [vmem:[#allocation5 + $0xc8] sm:$0xff] }
 0x101   : > { %1329 = vmatprep.subr.bf16.mxu0 %v5013_v18  ;;  %1372 = vmatprep.subr.bf16.mxu1 %v5015_v19  ;;  %v311_v18 = vld [vmem:[#allocation5 + $0xe8] sm:$0xff]  ;;  %v5056_v19 = vcombine.low %v298_v6, %v302_v7  ;;  %v5065_v20 = vcombine.high %v306_v13, %v310_v56  ;;  %v5105_v6 = vcombine.high %v346_v58, %v350_v59 }
 0x102   : > { %v5067_v21 = vcombine.high %v307_v16, %v311_v18 }
 0x104   : > { %1330 = vmatpush1.bf16.msra.mxu0 %v5012_v24  ;;  %1373 = vmatpush1.bf16.msra.mxu1 %v5014_v25  ;;  %v315_v24 = vld [vmem:[#allocation5 + $0x108] sm:$0xff] }
 0x105   : > { %1331 = vmatprep.subr.bf16.mxu0 %v5021_v26  ;;  %1374 = vmatprep.subr.bf16.mxu1 %v5023_v27  ;;  %v319_v25 = vld [vmem:[#allocation5 + $0x128] sm:$0xff]  ;;  %v5064_v26 = vcombine.low %v306_v13, %v310_v56  ;;  %v5066_v27 = vcombine.low %v307_v16, %v311_v18  ;;  %v362_v16 = vld [vmem:[#allocation5 + $0x280] sm:$0xff] }
 0x106   : > { %v5075_v29 = vcombine.high %v315_v24, %v319_v25  ;;  %v366_v18 = vld [vmem:[#allocation5 + $0x2a0] sm:$0xff] }
 0x108   : > { %1332 = vmatpush1.bf16.msra.mxu0 %v5020_v32  ;;  %1375 = vmatpush1.bf16.msra.mxu1 %v5022_v33  ;;  %v323_v32 = vld [vmem:[#allocation5 + $0x148] sm:$0xff] }
 0x109   : > { %1333 = vmatprep.subr.bf16.mxu0 %v5029_v34  ;;  %1376 = vmatprep.subr.bf16.mxu1 %v5031_v36  ;;  %v327_v33 = vld [vmem:[#allocation5 + $0x168] sm:$0xff]  ;;  %v5072_v34 = vcombine.low %v314_v22, %v318_v23  ;;  %v5074_v36 = vcombine.low %v315_v24, %v319_v25  ;;  %v5121_v22 = vcombine.high %v362_v16, %v366_v18  ;;  %v370_v24 = vld [vmem:[#allocation5 + $0x2c0] sm:$0xff] }
 0x10a   : > { %v5083_v38 = vcombine.high %v323_v32, %v327_v33  ;;  %v374_v25 = vld [vmem:[#allocation5 + $0x2e0] sm:$0xff] }
 0x10c   : > { %1334 = vmatpush1.bf16.msra.mxu0 %v5028_v41  ;;  %1377 = vmatpush1.bf16.msra.mxu1 %v5030_v42  ;;  %v331_v41 = vld [vmem:[#allocation5 + $0x188] sm:$0xff] }
 0x10d   : > { %1335 = vmatprep.subr.bf16.mxu0 %v5037_v43  ;;  %1378 = vmatprep.subr.bf16.mxu1 %v5039_v44  ;;  %v335_v42 = vld [vmem:[#allocation5 + $0x1a8] sm:$0xff]  ;;  %v5080_v43 = vcombine.low %v322_v30, %v326_v31  ;;  %v5082_v44 = vcombine.low %v323_v32, %v327_v33  ;;  %v5129_v30 = vcombine.high %v370_v24, %v374_v25  ;;  %v378_v32 = vld [vmem:[#allocation5 + $0x300] sm:$0xff] }
 0x10e   : > { %v5091_v46 = vcombine.high %v331_v41, %v335_v42  ;;  %v382_v33 = vld [vmem:[#allocation5 + $0x320] sm:$0xff] }
 0x110   : > { %1336 = vmatpush1.bf16.msra.mxu0 %v5036_v49  ;;  %1379 = vmatpush1.bf16.msra.mxu1 %v5038_v50  ;;  %v339_v49 = vld [vmem:[#allocation5 + $0x1c8] sm:$0xff] }
 0x111   : > { %2033 = vmatprep.subr.bf16.mxu0 %v5041_v51  ;;  %2076 = vmatprep.subr.bf16.mxu1 %v5043_v52  ;;  %v343_v50 = vld [vmem:[#allocation5 + $0x1e8] sm:$0xff]  ;;  %v5088_v51 = vcombine.low %v330_v39, %v334_v40  ;;  %v5090_v52 = vcombine.low %v331_v41, %v335_v42  ;;  %v5137_v39 = vcombine.high %v378_v32, %v382_v33  ;;  %v386_v41 = vld [vmem:[#allocation5 + $0x340] sm:$0xff] }
 0x112   : > { %v5099_v55 = vcombine.high %v339_v49, %v343_v50  ;;  %v390_v42 = vld [vmem:[#allocation5 + $0x360] sm:$0xff] }
 0x113   : > { %1338 = vmatmul.mubr.bf16.vlgmr.msra.gmra.mrb[4].mxu0 %v6299_v35  ;;  %1381 = vmatmul.mubr.bf16.vlgmr.msra.gmra.mrb[4].mxu1 %v6299_v35  ;;  %v5058_v35 = vcombine.low %v299_v17, %v303_v8  ;;  %v354_v17 = vld [vmem:[#allocation5 + $0x240] sm:$0xff] }
 0x114   : > { %2034 = vmatpush1.bf16.msra.mxu0 %v5040_v61  ;;  %2077 = vmatpush1.bf16.msra.mxu1 %v5042_v0  ;;  %v347_v61 = vld [vmem:[#allocation5 + $0x208] sm:$0xff]  ;;  %v358_v8 = vld [vmem:[#allocation5 + $0x260] sm:$0xff] }
 0x115   : > { %2035 = vmatprep.subr.bf16.mxu0 %v5049_v1  ;;  %2078 = vmatprep.subr.bf16.mxu1 %v5051_v3  ;;  %v351_v0 = vld [vmem:[#allocation5 + $0x228] sm:$0xff]  ;;  %v5096_v1 = vcombine.low %v338_v47, %v342_v48  ;;  %v5098_v3 = vcombine.low %v339_v49, %v343_v50  ;;  %v5113_v13 = vcombine.high %v354_v17, %v358_v8  ;;  %v394_v49 = vld [vmem:[#allocation5 + $0x380] sm:$0xff] }
 0x116   : > { %2065 = vmatprep.mubr.bf16.mxu0 %v6262_v57  ;;  %2108 = vmatprep.mubr.bf16.mxu1 %v6262_v57  ;;  %v5107_v7 = vcombine.high %v347_v61, %v351_v0  ;;  %v5145_v47 = vcombine.high %v386_v41, %v390_v42  ;;  %v398_v50 = vld [vmem:[#allocation5 + $0x3a0] sm:$0xff] }
 0x118   : > { %2036 = vmatpush1.bf16.msra.mxu0 %v5048_v9  ;;  %2079 = vmatpush1.bf16.msra.mxu1 %v5050_v10  ;;  %v355_v9 = vld [vmem:[#allocation5 + $0x248] sm:$0xff] }
 0x119   : > { %2037 = vmatprep.subr.bf16.mxu0 %v5057_v11  ;;  %2080 = vmatprep.subr.bf16.mxu1 %v5059_v12  ;;  %v359_v10 = vld [vmem:[#allocation5 + $0x268] sm:$0xff]  ;;  %v5104_v11 = vcombine.low %v346_v58, %v350_v59  ;;  %v5106_v12 = vcombine.low %v347_v61, %v351_v0  ;;  %v5153_v58 = vcombine.high %v394_v49, %v398_v50  ;;  %v402_v61 = vld [vmem:[#allocation5 + $0x3c0] sm:$0xff] }
 0x11a   : > { %v5115_v56 = vcombine.high %v355_v9, %v359_v10  ;;  %v406_v0 = vld [vmem:[#allocation5 + $0x3e0] sm:$0xff] }
 0x11c   : > { %2038 = vmatpush1.bf16.msra.mxu0 %v5056_v19  ;;  %2081 = vmatpush1.bf16.msra.mxu1 %v5058_v35  ;;  %v363_v19 = vld [vmem:[#allocation5 + $0x288] sm:$0xff] }
 0x11d   : > { %2039 = vmatprep.subr.bf16.mxu0 %v5065_v20  ;;  %2082 = vmatprep.subr.bf16.mxu1 %v5067_v21  ;;  %v367_v35 = vld [vmem:[#allocation5 + $0x2a8] sm:$0xff]  ;;  %v5112_v20 = vcombine.low %v354_v17, %v358_v8  ;;  %v5114_v21 = vcombine.low %v355_v9, %v359_v10  ;;  %v5161_v17 = vcombine.high %v402_v61, %v406_v0  ;;  %v284_v9 = vld [vmem:[#allocation5 + $0x10] sm:$0xff] }
 0x11e   : > { %v5123_v23 = vcombine.high %v363_v19, %v367_v35  ;;  %v288_v10 = vld [vmem:[#allocation5 + $0x30] sm:$0xff] }
 0x120   : > { %2040 = vmatpush1.bf16.msra.mxu0 %v5064_v26  ;;  %2083 = vmatpush1.bf16.msra.mxu1 %v5066_v27  ;;  %v371_v26 = vld [vmem:[#allocation5 + $0x2c8] sm:$0xff] }
 0x121   : > { %2041 = vmatprep.subr.bf16.mxu0 %v5073_v28  ;;  %2084 = vmatprep.subr.bf16.mxu1 %v5075_v29  ;;  %v375_v27 = vld [vmem:[#allocation5 + $0x2e8] sm:$0xff]  ;;  %v5120_v28 = vcombine.low %v362_v16, %v366_v18  ;;  %v5122_v29 = vcombine.low %v363_v19, %v367_v35  ;;  %v5045_v16 = vcombine.high %v284_v9, %v288_v10  ;;  %v292_v19 = vld [vmem:[#allocation5 + $0x50] sm:$0xff] }
 0x122   : > { %v5131_v31 = vcombine.high %v371_v26, %v375_v27  ;;  %v296_v35 = vld [vmem:[#allocation5 + $0x70] sm:$0xff] }
 0x124   : > { %2042 = vmatpush1.bf16.msra.mxu0 %v5072_v34  ;;  %2085 = vmatpush1.bf16.msra.mxu1 %v5074_v36  ;;  %v379_v34 = vld [vmem:[#allocation5 + $0x308] sm:$0xff] }
 0x125   : > { %2043 = vmatprep.subr.bf16.mxu0 %v5081_v37  ;;  %2086 = vmatprep.subr.bf16.mxu1 %v5083_v38  ;;  %v383_v36 = vld [vmem:[#allocation5 + $0x328] sm:$0xff]  ;;  %v5128_v37 = vcombine.low %v370_v24, %v374_v25  ;;  %v5130_v38 = vcombine.low %v371_v26, %v375_v27  ;;  %v5053_v24 = vcombine.high %v292_v19, %v296_v35  ;;  %v300_v26 = vld [vmem:[#allocation5 + $0x90] sm:$0xff] }
 0x126   : > { %v5139_v40 = vcombine.high %v379_v34, %v383_v36  ;;  %v304_v27 = vld [vmem:[#allocation5 + $0xb0] sm:$0xff] }
 0x128   : > { %2044 = vmatpush1.bf16.msra.mxu0 %v5080_v43  ;;  %2087 = vmatpush1.bf16.msra.mxu1 %v5082_v44  ;;  %v387_v43 = vld [vmem:[#allocation5 + $0x348] sm:$0xff] }
 0x129   : > { %2045 = vmatprep.subr.bf16.mxu0 %v5089_v45  ;;  %2088 = vmatprep.subr.bf16.mxu1 %v5091_v46  ;;  %v391_v44 = vld [vmem:[#allocation5 + $0x368] sm:$0xff]  ;;  %v5136_v45 = vcombine.low %v378_v32, %v382_v33  ;;  %v5138_v46 = vcombine.low %v379_v34, %v383_v36  ;;  %v5061_v33 = vcombine.high %v300_v26, %v304_v27  ;;  %v308_v36 = vld [vmem:[#allocation5 + $0xd0] sm:$0xff] }
 0x12a   : > { %v5147_v48 = vcombine.high %v387_v43, %v391_v44 }
 0x12c   : > { %2046 = vmatpush1.bf16.msra.mxu0 %v5088_v51  ;;  %2089 = vmatpush1.bf16.msra.mxu1 %v5090_v52  ;;  %v395_v51 = vld [vmem:[#allocation5 + $0x388] sm:$0xff] }
 0x12d   : > { %2047 = vmatprep.subr.bf16.mxu0 %v5097_v54  ;;  %2090 = vmatprep.subr.bf16.mxu1 %v5099_v55  ;;  %v399_v52 = vld [vmem:[#allocation5 + $0x3a8] sm:$0xff]  ;;  %v5144_v54 = vcombine.low %v386_v41, %v390_v42  ;;  %v5146_v55 = vcombine.low %v387_v43, %v391_v44  ;;  %v5060_v41 = vcombine.low %v300_v26, %v304_v27 }
 0x12e   : > { %v5155_v59 = vcombine.high %v395_v51, %v399_v52 }
 0x130   : > { %2048 = vmatpush1.bf16.msra.mxu0 %v5096_v1  ;;  %2091 = vmatpush1.bf16.msra.mxu1 %v5098_v3  ;;  %v403_v1 = vld [vmem:[#allocation5 + $0x3c8] sm:$0xff] }
 0x131   : > { %2049 = vmatprep.subr.bf16.mxu0 %v5105_v6  ;;  %2092 = vmatprep.subr.bf16.mxu1 %v5107_v7  ;;  %v407_v3 = vld [vmem:[#allocation5 + $0x3e8] sm:$0xff]  ;;  %v5152_v6 = vcombine.low %v394_v49, %v398_v50  ;;  %v5154_v7 = vcombine.low %v395_v51, %v399_v52 }
 0x132   : > { %v5163_v8 = vcombine.high %v403_v1, %v407_v3 }
 0x134   : > { %2050 = vmatpush1.bf16.msra.mxu0 %v5104_v11  ;;  %2093 = vmatpush1.bf16.msra.mxu1 %v5106_v12  ;;  %v285_v11 = vld [vmem:[#allocation5 + $0x18] sm:$0xff] }
 0x135   : > { %2051 = vmatprep.subr.bf16.mxu0 %v5113_v13  ;;  %2094 = vmatprep.subr.bf16.mxu1 %v5115_v56  ;;  %v289_v12 = vld [vmem:[#allocation5 + $0x38] sm:$0xff]  ;;  %v5160_v13 = vcombine.low %v402_v61, %v406_v0  ;;  %v5162_v56 = vcombine.low %v403_v1, %v407_v3 }
 0x136   : > { %v5047_v18 = vcombine.high %v285_v11, %v289_v12 }
 0x138   : > { %2052 = vmatpush1.bf16.msra.mxu0 %v5112_v20  ;;  %2095 = vmatpush1.bf16.msra.mxu1 %v5114_v21  ;;  %v293_v20 = vld [vmem:[#allocation5 + $0x58] sm:$0xff] }
 0x139   : > { %2053 = vmatprep.subr.bf16.mxu0 %v5121_v22  ;;  %2096 = vmatprep.subr.bf16.mxu1 %v5123_v23  ;;  %v297_v21 = vld [vmem:[#allocation5 + $0x78] sm:$0xff]  ;;  %v5044_v22 = vcombine.low %v284_v9, %v288_v10  ;;  %v5046_v23 = vcombine.low %v285_v11, %v289_v12 }
 0x13a   : > { %v5055_v25 = vcombine.high %v293_v20, %v297_v21  ;;  %v5054_v32 = vcombine.low %v293_v20, %v297_v21 }
 0x13c   : > { %2054 = vmatpush1.bf16.msra.mxu0 %v5120_v28  ;;  %2097 = vmatpush1.bf16.msra.mxu1 %v5122_v29  ;;  %v6310_v28 = vld [vmem:[%s6244_s21] ss:$8 sps:$4 sm:$0xff]   ;;  %v301_v29 = vld [vmem:[#allocation5 + $0x98] sm:$0xff] }
 0x13d   : > { %2055 = vmatprep.subr.bf16.mxu0 %v5129_v30  ;;  %2098 = vmatprep.subr.bf16.mxu1 %v5131_v31  ;;  %v305_v30 = vld [vmem:[#allocation5 + $0xb8] sm:$0xff]  ;;  %v5052_v31 = vcombine.low %v292_v19, %v296_v35 }
 0x13e   : > { %v5063_v34 = vcombine.high %v301_v29, %v305_v30  ;;  %v5062_v42 = vcombine.low %v301_v29, %v305_v30 }
 0x140   : > { %2056 = vmatpush1.bf16.msra.mxu0 %v5128_v37  ;;  %2099 = vmatpush1.bf16.msra.mxu1 %v5130_v38  ;;  %v312_v37 = vld [vmem:[#allocation5 + $0xf0] sm:$0xff]  ;;  %v6315_v38 = vld [vmem:[%s6244_s21 + $0x4] ss:$8 sps:$4 sm:$0xff]  }
 0x141   : > { %2057 = vmatprep.subr.bf16.mxu0 %v5137_v39  ;;  %2100 = vmatprep.subr.bf16.mxu1 %v5139_v40  ;;  %v309_v39 = vld [vmem:[#allocation5 + $0xd8] sm:$0xff]  ;;  %v5069_v43 = vcombine.high %v308_v36, %v312_v37  ;;  %v5068_v49 = vcombine.low %v308_v36, %v312_v37 }
 0x142   : > { %v313_v40 = vld [vmem:[#allocation5 + $0xf8] sm:$0xff] }
 0x143   : > { %v5071_v44 = vcombine.high %v309_v39, %v313_v40  ;;  %v5070_v50 = vcombine.low %v309_v39, %v313_v40 }
 0x144   : > { %2058 = vmatpush1.bf16.msra.mxu0 %v5136_v45  ;;  %2101 = vmatpush1.bf16.msra.mxu1 %v5138_v46  ;;  %v316_v45 = vld [vmem:[#allocation5 + $0x110] sm:$0xff] }
 0x145   : > { %2059 = vmatprep.subr.bf16.mxu0 %v5145_v47  ;;  %2102 = vmatprep.subr.bf16.mxu1 %v5147_v48  ;;  %v320_v46 = vld [vmem:[#allocation5 + $0x130] sm:$0xff]  ;;  %v317_v47 = vld [vmem:[#allocation5 + $0x118] sm:$0xff] }
 0x146   : > { %v321_v48 = vld [vmem:[#allocation5 + $0x138] sm:$0xff]  ;;  %v5077_v51 = vcombine.high %v316_v45, %v320_v46  ;;  %v5076_v61 = vcombine.low %v316_v45, %v320_v46 }
 0x147   : > { %v5079_v52 = vcombine.high %v317_v47, %v321_v48  ;;  %v5078_v0 = vcombine.low %v317_v47, %v321_v48 }
 0x148   : > { %2060 = vmatpush1.bf16.msra.mxu0 %v5144_v54  ;;  %2103 = vmatpush1.bf16.msra.mxu1 %v5146_v55  ;;  %v324_v54 = vld [vmem:[#allocation5 + $0x150] sm:$0xff] }
 0x149   : > { %2061 = vmatprep.subr.bf16.mxu0 %v5153_v58  ;;  %2104 = vmatprep.subr.bf16.mxu1 %v5155_v59  ;;  %v328_v55 = vld [vmem:[#allocation5 + $0x170] sm:$0xff]  ;;  %v325_v58 = vld [vmem:[#allocation5 + $0x158] sm:$0xff] }
 0x14a   : > { %v329_v59 = vld [vmem:[#allocation5 + $0x178] sm:$0xff]  ;;  %v5085_v1 = vcombine.high %v324_v54, %v328_v55  ;;  %v5084_v9 = vcombine.low %v324_v54, %v328_v55 }
 0x14b   : > { %v5087_v3 = vcombine.high %v325_v58, %v329_v59  ;;  %v5086_v10 = vcombine.low %v325_v58, %v329_v59 }
 0x14c   : > { %2062 = vmatpush1.bf16.msra.mxu0 %v5152_v6  ;;  %2105 = vmatpush1.bf16.msra.mxu1 %v5154_v7  ;;  %v332_v6 = vld [vmem:[#allocation5 + $0x190] sm:$0xff] }
 0x14d   : > { %2063 = vmatprep.subr.bf16.mxu0 %v5161_v17  ;;  %2106 = vmatprep.subr.bf16.mxu1 %v5163_v8  ;;  %v336_v7 = vld [vmem:[#allocation5 + $0x1b0] sm:$0xff]  ;;  %v333_v17 = vld [vmem:[#allocation5 + $0x198] sm:$0xff] }
 0x14e   : > { %v337_v8 = vld [vmem:[#allocation5 + $0x1b8] sm:$0xff]  ;;  %v5093_v11 = vcombine.high %v332_v6, %v336_v7  ;;  %v5092_v19 = vcombine.low %v332_v6, %v336_v7 }
 0x14f   : > { %v5095_v12 = vcombine.high %v333_v17, %v337_v8  ;;  %v5094_v35 = vcombine.low %v333_v17, %v337_v8 }
 0x150   : > { %2064 = vmatpush1.bf16.msra.mxu0 %v5160_v13  ;;  %2107 = vmatpush1.bf16.msra.mxu1 %v5162_v56  ;;  %v340_v13 = vld [vmem:[#allocation5 + $0x1d0] sm:$0xff] }
 0x151   : > { %2119 = vmatprep.subr.bf16.mxu0 %v5045_v16  ;;  %2162 = vmatprep.subr.bf16.mxu1 %v5047_v18  ;;  %v344_v56 = vld [vmem:[#allocation5 + $0x1f0] sm:$0xff]  ;;  %v341_v16 = vld [vmem:[#allocation5 + $0x1d8] sm:$0xff] }
 0x152   : > { %v345_v18 = vld [vmem:[#allocation5 + $0x1f8] sm:$0xff]  ;;  %v5101_v20 = vcombine.high %v340_v13, %v344_v56  ;;  %v5100_v26 = vcombine.low %v340_v13, %v344_v56 }
 0x153   : > { %2066 = vmatmul.mubr.bf16.vlgmr.msra.gmra.mrb[0].mxu0 %v6310_v28  ;;  %2109 = vmatmul.mubr.bf16.vlgmr.msra.gmra.mrb[0].mxu1 %v6310_v28  ;;  %v5103_v21 = vcombine.high %v341_v16, %v345_v18  ;;  %v5102_v27 = vcombine.low %v341_v16, %v345_v18 }
 0x154   : > { %2120 = vmatpush1.bf16.msra.mxu0 %v5044_v22  ;;  %2163 = vmatpush1.bf16.msra.mxu1 %v5046_v23  ;;  %v348_v22 = vld [vmem:[#allocation5 + $0x210] sm:$0xff] }
 0x155   : > { %2121 = vmatprep.subr.bf16.mxu0 %v5053_v24  ;;  %2164 = vmatprep.subr.bf16.mxu1 %v5055_v25  ;;  %v352_v23 = vld [vmem:[#allocation5 + $0x230] sm:$0xff]  ;;  %v349_v24 = vld [vmem:[#allocation5 + $0x218] sm:$0xff] }
 0x156   : > { %2151 = vmatprep.mubr.bf16.mxu0 %v6315_v38  ;;  %2194 = vmatprep.mubr.bf16.mxu1 %v6315_v38  ;;  %v353_v25 = vld [vmem:[#allocation5 + $0x238] sm:$0xff]  ;;  %v5109_v29 = vcombine.high %v348_v22, %v352_v23  ;;  %v5108_v36 = vcombine.low %v348_v22, %v352_v23 }
 0x157   : > { %v5111_v30 = vcombine.high %v349_v24, %v353_v25  ;;  %v5110_v37 = vcombine.low %v349_v24, %v353_v25 }
 0x158   : > { %2122 = vmatpush1.bf16.msra.mxu0 %v5052_v31  ;;  %2165 = vmatpush1.bf16.msra.mxu1 %v5054_v32  ;;  %v356_v31 = vld [vmem:[#allocation5 + $0x250] sm:$0xff] }
 0x159   : > { %2123 = vmatprep.subr.bf16.mxu0 %v5061_v33  ;;  %2166 = vmatprep.subr.bf16.mxu1 %v5063_v34  ;;  %v360_v32 = vld [vmem:[#allocation5 + $0x270] sm:$0xff]  ;;  %v357_v33 = vld [vmem:[#allocation5 + $0x258] sm:$0xff] }
 0x15a   : > { %v361_v34 = vld [vmem:[#allocation5 + $0x278] sm:$0xff]  ;;  %v5117_v39 = vcombine.high %v356_v31, %v360_v32  ;;  %v5116_v45 = vcombine.low %v356_v31, %v360_v32 }
 0x15b   : > { %v5119_v40 = vcombine.high %v357_v33, %v361_v34  ;;  %v5118_v46 = vcombine.low %v357_v33, %v361_v34 }
 0x15c   : > { %2124 = vmatpush1.bf16.msra.mxu0 %v5060_v41  ;;  %2167 = vmatpush1.bf16.msra.mxu1 %v5062_v42  ;;  %v364_v41 = vld [vmem:[#allocation5 + $0x290] sm:$0xff] }
 0x15d   : > { %2125 = vmatprep.subr.bf16.mxu0 %v5069_v43  ;;  %2168 = vmatprep.subr.bf16.mxu1 %v5071_v44  ;;  %v368_v42 = vld [vmem:[#allocation5 + $0x2b0] sm:$0xff]  ;;  %v365_v43 = vld [vmem:[#allocation5 + $0x298] sm:$0xff] }
 0x15e   : > { %v369_v44 = vld [vmem:[#allocation5 + $0x2b8] sm:$0xff]  ;;  %v5125_v47 = vcombine.high %v364_v41, %v368_v42  ;;  %v5124_v54 = vcombine.low %v364_v41, %v368_v42 }
 0x15f   : > { %v5127_v48 = vcombine.high %v365_v43, %v369_v44  ;;  %v5126_v55 = vcombine.low %v365_v43, %v369_v44 }
 0x160   : > { %2126 = vmatpush1.bf16.msra.mxu0 %v5068_v49  ;;  %2169 = vmatpush1.bf16.msra.mxu1 %v5070_v50  ;;  %v372_v49 = vld [vmem:[#allocation5 + $0x2d0] sm:$0xff] }
 0x161   : > { %2127 = vmatprep.subr.bf16.mxu0 %v5077_v51  ;;  %2170 = vmatprep.subr.bf16.mxu1 %v5079_v52  ;;  %v376_v50 = vld [vmem:[#allocation5 + $0x2f0] sm:$0xff]  ;;  %v373_v51 = vld [vmem:[#allocation5 + $0x2d8] sm:$0xff] }
 0x162   : > { %v377_v52 = vld [vmem:[#allocation5 + $0x2f8] sm:$0xff]  ;;  %v5133_v58 = vcombine.high %v372_v49, %v376_v50  ;;  %v5132_v6 = vcombine.low %v372_v49, %v376_v50  ;;  %v2338_v49 = vrot.slane %v6315_v38, 1  ;;  %v2339_v50 = vrot.slane %v6266_v60, 1 }
 0x163   : > { %v5135_v59 = vcombine.high %v373_v51, %v377_v52  ;;  %v5134_v7 = vcombine.low %v373_v51, %v377_v52 }
 0x164   : > { %2128 = vmatpush1.bf16.msra.mxu0 %v5076_v61  ;;  %2171 = vmatpush1.bf16.msra.mxu1 %v5078_v0  ;;  %v380_v61 = vld [vmem:[#allocation5 + $0x310] sm:$0xff] }
 0x165   : > { %2129 = vmatprep.subr.bf16.mxu0 %v5085_v1  ;;  %2172 = vmatprep.subr.bf16.mxu1 %v5087_v3  ;;  %v384_v0 = vld [vmem:[#allocation5 + $0x330] sm:$0xff]  ;;  %v381_v1 = vld [vmem:[#allocation5 + $0x318] sm:$0xff] }
 0x166   : > { %v385_v3 = vld [vmem:[#allocation5 + $0x338] sm:$0xff]  ;;  %v5141_v17 = vcombine.high %v380_v61, %v384_v0  ;;  %v5140_v13 = vcombine.low %v380_v61, %v384_v0  ;;  %v2223_v61 = vld [vmem:[#allocation5 + $0x888] sm:$0xff] }
 0x167   : > { %v5143_v8 = vcombine.high %v381_v1, %v385_v3  ;;  %v5142_v56 = vcombine.low %v381_v1, %v385_v3  ;;  %v2227_v0 = vld [vmem:[#allocation5 + $0x8a8] sm:$0xff]  ;;  %v6323_v1 = vsel %vm2334_vm1, %v2338_v49, %v2339_v50 }
 0x168   : > { %2130 = vmatpush1.bf16.msra.mxu0 %v5084_v9  ;;  %2173 = vmatpush1.bf16.msra.mxu1 %v5086_v10  ;;  %v388_v9 = vld [vmem:[#allocation5 + $0x350] sm:$0xff] }
 0x169   : > { %2131 = vmatprep.subr.bf16.mxu0 %v5093_v11  ;;  %2174 = vmatprep.subr.bf16.mxu1 %v5095_v12  ;;  %v392_v10 = vld [vmem:[#allocation5 + $0x370] sm:$0xff]  ;;  %v389_v11 = vld [vmem:[#allocation5 + $0x358] sm:$0xff] }
 0x16a   : > { %v393_v12 = vld [vmem:[#allocation5 + $0x378] sm:$0xff]  ;;  %v5149_v16 = vcombine.high %v388_v9, %v392_v10  ;;  %v5148_v22 = vcombine.low %v388_v9, %v392_v10  ;;  %v2231_v9 = vld [vmem:[#allocation5 + $0x8c8] sm:$0xff] }
 0x16b   : > { %v5151_v18 = vcombine.high %v389_v11, %v393_v12  ;;  %v5150_v23 = vcombine.low %v389_v11, %v393_v12  ;;  %v2235_v10 = vld [vmem:[#allocation5 + $0x8e8] sm:$0xff]  ;;  %v5186_v12 = vcombine.low %v2223_v61, %v2227_v0 }
 0x16c   : > { %2132 = vmatpush1.bf16.msra.mxu0 %v5092_v19  ;;  %2175 = vmatpush1.bf16.msra.mxu1 %v5094_v35  ;;  %v396_v19 = vld [vmem:[#allocation5 + $0x390] sm:$0xff] }
 0x16d   : > { %2133 = vmatprep.subr.bf16.mxu0 %v5101_v20  ;;  %2176 = vmatprep.subr.bf16.mxu1 %v5103_v21  ;;  %v400_v35 = vld [vmem:[#allocation5 + $0x3b0] sm:$0xff]  ;;  %v397_v20 = vld [vmem:[#allocation5 + $0x398] sm:$0xff] }
 0x16e   : > { %v401_v21 = vld [vmem:[#allocation5 + $0x3b8] sm:$0xff]  ;;  %v5157_v24 = vcombine.high %v396_v19, %v400_v35  ;;  %v5156_v31 = vcombine.low %v396_v19, %v400_v35  ;;  %v2239_v19 = vld [vmem:[#allocation5 + $0x908] sm:$0xff] }
 0x16f   : > { %v5159_v25 = vcombine.high %v397_v20, %v401_v21  ;;  %v5158_v32 = vcombine.low %v397_v20, %v401_v21  ;;  %v2243_v35 = vld [vmem:[#allocation5 + $0x928] sm:$0xff]  ;;  %v5194_v21 = vcombine.low %v2231_v9, %v2235_v10 }
 0x170   : > { %2134 = vmatpush1.bf16.msra.mxu0 %v5100_v26  ;;  %2177 = vmatpush1.bf16.msra.mxu1 %v5102_v27  ;;  %v404_v26 = vld [vmem:[#allocation5 + $0x3d0] sm:$0xff] }
 0x171   : > { %2135 = vmatprep.subr.bf16.mxu0 %v5109_v29  ;;  %2178 = vmatprep.subr.bf16.mxu1 %v5111_v30  ;;  %v408_v27 = vld [vmem:[#allocation5 + $0x3f0] sm:$0xff]  ;;  %v405_v29 = vld [vmem:[#allocation5 + $0x3d8] sm:$0xff] }
 0x172   : > { %v409_v30 = vld [vmem:[#allocation5 + $0x3f8] sm:$0xff]  ;;  %v5165_v33 = vcombine.high %v404_v26, %v408_v27  ;;  %v5164_v41 = vcombine.low %v404_v26, %v408_v27  ;;  %v2247_v26 = vld [vmem:[#allocation5 + $0x948] sm:$0xff] }
 0x173   : > { %v5167_v34 = vcombine.high %v405_v29, %v409_v30  ;;  %v5166_v42 = vcombine.low %v405_v29, %v409_v30  ;;  %v2251_v27 = vld [vmem:[#allocation5 + $0x968] sm:$0xff]  ;;  %v5202_v30 = vcombine.low %v2239_v19, %v2243_v35 }
 0x174   : > { %2136 = vmatpush1.bf16.msra.mxu0 %v5108_v36  ;;  %2179 = vmatpush1.bf16.msra.mxu1 %v5110_v37  ;;  %v2206_v36 = vld [vmem:[#allocation5 + $0x800] sm:$0xff] }
 0x175   : > { %2137 = vmatprep.subr.bf16.mxu0 %v5117_v39  ;;  %2180 = vmatprep.subr.bf16.mxu1 %v5119_v40  ;;  %v2210_v37 = vld [vmem:[#allocation5 + $0x820] sm:$0xff]  ;;  %v2207_v39 = vld [vmem:[#allocation5 + $0x808] sm:$0xff] }
 0x176   : > { %v2211_v40 = vld [vmem:[#allocation5 + $0x828] sm:$0xff]  ;;  %v5169_v43 = vcombine.high %v2206_v36, %v2210_v37  ;;  %v5168_v51 = vcombine.low %v2206_v36, %v2210_v37 }
 0x177   : > { %v5171_v44 = vcombine.high %v2207_v39, %v2211_v40  ;;  %v5170_v52 = vcombine.low %v2207_v39, %v2211_v40  ;;  %v2255_v36 = vld [vmem:[#allocation5 + $0x988] sm:$0xff]  ;;  %v5210_v40 = vcombine.low %v2247_v26, %v2251_v27 }
 0x178   : > { %2138 = vmatpush1.bf16.msra.mxu0 %v5116_v45  ;;  %2181 = vmatpush1.bf16.msra.mxu1 %v5118_v46  ;;  %v2214_v45 = vld [vmem:[#allocation5 + $0x840] sm:$0xff]  ;;  %v2259_v37 = vld [vmem:[#allocation5 + $0x9a8] sm:$0xff] }
 0x179   : > { %2139 = vmatprep.subr.bf16.mxu0 %v5125_v47  ;;  %2182 = vmatprep.subr.bf16.mxu1 %v5127_v48  ;;  %v2218_v46 = vld [vmem:[#allocation5 + $0x860] sm:$0xff]  ;;  %v2215_v47 = vld [vmem:[#allocation5 + $0x848] sm:$0xff] }
 0x17a   : > { %v2219_v48 = vld [vmem:[#allocation5 + $0x868] sm:$0xff]  ;;  %v5176_v38 = vcombine.low %v2214_v45, %v2218_v46 }
 0x17b   : > { %v5178_v3 = vcombine.low %v2215_v47, %v2219_v48 }
 0x17c   : > { %2140 = vmatpush1.bf16.msra.mxu0 %v5124_v54  ;;  %2183 = vmatpush1.bf16.msra.mxu1 %v5126_v55  ;;  %v5177_v54 = vcombine.high %v2214_v45, %v2218_v46  ;;  %v5179_v55 = vcombine.high %v2215_v47, %v2219_v48  ;;  %v2263_v45 = vld [vmem:[#allocation5 + $0x9c8] sm:$0xff]  ;;  %v5218_v48 = vcombine.low %v2255_v36, %v2259_v37 }
 0x17d   : > { %2141 = vmatprep.subr.bf16.mxu0 %v5133_v58  ;;  %2184 = vmatprep.subr.bf16.mxu1 %v5135_v59  ;;  %v2222_v58 = vld [vmem:[#allocation5 + $0x880] sm:$0xff]  ;;  %v2267_v46 = vld [vmem:[#allocation5 + $0x9e8] sm:$0xff] }
 0x17e   : > { %v2226_v59 = vld [vmem:[#allocation5 + $0x8a0] sm:$0xff]  ;;  %v5227_v50 = vcombine.high %v2263_v45, %v2267_v46 }
 0x17f   : > { %v5184_v11 = vcombine.low %v2222_v58, %v2226_v59 }
 0x180   : > { %2142 = vmatpush1.bf16.msra.mxu0 %v5132_v6  ;;  %2185 = vmatpush1.bf16.msra.mxu1 %v5134_v7  ;;  %v5185_v6 = vcombine.high %v2222_v58, %v2226_v59  ;;  %v5187_v7 = vcombine.high %v2223_v61, %v2227_v0  ;;  %v5226_v59 = vcombine.low %v2263_v45, %v2267_v46 }
 0x181   : > { %2143 = vmatprep.subr.bf16.mxu0 %v5141_v17  ;;  %2186 = vmatprep.subr.bf16.mxu1 %v5143_v8  ;;  %v2230_v17 = vld [vmem:[#allocation5 + $0x8c0] sm:$0xff] }
 0x182   : > { %v2234_v8 = vld [vmem:[#allocation5 + $0x8e0] sm:$0xff] }
 0x183   : > { %v5192_v20 = vcombine.low %v2230_v17, %v2234_v8 }
 0x184   : > { %2144 = vmatpush1.bf16.msra.mxu0 %v5140_v13  ;;  %2187 = vmatpush1.bf16.msra.mxu1 %v5142_v56  ;;  %v5193_v13 = vcombine.high %v2230_v17, %v2234_v8  ;;  %v5195_v56 = vcombine.high %v2231_v9, %v2235_v10 }
 0x185   : > { %2145 = vmatprep.subr.bf16.mxu0 %v5149_v16  ;;  %2188 = vmatprep.subr.bf16.mxu1 %v5151_v18  ;;  %v2238_v16 = vld [vmem:[#allocation5 + $0x900] sm:$0xff] }
 0x186   : > { %v2242_v18 = vld [vmem:[#allocation5 + $0x920] sm:$0xff] }
 0x187   : > { %v5200_v29 = vcombine.low %v2238_v16, %v2242_v18 }
 0x188   : > { %2146 = vmatpush1.bf16.msra.mxu0 %v5148_v22  ;;  %2189 = vmatpush1.bf16.msra.mxu1 %v5150_v23  ;;  %v5201_v22 = vcombine.high %v2238_v16, %v2242_v18  ;;  %v5203_v23 = vcombine.high %v2239_v19, %v2243_v35 }
 0x189   : > { %2147 = vmatprep.subr.bf16.mxu0 %v5157_v24  ;;  %2190 = vmatprep.subr.bf16.mxu1 %v5159_v25  ;;  %v2246_v24 = vld [vmem:[#allocation5 + $0x940] sm:$0xff] }
 0x18a   : > { %v2250_v25 = vld [vmem:[#allocation5 + $0x960] sm:$0xff] }
 0x18b   : > { %v5208_v39 = vcombine.low %v2246_v24, %v2250_v25 }
 0x18c   : > { %2148 = vmatpush1.bf16.msra.mxu0 %v5156_v31  ;;  %2191 = vmatpush1.bf16.msra.mxu1 %v5158_v32  ;;  %v5209_v31 = vcombine.high %v2246_v24, %v2250_v25  ;;  %v5211_v32 = vcombine.high %v2247_v26, %v2251_v27 }
 0x18d   : > { %2149 = vmatprep.subr.bf16.mxu0 %v5165_v33  ;;  %2192 = vmatprep.subr.bf16.mxu1 %v5167_v34  ;;  %v2254_v33 = vld [vmem:[#allocation5 + $0x980] sm:$0xff] }
 0x18e   : > { %v2258_v34 = vld [vmem:[#allocation5 + $0x9a0] sm:$0xff] }
 0x18f   : > { %v5216_v47 = vcombine.low %v2254_v33, %v2258_v34 }
 0x190   : > { %2150 = vmatpush1.bf16.msra.mxu0 %v5164_v41  ;;  %2193 = vmatpush1.bf16.msra.mxu1 %v5166_v42  ;;  %v5217_v41 = vcombine.high %v2254_v33, %v2258_v34  ;;  %v5219_v42 = vcombine.high %v2255_v36, %v2259_v37 }
 0x191   : > { %2983 = vmatprep.subr.bf16.mxu0 %v5169_v43  ;;  %3026 = vmatprep.subr.bf16.mxu1 %v5171_v44  ;;  %v2262_v43 = vld [vmem:[#allocation5 + $0x9c0] sm:$0xff] }
 0x192   : > { %v2266_v44 = vld [vmem:[#allocation5 + $0x9e0] sm:$0xff] }
 0x193   : > { %2152 = vmatmul.mubr.bf16.vlgmr.msra.gmra.mrb[4].mxu0 %v6310_v28  ;;  %2195 = vmatmul.mubr.bf16.vlgmr.msra.gmra.mrb[4].mxu1 %v6310_v28  ;;  %v5225_v49 = vcombine.high %v2262_v43, %v2266_v44  ;;  %v5224_v58 = vcombine.low %v2262_v43, %v2266_v44 }
 0x194   : > { %2984 = vmatpush1.bf16.msra.mxu0 %v5168_v51  ;;  %3027 = vmatpush1.bf16.msra.mxu1 %v5170_v52  ;;  %v2270_v51 = vld [vmem:[#allocation5 + $0xa00] sm:$0xff] }
 0x195   : > { %2985 = vmatprep.subr.bf16.mxu0 %v5177_v54  ;;  %3028 = vmatprep.subr.bf16.mxu1 %v5179_v55  ;;  %v2274_v52 = vld [vmem:[#allocation5 + $0xa20] sm:$0xff]  ;;  %v2271_v54 = vld [vmem:[#allocation5 + $0xa08] sm:$0xff] }
 0x196   : > { %3015 = vmatprep.mubr.bf16.mxu0 %v6323_v1  ;;  %3058 = vmatprep.mubr.bf16.mxu1 %v6323_v1  ;;  %v2275_v55 = vld [vmem:[#allocation5 + $0xa28] sm:$0xff]  ;;  %v5233_v61 = vcombine.high %v2270_v51, %v2274_v52  ;;  %v5232_v17 = vcombine.low %v2270_v51, %v2274_v52 }
 0x197   : > { %v5235_v0 = vcombine.high %v2271_v54, %v2275_v55  ;;  %v5234_v8 = vcombine.low %v2271_v54, %v2275_v55 }
 0x198   : > { %2986 = vmatpush1.bf16.msra.mxu0 %v5176_v38  ;;  %3029 = vmatpush1.bf16.msra.mxu1 %v5178_v3  ;;  %v2278_v38 = vld [vmem:[#allocation5 + $0xa40] sm:$0xff] }
 0x199   : > { %2987 = vmatprep.subr.bf16.mxu0 %v5185_v6  ;;  %3030 = vmatprep.subr.bf16.mxu1 %v5187_v7  ;;  %v2282_v3 = vld [vmem:[#allocation5 + $0xa60] sm:$0xff]  ;;  %v2279_v6 = vld [vmem:[#allocation5 + $0xa48] sm:$0xff] }
 0x19a   : > { %v2283_v7 = vld [vmem:[#allocation5 + $0xa68] sm:$0xff]  ;;  %v5241_v9 = vcombine.high %v2278_v38, %v2282_v3  ;;  %v5240_v16 = vcombine.low %v2278_v38, %v2282_v3 }
 0x19b   : > { %v5243_v10 = vcombine.high %v2279_v6, %v2283_v7  ;;  %v5242_v18 = vcombine.low %v2279_v6, %v2283_v7 }
 0x19c   : > { %2988 = vmatpush1.bf16.msra.mxu0 %v5184_v11  ;;  %3031 = vmatpush1.bf16.msra.mxu1 %v5186_v12  ;;  %v2286_v11 = vld [vmem:[#allocation5 + $0xa80] sm:$0xff] }
 0x19d   : > { %2989 = vmatprep.subr.bf16.mxu0 %v5193_v13  ;;  %3032 = vmatprep.subr.bf16.mxu1 %v5195_v56  ;;  %v2290_v12 = vld [vmem:[#allocation5 + $0xaa0] sm:$0xff]  ;;  %v2287_v13 = vld [vmem:[#allocation5 + $0xa88] sm:$0xff] }
 0x19e   : > { %v2291_v56 = vld [vmem:[#allocation5 + $0xaa8] sm:$0xff]  ;;  %v5249_v19 = vcombine.high %v2286_v11, %v2290_v12  ;;  %v5248_v24 = vcombine.low %v2286_v11, %v2290_v12  ;;  %v2335_v12 = vrot.slane %v6310_v28, 1 }
 0x19f   : > { %v5251_v35 = vcombine.high %v2287_v13, %v2291_v56  ;;  %v5250_v25 = vcombine.low %v2287_v13, %v2291_v56  ;;  %v2336_v13 = vrot.slane %v6287_v4, 1 }
 0x1a0   : > { %2990 = vmatpush1.bf16.msra.mxu0 %v5192_v20  ;;  %3033 = vmatpush1.bf16.msra.mxu1 %v5194_v21  ;;  %v2294_v20 = vld [vmem:[#allocation5 + $0xac0] sm:$0xff] }
 0x1a1   : > { %2991 = vmatprep.subr.bf16.mxu0 %v5201_v22  ;;  %3034 = vmatprep.subr.bf16.mxu1 %v5203_v23  ;;  %v2298_v21 = vld [vmem:[#allocation5 + $0xae0] sm:$0xff]  ;;  %v2295_v22 = vld [vmem:[#allocation5 + $0xac8] sm:$0xff] }
 0x1a2   : > { %v2299_v23 = vld [vmem:[#allocation5 + $0xae8] sm:$0xff]  ;;  %v5257_v26 = vcombine.high %v2294_v20, %v2298_v21  ;;  %v5256_v33 = vcombine.low %v2294_v20, %v2298_v21  ;;  %v2217_v20 = vld [vmem:[#allocation5 + $0x858] sm:$0xff] }
 0x1a3   : > { %v5259_v27 = vcombine.high %v2295_v22, %v2299_v23  ;;  %v5258_v34 = vcombine.low %v2295_v22, %v2299_v23  ;;  %v2221_v21 = vld [vmem:[#allocation5 + $0x878] sm:$0xff]  ;;  %v6331_v23 = vsel %vm2334_vm1, %v2335_v12, %v2336_v13  ;;  %v2264_v12 = vld [vmem:[#allocation5 + $0x9d0] sm:$0xff] }
 0x1a4   : > { %2992 = vmatpush1.bf16.msra.mxu0 %v5200_v29  ;;  %3035 = vmatpush1.bf16.msra.mxu1 %v5202_v30  ;;  %v2302_v29 = vld [vmem:[#allocation5 + $0xb00] sm:$0xff]  ;;  %v2268_v13 = vld [vmem:[#allocation5 + $0x9f0] sm:$0xff] }
 0x1a5   : > { %2993 = vmatprep.subr.bf16.mxu0 %v5209_v31  ;;  %3036 = vmatprep.subr.bf16.mxu1 %v5211_v32  ;;  %v2306_v30 = vld [vmem:[#allocation5 + $0xb20] sm:$0xff]  ;;  %v2303_v31 = vld [vmem:[#allocation5 + $0xb08] sm:$0xff] }
 0x1a6   : > { %v2307_v32 = vld [vmem:[#allocation5 + $0xb28] sm:$0xff]  ;;  %v5265_v36 = vcombine.high %v2302_v29, %v2306_v30  ;;  %v5264_v43 = vcombine.low %v2302_v29, %v2306_v30  ;;  %v2225_v29 = vld [vmem:[#allocation5 + $0x898] sm:$0xff] }
 0x1a7   : > { %v5267_v37 = vcombine.high %v2303_v31, %v2307_v32  ;;  %v5266_v44 = vcombine.low %v2303_v31, %v2307_v32  ;;  %v2229_v30 = vld [vmem:[#allocation5 + $0x8b8] sm:$0xff]  ;;  %v5182_v32 = vcombine.low %v2217_v20, %v2221_v21 }
 0x1a8   : > { %2994 = vmatpush1.bf16.msra.mxu0 %v5208_v39  ;;  %3037 = vmatpush1.bf16.msra.mxu1 %v5210_v40  ;;  %v2310_v39 = vld [vmem:[#allocation5 + $0xb40] sm:$0xff] }
 0x1a9   : > { %2995 = vmatprep.subr.bf16.mxu0 %v5217_v41  ;;  %3038 = vmatprep.subr.bf16.mxu1 %v5219_v42  ;;  %v2314_v40 = vld [vmem:[#allocation5 + $0xb60] sm:$0xff]  ;;  %v2311_v41 = vld [vmem:[#allocation5 + $0xb48] sm:$0xff] }
 0x1aa   : > { %v2315_v42 = vld [vmem:[#allocation5 + $0xb68] sm:$0xff]  ;;  %v5273_v45 = vcombine.high %v2310_v39, %v2314_v40  ;;  %v5272_v51 = vcombine.low %v2310_v39, %v2314_v40  ;;  %v2233_v39 = vld [vmem:[#allocation5 + $0x8d8] sm:$0xff] }
 0x1ab   : > { %v5275_v46 = vcombine.high %v2311_v41, %v2315_v42  ;;  %v5274_v52 = vcombine.low %v2311_v41, %v2315_v42  ;;  %v2237_v40 = vld [vmem:[#allocation5 + $0x8f8] sm:$0xff]  ;;  %v5190_v42 = vcombine.low %v2225_v29, %v2229_v30 }
 0x1ac   : > { %2996 = vmatpush1.bf16.msra.mxu0 %v5216_v47  ;;  %3039 = vmatpush1.bf16.msra.mxu1 %v5218_v48  ;;  %v2318_v47 = vld [vmem:[#allocation5 + $0xb80] sm:$0xff] }
 0x1ad   : > { %2997 = vmatprep.subr.bf16.mxu0 %v5225_v49  ;;  %3040 = vmatprep.subr.bf16.mxu1 %v5227_v50  ;;  %v2322_v48 = vld [vmem:[#allocation5 + $0xba0] sm:$0xff]  ;;  %v2319_v49 = vld [vmem:[#allocation5 + $0xb88] sm:$0xff] }
 0x1ae   : > { %v2323_v50 = vld [vmem:[#allocation5 + $0xba8] sm:$0xff]  ;;  %v5281_v54 = vcombine.high %v2318_v47, %v2322_v48  ;;  %v5280_v38 = vcombine.low %v2318_v47, %v2322_v48  ;;  %v2241_v47 = vld [vmem:[#allocation5 + $0x918] sm:$0xff] }
 0x1af   : > { %v5283_v55 = vcombine.high %v2319_v49, %v2323_v50  ;;  %v5282_v3 = vcombine.low %v2319_v49, %v2323_v50  ;;  %v2245_v48 = vld [vmem:[#allocation5 + $0x938] sm:$0xff]  ;;  %v5198_v50 = vcombine.low %v2233_v39, %v2237_v40 }
 0x1b0   : > { %2998 = vmatpush1.bf16.msra.mxu0 %v5224_v58  ;;  %3041 = vmatpush1.bf16.msra.mxu1 %v5226_v59  ;;  %v2326_v58 = vld [vmem:[#allocation5 + $0xbc0] sm:$0xff] }
 0x1b1   : > { %2999 = vmatprep.subr.bf16.mxu0 %v5233_v61  ;;  %3042 = vmatprep.subr.bf16.mxu1 %v5235_v0  ;;  %v2330_v59 = vld [vmem:[#allocation5 + $0xbe0] sm:$0xff]  ;;  %v2327_v61 = vld [vmem:[#allocation5 + $0xbc8] sm:$0xff] }
 0x1b2   : > { %v2331_v0 = vld [vmem:[#allocation5 + $0xbe8] sm:$0xff]  ;;  %v5289_v6 = vcombine.high %v2326_v58, %v2330_v59  ;;  %v5288_v11 = vcombine.low %v2326_v58, %v2330_v59  ;;  %v2253_v58 = vld [vmem:[#allocation5 + $0x978] sm:$0xff] }
 0x1b3   : > { %v5291_v7 = vcombine.high %v2327_v61, %v2331_v0  ;;  %v5290_v56 = vcombine.low %v2327_v61, %v2331_v0  ;;  %v5206_v61 = vcombine.low %v2241_v47, %v2245_v48 }
 0x1b4   : > { %3000 = vmatpush1.bf16.msra.mxu0 %v5232_v17  ;;  %3043 = vmatpush1.bf16.msra.mxu1 %v5234_v8  ;;  %v2208_v17 = vld [vmem:[#allocation5 + $0x810] sm:$0xff] }
 0x1b5   : > { %3001 = vmatprep.subr.bf16.mxu0 %v5241_v9  ;;  %3044 = vmatprep.subr.bf16.mxu1 %v5243_v10  ;;  %v2212_v8 = vld [vmem:[#allocation5 + $0x830] sm:$0xff]  ;;  %v2209_v9 = vld [vmem:[#allocation5 + $0x818] sm:$0xff] }
 0x1b6   : > { %v2213_v10 = vld [vmem:[#allocation5 + $0x838] sm:$0xff]  ;;  %v5172_v22 = vcombine.low %v2208_v17, %v2212_v8 }
 0x1b7   : > { %v5174_v28 = vcombine.low %v2209_v9, %v2213_v10 }
 0x1b8   : > { %3002 = vmatpush1.bf16.msra.mxu0 %v5240_v16  ;;  %3045 = vmatpush1.bf16.msra.mxu1 %v5242_v18  ;;  %v5173_v16 = vcombine.high %v2208_v17, %v2212_v8  ;;  %v5175_v18 = vcombine.high %v2209_v9, %v2213_v10  ;;  %v2261_v17 = vld [vmem:[#allocation5 + $0x9b8] sm:$0xff] }
 0x1b9   : > { %3003 = vmatprep.subr.bf16.mxu0 %v5249_v19  ;;  %3046 = vmatprep.subr.bf16.mxu1 %v5251_v35  ;;  %v2216_v19 = vld [vmem:[#allocation5 + $0x850] sm:$0xff] }
 0x1ba   : > { %v2220_v35 = vld [vmem:[#allocation5 + $0x870] sm:$0xff] }
 0x1bb   : > { %v5180_v31 = vcombine.low %v2216_v19, %v2220_v35 }
 0x1bc   : > { %3004 = vmatpush1.bf16.msra.mxu0 %v5248_v24  ;;  %3047 = vmatpush1.bf16.msra.mxu1 %v5250_v25  ;;  %v5181_v24 = vcombine.high %v2216_v19, %v2220_v35  ;;  %v5183_v25 = vcombine.high %v2217_v20, %v2221_v21  ;;  %v5229_v35 = vcombine.high %v2264_v12, %v2268_v13  ;;  %v2272_v21 = vld [vmem:[#allocation5 + $0xa10] sm:$0xff] }
 0x1bd   : > { %3005 = vmatprep.subr.bf16.mxu0 %v5257_v26  ;;  %3048 = vmatprep.subr.bf16.mxu1 %v5259_v27  ;;  %v2224_v26 = vld [vmem:[#allocation5 + $0x890] sm:$0xff] }
 0x1be   : > { %v2228_v27 = vld [vmem:[#allocation5 + $0x8b0] sm:$0xff] }
 0x1bf   : > { %v5188_v41 = vcombine.low %v2224_v26, %v2228_v27 }
 0x1c0   : > { %3006 = vmatpush1.bf16.msra.mxu0 %v5256_v33  ;;  %3049 = vmatpush1.bf16.msra.mxu1 %v5258_v34  ;;  %v5189_v33 = vcombine.high %v2224_v26, %v2228_v27  ;;  %v5191_v34 = vcombine.high %v2225_v29, %v2229_v30  ;;  %v2280_v30 = vld [vmem:[#allocation5 + $0xa50] sm:$0xff] }
 0x1c1   : > { %3007 = vmatprep.subr.bf16.mxu0 %v5265_v36  ;;  %3050 = vmatprep.subr.bf16.mxu1 %v5267_v37  ;;  %v2232_v36 = vld [vmem:[#allocation5 + $0x8d0] sm:$0xff] }
 0x1c2   : > { %v2236_v37 = vld [vmem:[#allocation5 + $0x8f0] sm:$0xff] }
 0x1c3   : > { %v5196_v49 = vcombine.low %v2232_v36, %v2236_v37 }
 0x1c4   : > { %3008 = vmatpush1.bf16.msra.mxu0 %v5264_v43  ;;  %3051 = vmatpush1.bf16.msra.mxu1 %v5266_v44  ;;  %v5197_v43 = vcombine.high %v2232_v36, %v2236_v37  ;;  %v5199_v44 = vcombine.high %v2233_v39, %v2237_v40  ;;  %v2288_v40 = vld [vmem:[#allocation5 + $0xa90] sm:$0xff] }
 0x1c5   : > { %3009 = vmatprep.subr.bf16.mxu0 %v5273_v45  ;;  %3052 = vmatprep.subr.bf16.mxu1 %v5275_v46  ;;  %v2240_v45 = vld [vmem:[#allocation5 + $0x910] sm:$0xff] }
 0x1c6   : > { %v2244_v46 = vld [vmem:[#allocation5 + $0x930] sm:$0xff] }
 0x1c7   : > { %v5204_v59 = vcombine.low %v2240_v45, %v2244_v46 }
 0x1c8   : > { %3010 = vmatpush1.bf16.msra.mxu0 %v5272_v51  ;;  %3053 = vmatpush1.bf16.msra.mxu1 %v5274_v52  ;;  %v5205_v51 = vcombine.high %v2240_v45, %v2244_v46  ;;  %v2248_v52 = vld [vmem:[#allocation5 + $0x950] sm:$0xff] }
 0x1c9   : > { %3011 = vmatprep.subr.bf16.mxu0 %v5281_v54  ;;  %3054 = vmatprep.subr.bf16.mxu1 %v5283_v55  ;;  %v2252_v54 = vld [vmem:[#allocation5 + $0x970] sm:$0xff]  ;;  %v2249_v55 = vld [vmem:[#allocation5 + $0x958] sm:$0xff] }
 0x1ca   : > { %v5213_v0 = vcombine.high %v2248_v52, %v2252_v54  ;;  %v5212_v8 = vcombine.low %v2248_v52, %v2252_v54  ;;  %v5214_v9 = vcombine.low %v2249_v55, %v2253_v58 }
 0x1cc   : > { %3012 = vmatpush1.bf16.msra.mxu0 %v5280_v38  ;;  %3055 = vmatpush1.bf16.msra.mxu1 %v5282_v3  ;;  %v5215_v38 = vcombine.high %v2249_v55, %v2253_v58  ;;  %v2256_v3 = vld [vmem:[#allocation5 + $0x990] sm:$0xff] }
 0x1cd   : > { %3013 = vmatprep.subr.bf16.mxu0 %v5289_v6  ;;  %3056 = vmatprep.subr.bf16.mxu1 %v5291_v7  ;;  %v2260_v6 = vld [vmem:[#allocation5 + $0x9b0] sm:$0xff]  ;;  %v2257_v7 = vld [vmem:[#allocation5 + $0x998] sm:$0xff] }
 0x1ce   : > { %v5221_v10 = vcombine.high %v2256_v3, %v2260_v6  ;;  %v5222_v19 = vcombine.low %v2257_v7, %v2261_v17  ;;  %v2304_v58 = vld [vmem:[#allocation5 + $0xb10] sm:$0xff] }
 0x1d0   : > { %3014 = vmatpush1.bf16.msra.mxu0 %v5288_v11  ;;  %3057 = vmatpush1.bf16.msra.mxu1 %v5290_v56  ;;  %v5223_v11 = vcombine.high %v2257_v7, %v2261_v17  ;;  %v2265_v56 = vld [vmem:[#allocation5 + $0x9d8] sm:$0xff]  ;;  %v2312_v17 = vld [vmem:[#allocation5 + $0xb50] sm:$0xff] }
 0x1d1   : > { %3069 = vmatprep.subr.bf16.mxu0 %v5173_v16  ;;  %3112 = vmatprep.subr.bf16.mxu1 %v5175_v18  ;;  %v2269_v16 = vld [vmem:[#allocation5 + $0x9f8] sm:$0xff]  ;;  %v5220_v18 = vcombine.low %v2256_v3, %v2260_v6 }
 0x1d2   : > { %v5231_v20 = vcombine.high %v2265_v56, %v2269_v16  ;;  %v5230_v26 = vcombine.low %v2265_v56, %v2269_v16  ;;  %v2320_v16 = vld [vmem:[#allocation5 + $0xb90] sm:$0xff] }
 0x1d3   : > { %3016 = vmatmul.mubr.bf16.vlgmr.msra.gmra.mrb[0].mxu0 %v6331_v23  ;;  %3059 = vmatmul.mubr.bf16.vlgmr.msra.gmra.mrb[0].mxu1 %v6331_v23 }
 0x1d4   : > { %3070 = vmatpush1.bf16.msra.mxu0 %v5172_v22  ;;  %3113 = vmatpush1.bf16.msra.mxu1 %v5174_v28  ;;  %v2276_v22 = vld [vmem:[#allocation5 + $0xa30] sm:$0xff]  ;;  %v2273_v28 = vld [vmem:[#allocation5 + $0xa18] sm:$0xff] }
 0x1d5   : > { %3071 = vmatprep.subr.bf16.mxu0 %v5181_v24  ;;  %3114 = vmatprep.subr.bf16.mxu1 %v5183_v25  ;;  %v2277_v24 = vld [vmem:[#allocation5 + $0xa38] sm:$0xff]  ;;  %v5228_v25 = vcombine.low %v2264_v12, %v2268_v13  ;;  %v5237_v27 = vcombine.high %v2272_v21, %v2276_v22 }
 0x1d6   : > { %3101 = vmatprep.mubr.bf16.mxu0 %v6323_v1  ;;  %3144 = vmatprep.mubr.bf16.mxu1 %v6323_v1  ;;  %v5207_v1 = vcombine.high %v2241_v47, %v2245_v48  ;;  %v5239_v29 = vcombine.high %v2273_v28, %v2277_v24  ;;  %v5238_v36 = vcombine.low %v2273_v28, %v2277_v24  ;;  %v2296_v48 = vld [vmem:[#allocation5 + $0xad0] sm:$0xff] }
 0x1d7   : > { %v2328_v24 = vld [vmem:[#allocation5 + $0xbd0] sm:$0xff] }
 0x1d8   : > { %3072 = vmatpush1.bf16.msra.mxu0 %v5180_v31  ;;  %3115 = vmatpush1.bf16.msra.mxu1 %v5182_v32  ;;  %v2284_v31 = vld [vmem:[#allocation5 + $0xa70] sm:$0xff]  ;;  %v2281_v32 = vld [vmem:[#allocation5 + $0xa58] sm:$0xff] }
 0x1d9   : > { %3073 = vmatprep.subr.bf16.mxu0 %v5189_v33  ;;  %3116 = vmatprep.subr.bf16.mxu1 %v5191_v34  ;;  %v2285_v33 = vld [vmem:[#allocation5 + $0xa78] sm:$0xff]  ;;  %v5236_v34 = vcombine.low %v2272_v21, %v2276_v22  ;;  %v5245_v37 = vcombine.high %v2280_v30, %v2284_v31 }
 0x1da   : > { %v5247_v39 = vcombine.high %v2281_v32, %v2285_v33  ;;  %v5246_v45 = vcombine.low %v2281_v32, %v2285_v33 }
 0x1dc   : > { %3074 = vmatpush1.bf16.msra.mxu0 %v5188_v41  ;;  %3117 = vmatpush1.bf16.msra.mxu1 %v5190_v42  ;;  %v2292_v41 = vld [vmem:[#allocation5 + $0xab0] sm:$0xff]  ;;  %v2289_v42 = vld [vmem:[#allocation5 + $0xa98] sm:$0xff] }
 0x1dd   : > { %3075 = vmatprep.subr.bf16.mxu0 %v5197_v43  ;;  %3118 = vmatprep.subr.bf16.mxu1 %v5199_v44  ;;  %v2293_v43 = vld [vmem:[#allocation5 + $0xab8] sm:$0xff]  ;;  %v5244_v44 = vcombine.low %v2280_v30, %v2284_v31  ;;  %v5253_v46 = vcombine.high %v2288_v40, %v2292_v41 }
 0x1de   : > { %v5255_v47 = vcombine.high %v2289_v42, %v2293_v43  ;;  %v5254_v52 = vcombine.low %v2289_v42, %v2293_v43  ;;  %v3316_v43 = vrot.slane %v573_v2, 2 }
 0x1e0   : > { %3076 = vmatpush1.bf16.msra.mxu0 %v5196_v49  ;;  %3119 = vmatpush1.bf16.msra.mxu1 %v5198_v50  ;;  %v2300_v49 = vld [vmem:[#allocation5 + $0xaf0] sm:$0xff]  ;;  %v2297_v50 = vld [vmem:[#allocation5 + $0xad8] sm:$0xff] }
 0x1e1   : > { %3077 = vmatprep.subr.bf16.mxu0 %v5205_v51  ;;  %3120 = vmatprep.subr.bf16.mxu1 %v5207_v1  ;;  %v2301_v51 = vld [vmem:[#allocation5 + $0xaf8] sm:$0xff]  ;;  %v5252_v1 = vcombine.low %v2288_v40, %v2292_v41  ;;  %v5261_v54 = vcombine.high %v2296_v48, %v2300_v49  ;;  %v3310_v40 = vrot.slane %v566_v62, 1  ;;  %v3311_v41 = vrot.slane %v568_v63, 2 }
 0x1e2   : > { %v5263_v55 = vcombine.high %v2297_v50, %v2301_v51  ;;  %v5262_v3 = vcombine.low %v2297_v50, %v2301_v51  ;;  %v3181_v50 = vld [vmem:[#allocation5 + $0xc48] sm:$0xff] }
 0x1e3   : > { %v3185_v51 = vld [vmem:[#allocation5 + $0xc68] sm:$0xff]  ;;  %v3312_v62 = vor.u32 %v3311_v41, %v3310_v40  ;;  %v3228_v40 = vld [vmem:[#allocation5 + $0xdc0] sm:$0xff] }
 0x1e4   : > { %3078 = vmatpush1.bf16.msra.mxu0 %v5204_v59  ;;  %3121 = vmatpush1.bf16.msra.mxu1 %v5206_v61  ;;  %v2308_v59 = vld [vmem:[#allocation5 + $0xb30] sm:$0xff]  ;;  %v2305_v61 = vld [vmem:[#allocation5 + $0xb18] sm:$0xff]  ;;  %v5307_v2 = vcombine.high %v3181_v50, %v3185_v51  ;;  %v3232_v41 = vld [vmem:[#allocation5 + $0xde0] sm:$0xff] }
 0x1e5   : > { %3079 = vmatprep.subr.bf16.mxu0 %v5213_v0  ;;  %3122 = vmatprep.subr.bf16.mxu1 %v5215_v38  ;;  %v2309_v0 = vld [vmem:[#allocation5 + $0xb38] sm:$0xff]  ;;  %v5260_v38 = vcombine.low %v2296_v48, %v2300_v49  ;;  %v5269_v6 = vcombine.high %v2304_v58, %v2308_v59  ;;  %v3180_v48 = vld [vmem:[#allocation5 + $0xc40] sm:$0xff] }
 0x1e6   : > { %v5271_v7 = vcombine.high %v2305_v61, %v2309_v0  ;;  %v5270_v12 = vcombine.low %v2305_v61, %v2309_v0  ;;  %v3184_v49 = vld [vmem:[#allocation5 + $0xc60] sm:$0xff]  ;;  %v5306_v0 = vcombine.low %v3181_v50, %v3185_v51  ;;  %v3237_v50 = vld [vmem:[#allocation5 + $0xe08] sm:$0xff] }
 0x1e7   : > { %v5305_v63 = vcombine.high %v3180_v48, %v3184_v49  ;;  %v5304_v61 = vcombine.low %v3180_v48, %v3184_v49  ;;  %v3236_v48 = vld [vmem:[#allocation5 + $0xe00] sm:$0xff]  ;;  %v3241_v51 = vld [vmem:[#allocation5 + $0xe28] sm:$0xff] }
 0x1e8   : > { %3080 = vmatpush1.bf16.msra.mxu0 %v5212_v8  ;;  %3123 = vmatpush1.bf16.msra.mxu1 %v5214_v9  ;;  %v2316_v8 = vld [vmem:[#allocation5 + $0xb70] sm:$0xff]  ;;  %v2313_v9 = vld [vmem:[#allocation5 + $0xb58] sm:$0xff]  ;;  %v3240_v49 = vld [vmem:[#allocation5 + $0xe20] sm:$0xff] }
 0x1e9   : > { %3081 = vmatprep.subr.bf16.mxu0 %v5221_v10  ;;  %3124 = vmatprep.subr.bf16.mxu1 %v5223_v11  ;;  %v2317_v10 = vld [vmem:[#allocation5 + $0xb78] sm:$0xff]  ;;  %v5268_v11 = vcombine.low %v2304_v58, %v2308_v59  ;;  %v5277_v13 = vcombine.high %v2312_v17, %v2316_v8  ;;  %v3193_v58 = vld [vmem:[#allocation5 + $0xca8] sm:$0xff] }
 0x1ea   : > { %v5279_v56 = vcombine.high %v2313_v9, %v2317_v10  ;;  %v5278_v21 = vcombine.low %v2313_v9, %v2317_v10 }
 0x1ec   : > { %3082 = vmatpush1.bf16.msra.mxu0 %v5220_v18  ;;  %3125 = vmatpush1.bf16.msra.mxu1 %v5222_v19  ;;  %v2324_v18 = vld [vmem:[#allocation5 + $0xbb0] sm:$0xff]  ;;  %v2321_v19 = vld [vmem:[#allocation5 + $0xb98] sm:$0xff] }
 0x1ed   : > { %3083 = vmatprep.subr.bf16.mxu0 %v5229_v35  ;;  %3126 = vmatprep.subr.bf16.mxu1 %v5231_v20  ;;  %v2325_v35 = vld [vmem:[#allocation5 + $0xbb8] sm:$0xff]  ;;  %v5276_v20 = vcombine.low %v2312_v17, %v2316_v8  ;;  %v5285_v22 = vcombine.high %v2320_v16, %v2324_v18  ;;  %v5284_v30 = vcombine.low %v2320_v16, %v2324_v18  ;;  %v3197_v17 = vld [vmem:[#allocation5 + $0xcc8] sm:$0xff] }
 0x1ee   : > { %v5287_v28 = vcombine.high %v2321_v19, %v2325_v35  ;;  %v5286_v31 = vcombine.low %v2321_v19, %v2325_v35  ;;  %v3201_v8 = vld [vmem:[#allocation5 + $0xce8] sm:$0xff] }
 0x1ef   : > { %v3209_v16 = vld [vmem:[#allocation5 + $0xd28] sm:$0xff]  ;;  %v5322_v19 = vcombine.low %v3197_v17, %v3201_v8 }
 0x1f0   : > { %3084 = vmatpush1.bf16.msra.mxu0 %v5228_v25  ;;  %3127 = vmatpush1.bf16.msra.mxu1 %v5230_v26  ;;  %v2332_v25 = vld [vmem:[#allocation5 + $0xbf0] sm:$0xff]  ;;  %v2329_v26 = vld [vmem:[#allocation5 + $0xbd8] sm:$0xff] }
 0x1f1   : > { %3085 = vmatprep.subr.bf16.mxu0 %v5237_v27  ;;  %3128 = vmatprep.subr.bf16.mxu1 %v5239_v29  ;;  %v2333_v27 = vld [vmem:[#allocation5 + $0xbf8] sm:$0xff]  ;;  %v3313_v29 = vshrl.u32 %v6266_v60, 16  ;;  %v5293_v32 = vcombine.high %v2328_v24, %v2332_v25 }
 0x1f2   : > { %v5295_v33 = vcombine.high %v2329_v26, %v2333_v27 }
 0x1f3   : > { %v3315_v42 = vrot.slane %v3313_v29, 1 }
 0x1f4   : > { %3086 = vmatpush1.bf16.msra.mxu0 %v5236_v34  ;;  %3129 = vmatpush1.bf16.msra.mxu1 %v5238_v36  ;;  %v3172_v34 = vld [vmem:[#allocation5 + $0xc00] sm:$0xff] }
 0x1f5   : > { %3087 = vmatprep.subr.bf16.mxu0 %v5245_v37  ;;  %3130 = vmatprep.subr.bf16.mxu1 %v5247_v39  ;;  %v3176_v36 = vld [vmem:[#allocation5 + $0xc20] sm:$0xff]  ;;  %v3173_v37 = vld [vmem:[#allocation5 + $0xc08] sm:$0xff] }
 0x1f6   : > { %v3177_v39 = vld [vmem:[#allocation5 + $0xc28] sm:$0xff]  ;;  %v5296_v57 = vcombine.low %v3172_v34, %v3176_v36 }
 0x1f7   : > { %v5298_v60 = vcombine.low %v3173_v37, %v3177_v39 }
 0x1f8   : > { %3088 = vmatpush1.bf16.msra.mxu0 %v5244_v44  ;;  %3131 = vmatpush1.bf16.msra.mxu1 %v5246_v45  ;;  %v5292_v44 = vcombine.low %v2328_v24, %v2332_v25  ;;  %v5294_v45 = vcombine.low %v2329_v26, %v2333_v27  ;;  %v3217_v24 = vld [vmem:[#allocation5 + $0xd68] sm:$0xff] }
 0x1f9   : > { %3089 = vmatprep.subr.bf16.mxu0 %v5253_v46  ;;  %3132 = vmatprep.subr.bf16.mxu1 %v5255_v47  ;;  %v5297_v46 = vcombine.high %v3172_v34, %v3176_v36  ;;  %v5299_v47 = vcombine.high %v3173_v37, %v3177_v39 }
 0x1fc   : > { %3090 = vmatpush1.bf16.msra.mxu0 %v5252_v1  ;;  %3133 = vmatpush1.bf16.msra.mxu1 %v5254_v52  ;;  %v3317_v1 = vor.u32 %v3316_v43, %v3315_v42  ;;  %v3188_v52 = vld [vmem:[#allocation5 + $0xc80] sm:$0xff]  ;;  %v3229_v42 = vld [vmem:[#allocation5 + $0xdc8] sm:$0xff] }
 0x1fd   : > { %3091 = vmatprep.subr.bf16.mxu0 %v5261_v54  ;;  %3134 = vmatprep.subr.bf16.mxu1 %v5263_v55  ;;  %v3192_v54 = vld [vmem:[#allocation5 + $0xca0] sm:$0xff]  ;;  %v3189_v55 = vld [vmem:[#allocation5 + $0xc88] sm:$0xff] }
 0x1fe   : > { %v6346_v59 = vsel %vm3300_vm2, %v3312_v62, %v3317_v1  ;;  %v5312_v9 = vcombine.low %v3188_v52, %v3192_v54  ;;  %v3233_v43 = vld [vmem:[#allocation5 + $0xde8] sm:$0xff]  ;;  %v5352_v62 = vcombine.low %v3228_v40, %v3232_v41 }
 0x1ff   : > { %v5354_v1 = vcombine.low %v3229_v42, %v3233_v43 }
 0x200   : > { %3092 = vmatpush1.bf16.msra.mxu0 %v5260_v38  ;;  %3135 = vmatpush1.bf16.msra.mxu1 %v5262_v3  ;;  %v5313_v38 = vcombine.high %v3188_v52, %v3192_v54  ;;  %v5315_v3 = vcombine.high %v3189_v55, %v3193_v58  ;;  %v3245_v52 = vld [vmem:[#allocation5 + $0xe48] sm:$0xff] }
 0x201   : > { %3093 = vmatprep.subr.bf16.mxu0 %v5269_v6  ;;  %3136 = vmatprep.subr.bf16.mxu1 %v5271_v7  ;;  %v3196_v6 = vld [vmem:[#allocation5 + $0xcc0] sm:$0xff]  ;;  %v3249_v54 = vld [vmem:[#allocation5 + $0xe68] sm:$0xff] }
 0x202   : > { %v3200_v7 = vld [vmem:[#allocation5 + $0xce0] sm:$0xff] }
 0x203   : > { %v5321_v10 = vcombine.high %v3196_v6, %v3200_v7  ;;  %v5320_v18 = vcombine.low %v3196_v6, %v3200_v7  ;;  %v3253_v6 = vld [vmem:[#allocation5 + $0xe88] sm:$0xff] }
 0x204   : > { %3094 = vmatpush1.bf16.msra.mxu0 %v5268_v11  ;;  %3137 = vmatpush1.bf16.msra.mxu1 %v5270_v12  ;;  %v5323_v11 = vcombine.high %v3197_v17, %v3201_v8  ;;  %v3204_v12 = vld [vmem:[#allocation5 + $0xd00] sm:$0xff]  ;;  %v3257_v7 = vld [vmem:[#allocation5 + $0xea8] sm:$0xff]  ;;  %v5370_v8 = vcombine.low %v3245_v52, %v3249_v54 }
 0x205   : > { %3095 = vmatprep.subr.bf16.mxu0 %v5277_v13  ;;  %3138 = vmatprep.subr.bf16.mxu1 %v5279_v56  ;;  %v3208_v13 = vld [vmem:[#allocation5 + $0xd20] sm:$0xff]  ;;  %v3205_v56 = vld [vmem:[#allocation5 + $0xd08] sm:$0xff] }
 0x206   : > { %v5329_v35 = vcombine.high %v3204_v12, %v3208_v13  ;;  %v5328_v25 = vcombine.low %v3204_v12, %v3208_v13  ;;  %v5330_v26 = vcombine.low %v3205_v56, %v3209_v16  ;;  %v3261_v12 = vld [vmem:[#allocation5 + $0xec8] sm:$0xff] }
 0x207   : > { %v3265_v13 = vld [vmem:[#allocation5 + $0xee8] sm:$0xff] }
 0x208   : > { %3096 = vmatpush1.bf16.msra.mxu0 %v5276_v20  ;;  %3139 = vmatpush1.bf16.msra.mxu1 %v5278_v21  ;;  %v5331_v20 = vcombine.high %v3205_v56, %v3209_v16  ;;  %v3212_v21 = vld [vmem:[#allocation5 + $0xd40] sm:$0xff]  ;;  %v5378_v16 = vcombine.low %v3253_v6, %v3257_v7 }
 0x209   : > { %3097 = vmatprep.subr.bf16.mxu0 %v5285_v22  ;;  %3140 = vmatprep.subr.bf16.mxu1 %v5287_v28  ;;  %v3216_v22 = vld [vmem:[#allocation5 + $0xd60] sm:$0xff]  ;;  %v3213_v28 = vld [vmem:[#allocation5 + $0xd48] sm:$0xff] }
 0x20a   : > { %v5337_v27 = vcombine.high %v3212_v21, %v3216_v22  ;;  %v5339_v29 = vcombine.high %v3213_v28, %v3217_v24  ;;  %v5336_v34 = vcombine.low %v3212_v21, %v3216_v22  ;;  %v5338_v36 = vcombine.low %v3213_v28, %v3217_v24  ;;  %v3269_v21 = vld [vmem:[#allocation5 + $0xf08] sm:$0xff] }
 0x20b   : > { %v3273_v22 = vld [vmem:[#allocation5 + $0xf28] sm:$0xff]  ;;  %v5386_v24 = vcombine.low %v3261_v12, %v3265_v13 }
 0x20c   : > { %3098 = vmatpush1.bf16.msra.mxu0 %v5284_v30  ;;  %3141 = vmatpush1.bf16.msra.mxu1 %v5286_v31  ;;  %v3220_v30 = vld [vmem:[#allocation5 + $0xd80] sm:$0xff] }
 0x20d   : > { %3099 = vmatprep.subr.bf16.mxu0 %v5293_v32  ;;  %3142 = vmatprep.subr.bf16.mxu1 %v5295_v33  ;;  %v3224_v31 = vld [vmem:[#allocation5 + $0xda0] sm:$0xff]  ;;  %v3221_v32 = vld [vmem:[#allocation5 + $0xd88] sm:$0xff] }
 0x20e   : > { %v3225_v33 = vld [vmem:[#allocation5 + $0xda8] sm:$0xff]  ;;  %v5345_v37 = vcombine.high %v3220_v30, %v3224_v31 }
 0x20f   : > { %v5347_v39 = vcombine.high %v3221_v32, %v3225_v33 }
 0x210   : > { %3100 = vmatpush1.bf16.msra.mxu0 %v5292_v44  ;;  %3143 = vmatpush1.bf16.msra.mxu1 %v5294_v45  ;;  %v5344_v44 = vcombine.low %v3220_v30, %v3224_v31  ;;  %v5346_v45 = vcombine.low %v3221_v32, %v3225_v33  ;;  %v3277_v30 = vld [vmem:[#allocation5 + $0xf48] sm:$0xff]  ;;  %v5394_v33 = vcombine.low %v3269_v21, %v3273_v22 }
 0x211   : > { %3961 = vmatprep.subr.bf16.mxu0 %v5297_v46  ;;  %4004 = vmatprep.subr.bf16.mxu1 %v5299_v47  ;;  %v5353_v46 = vcombine.high %v3228_v40, %v3232_v41  ;;  %v5355_v47 = vcombine.high %v3229_v42, %v3233_v43  ;;  %v3281_v31 = vld [vmem:[#allocation5 + $0xf68] sm:$0xff]  ;;  %v3304_v43 = vshrl.u32 %v6287_v4, 16 }
 0x212   : > { %v3285_v40 = vld [vmem:[#allocation5 + $0xf88] sm:$0xff] }
 0x213   : > { %3102 = vmatmul.mubr.bf16.vlgmr.msra.gmra.mrb[4].mxu0 %v6331_v23  ;;  %3145 = vmatmul.mubr.bf16.vlgmr.msra.gmra.mrb[4].mxu1 %v6331_v23  ;;  %v5314_v23 = vcombine.low %v3189_v55, %v3193_v58  ;;  %v5360_v55 = vcombine.low %v3236_v48, %v3240_v49  ;;  %v5362_v58 = vcombine.low %v3237_v50, %v3241_v51  ;;  %v3289_v41 = vld [vmem:[#allocation5 + $0xfa8] sm:$0xff] }
 0x214   : > { %3962 = vmatpush1.bf16.msra.mxu0 %v5296_v57  ;;  %4005 = vmatpush1.bf16.msra.mxu1 %v5298_v60  ;;  %v5361_v57 = vcombine.high %v3236_v48, %v3240_v49  ;;  %v5363_v60 = vcombine.high %v3237_v50, %v3241_v51  ;;  %v3296_v48 = vld [vmem:[#allocation5 + $0xfe0] sm:$0xff]  ;;  %v3293_v50 = vld [vmem:[#allocation5 + $0xfc8] sm:$0xff] }
 0x215   : > { %3963 = vmatprep.subr.bf16.mxu0 %v5305_v63  ;;  %4006 = vmatprep.subr.bf16.mxu1 %v5307_v2  ;;  %v3244_v63 = vld [vmem:[#allocation5 + $0xe40] sm:$0xff]  ;;  %v3297_v51 = vld [vmem:[#allocation5 + $0xfe8] sm:$0xff] }
 0x216   : > { %3993 = vmatprep.mubr.bf16.mxu0 %v6346_v59  ;;  %4036 = vmatprep.mubr.bf16.mxu1 %v6346_v59  ;;  %v3248_v2 = vld [vmem:[#allocation5 + $0xe60] sm:$0xff]  ;;  %v5418_v53 = vcombine.low %v3293_v50, %v3297_v51 }
 0x217   : > { %v5368_v17 = vcombine.low %v3244_v63, %v3248_v2 }
 0x218   : > { %3964 = vmatpush1.bf16.msra.mxu0 %v5304_v61  ;;  %4007 = vmatpush1.bf16.msra.mxu1 %v5306_v0  ;;  %v5369_v61 = vcombine.high %v3244_v63, %v3248_v2  ;;  %v5371_v0 = vcombine.high %v3245_v52, %v3249_v54  ;;  %v5410_v63 = vcombine.low %v3285_v40, %v3289_v41  ;;  %v3174_v54 = vld [vmem:[#allocation5 + $0xc10] sm:$0xff] }
 0x219   : > { %3965 = vmatprep.subr.bf16.mxu0 %v5313_v38  ;;  %4008 = vmatprep.subr.bf16.mxu1 %v5315_v3  ;;  %v3252_v38 = vld [vmem:[#allocation5 + $0xe80] sm:$0xff]  ;;  %v5419_v52 = vcombine.high %v3293_v50, %v3297_v51 }
 0x21a   : > { %v3256_v3 = vld [vmem:[#allocation5 + $0xea0] sm:$0xff] }
 0x21b   : > { %v5376_v56 = vcombine.low %v3252_v38, %v3256_v3 }
 0x21c   : > { %3966 = vmatpush1.bf16.msra.mxu0 %v5312_v9  ;;  %4009 = vmatpush1.bf16.msra.mxu1 %v5314_v23  ;;  %v5377_v9 = vcombine.high %v3252_v38, %v3256_v3  ;;  %v5379_v23 = vcombine.high %v3253_v6, %v3257_v7  ;;  %v3186_v3 = vld [vmem:[#allocation5 + $0xc70] sm:$0xff]  ;;  %v3183_v6 = vld [vmem:[#allocation5 + $0xc58] sm:$0xff] }
 0x21d   : > { %3967 = vmatprep.subr.bf16.mxu0 %v5321_v10  ;;  %4010 = vmatprep.subr.bf16.mxu1 %v5323_v11  ;;  %v3260_v10 = vld [vmem:[#allocation5 + $0xec0] sm:$0xff]  ;;  %v3187_v7 = vld [vmem:[#allocation5 + $0xc78] sm:$0xff] }
 0x21e   : > { %v3264_v11 = vld [vmem:[#allocation5 + $0xee0] sm:$0xff] }
 0x21f   : > { %v5384_v28 = vcombine.low %v3260_v10, %v3264_v11 }
 0x220   : > { %3968 = vmatpush1.bf16.msra.mxu0 %v5320_v18  ;;  %4011 = vmatpush1.bf16.msra.mxu1 %v5322_v19  ;;  %v5385_v18 = vcombine.high %v3260_v10, %v3264_v11  ;;  %v5387_v19 = vcombine.high %v3261_v12, %v3265_v13  ;;  %v5311_v10 = vcombine.high %v3183_v6, %v3187_v7  ;;  %v3190_v11 = vld [vmem:[#allocation5 + $0xc90] sm:$0xff]  ;;  %v3191_v13 = vld [vmem:[#allocation5 + $0xc98] sm:$0xff] }
 0x221   : > { %3969 = vmatprep.subr.bf16.mxu0 %v5329_v35  ;;  %4012 = vmatprep.subr.bf16.mxu1 %v5331_v20  ;;  %v3268_v35 = vld [vmem:[#allocation5 + $0xf00] sm:$0xff]  ;;  %v3194_v12 = vld [vmem:[#allocation5 + $0xcb0] sm:$0xff] }
 0x222   : > { %v3272_v20 = vld [vmem:[#allocation5 + $0xf20] sm:$0xff] }
 0x223   : > { %v5392_v32 = vcombine.low %v3268_v35, %v3272_v20 }
 0x224   : > { %3970 = vmatpush1.bf16.msra.mxu0 %v5328_v25  ;;  %4013 = vmatpush1.bf16.msra.mxu1 %v5330_v26  ;;  %v5393_v25 = vcombine.high %v3268_v35, %v3272_v20  ;;  %v5395_v26 = vcombine.high %v3269_v21, %v3273_v22  ;;  %v3198_v20 = vld [vmem:[#allocation5 + $0xcd0] sm:$0xff]  ;;  %v3199_v22 = vld [vmem:[#allocation5 + $0xcd8] sm:$0xff] }
 0x225   : > { %3971 = vmatprep.subr.bf16.mxu0 %v5337_v27  ;;  %4014 = vmatprep.subr.bf16.mxu1 %v5339_v29  ;;  %v3276_v27 = vld [vmem:[#allocation5 + $0xf40] sm:$0xff]  ;;  %v3202_v21 = vld [vmem:[#allocation5 + $0xcf0] sm:$0xff] }
 0x226   : > { %v3280_v29 = vld [vmem:[#allocation5 + $0xf60] sm:$0xff] }
 0x227   : > { %v5400_v42 = vcombine.low %v3276_v27, %v3280_v29 }
 0x228   : > { %3972 = vmatpush1.bf16.msra.mxu0 %v5336_v34  ;;  %4015 = vmatpush1.bf16.msra.mxu1 %v5338_v36  ;;  %v5401_v34 = vcombine.high %v3276_v27, %v3280_v29  ;;  %v5403_v36 = vcombine.high %v3277_v30, %v3281_v31  ;;  %v3206_v29 = vld [vmem:[#allocation5 + $0xd10] sm:$0xff] }
 0x229   : > { %3973 = vmatprep.subr.bf16.mxu0 %v5345_v37  ;;  %4016 = vmatprep.subr.bf16.mxu1 %v5347_v39  ;;  %v3284_v37 = vld [vmem:[#allocation5 + $0xf80] sm:$0xff] }
 0x22a   : > { %v3288_v39 = vld [vmem:[#allocation5 + $0xfa0] sm:$0xff] }
 0x22b   : > { %v5408_v49 = vcombine.low %v3284_v37, %v3288_v39 }
 0x22c   : > { %3974 = vmatpush1.bf16.msra.mxu0 %v5344_v44  ;;  %4017 = vmatpush1.bf16.msra.mxu1 %v5346_v45  ;;  %v5402_v44 = vcombine.low %v3277_v30, %v3281_v31  ;;  %v5409_v45 = vcombine.high %v3284_v37, %v3288_v39  ;;  %v3210_v30 = vld [vmem:[#allocation5 + $0xd30] sm:$0xff]  ;;  %v3207_v31 = vld [vmem:[#allocation5 + $0xd18] sm:$0xff] }
 0x22d   : > { %3975 = vmatprep.subr.bf16.mxu0 %v5353_v46  ;;  %4018 = vmatprep.subr.bf16.mxu1 %v5355_v47  ;;  %v5411_v46 = vcombine.high %v3285_v40, %v3289_v41  ;;  %v3292_v47 = vld [vmem:[#allocation5 + $0xfc0] sm:$0xff]  ;;  %v3214_v37 = vld [vmem:[#allocation5 + $0xd50] sm:$0xff]  ;;  %v3215_v40 = vld [vmem:[#allocation5 + $0xd58] sm:$0xff] }
 0x22e   : > { %v5417_v2 = vcombine.high %v3292_v47, %v3296_v48  ;;  %v3218_v39 = vld [vmem:[#allocation5 + $0xd70] sm:$0xff]  ;;  %v3219_v41 = vld [vmem:[#allocation5 + $0xd78] sm:$0xff] }
 0x22f   : > { %v5340_v50 = vcombine.low %v3214_v37, %v3218_v39  ;;  %v5342_v51 = vcombine.low %v3215_v40, %v3219_v41 }
 0x230   : > { %3976 = vmatpush1.bf16.msra.mxu0 %v5352_v62  ;;  %4019 = vmatpush1.bf16.msra.mxu1 %v5354_v1  ;;  %v3301_v62 = vrot.slane %v554_v14, 1  ;;  %v3302_v1 = vrot.slane %v556_v5, 2 }
 0x231   : > { %3977 = vmatprep.subr.bf16.mxu0 %v5361_v57  ;;  %4020 = vmatprep.subr.bf16.mxu1 %v5363_v60  ;;  %v3306_v57 = vrot.slane %v3304_v43, 1  ;;  %v3307_v60 = vrot.slane %v561_v15, 2  ;;  %v3182_v15 = vld [vmem:[#allocation5 + $0xc50] sm:$0xff] }
 0x232   : > { %v3303_v14 = vor.u32 %v3302_v1, %v3301_v62 }
 0x233   : > { %v3308_v38 = vor.u32 %v3307_v60, %v3306_v57  ;;  %v3230_v57 = vld [vmem:[#allocation5 + $0xdd0] sm:$0xff] }
 0x234   : > { %3978 = vmatpush1.bf16.msra.mxu0 %v5360_v55  ;;  %4021 = vmatpush1.bf16.msra.mxu1 %v5362_v58  ;;  %v3178_v55 = vld [vmem:[#allocation5 + $0xc30] sm:$0xff]  ;;  %v3175_v58 = vld [vmem:[#allocation5 + $0xc18] sm:$0xff] }
 0x235   : > { %3979 = vmatprep.subr.bf16.mxu0 %v5369_v61  ;;  %4022 = vmatprep.subr.bf16.mxu1 %v5371_v0  ;;  %v3179_v61 = vld [vmem:[#allocation5 + $0xc38] sm:$0xff]  ;;  %v5416_v0 = vcombine.low %v3292_v47, %v3296_v48  ;;  %v5301_v5 = vcombine.high %v3174_v54, %v3178_v55  ;;  %v3226_v47 = vld [vmem:[#allocation5 + $0xdb0] sm:$0xff] }
 0x236   : > { %v5303_v4 = vcombine.high %v3175_v58, %v3179_v61  ;;  %v3223_v48 = vld [vmem:[#allocation5 + $0xd98] sm:$0xff]  ;;  %v3234_v60 = vld [vmem:[#allocation5 + $0xdf0] sm:$0xff] }
 0x238   : > { %3980 = vmatpush1.bf16.msra.mxu0 %v5368_v17  ;;  %4023 = vmatpush1.bf16.msra.mxu1 %v5370_v8  ;;  %v6359_v17 = vsel %vm3300_vm2, %v3303_v14, %v3308_v38  ;;  %v5300_v8 = vcombine.low %v3174_v54, %v3178_v55  ;;  %v5357_v55 = vcombine.high %v3230_v57, %v3234_v60  ;;  %v3239_v14 = vld [vmem:[#allocation5 + $0xe18] sm:$0xff] }
 0x239   : > { %3981 = vmatprep.subr.bf16.mxu0 %v5377_v9  ;;  %4024 = vmatprep.subr.bf16.mxu1 %v5379_v23  ;;  %v5302_v9 = vcombine.low %v3175_v58, %v3179_v61  ;;  %v5309_v23 = vcombine.high %v3182_v15, %v3186_v3  ;;  %v3238_v61 = vld [vmem:[#allocation5 + $0xe10] sm:$0xff]  ;;  %v3243_v38 = vld [vmem:[#allocation5 + $0xe38] sm:$0xff] }
 0x23c   : > { %3982 = vmatpush1.bf16.msra.mxu0 %v5376_v56  ;;  %4025 = vmatpush1.bf16.msra.mxu1 %v5378_v16  ;;  %v3195_v56 = vld [vmem:[#allocation5 + $0xcb8] sm:$0xff]  ;;  %v5308_v16 = vcombine.low %v3182_v15, %v3186_v3  ;;  %v5367_v15 = vcombine.high %v3239_v14, %v3243_v38  ;;  %v3246_v3 = vld [vmem:[#allocation5 + $0xe50] sm:$0xff] }
 0x23d   : > { %3983 = vmatprep.subr.bf16.mxu0 %v5385_v18  ;;  %4026 = vmatprep.subr.bf16.mxu1 %v5387_v19  ;;  %v5310_v18 = vcombine.low %v3183_v6, %v3187_v7  ;;  %v5317_v19 = vcombine.high %v3190_v11, %v3194_v12  ;;  %v5319_v35 = vcombine.high %v3191_v13, %v3195_v56  ;;  %v3250_v6 = vld [vmem:[#allocation5 + $0xe70] sm:$0xff]  ;;  %v3247_v7 = vld [vmem:[#allocation5 + $0xe58] sm:$0xff] }
 0x240   : > { %3984 = vmatpush1.bf16.msra.mxu0 %v5384_v28  ;;  %4027 = vmatpush1.bf16.msra.mxu1 %v5386_v24  ;;  %v3203_v28 = vld [vmem:[#allocation5 + $0xcf8] sm:$0xff]  ;;  %v5316_v24 = vcombine.low %v3190_v11, %v3194_v12  ;;  %v3254_v12 = vld [vmem:[#allocation5 + $0xe90] sm:$0xff] }
 0x241   : > { %3985 = vmatprep.subr.bf16.mxu0 %v5393_v25  ;;  %4028 = vmatprep.subr.bf16.mxu1 %v5395_v26  ;;  %v5318_v25 = vcombine.low %v3191_v13, %v3195_v56  ;;  %v5325_v26 = vcombine.high %v3198_v20, %v3202_v21  ;;  %v5327_v27 = vcombine.high %v3199_v22, %v3203_v28  ;;  %v3258_v13 = vld [vmem:[#allocation5 + $0xeb0] sm:$0xff]  ;;  %v3255_v56 = vld [vmem:[#allocation5 + $0xe98] sm:$0xff] }
 0x244   : > { %3986 = vmatpush1.bf16.msra.mxu0 %v5392_v32  ;;  %4029 = vmatpush1.bf16.msra.mxu1 %v5394_v33  ;;  %v3211_v32 = vld [vmem:[#allocation5 + $0xd38] sm:$0xff]  ;;  %v5324_v33 = vcombine.low %v3198_v20, %v3202_v21  ;;  %v3262_v21 = vld [vmem:[#allocation5 + $0xed0] sm:$0xff] }
 0x245   : > { %3987 = vmatprep.subr.bf16.mxu0 %v5401_v34  ;;  %4030 = vmatprep.subr.bf16.mxu1 %v5403_v36  ;;  %v5326_v34 = vcombine.low %v3199_v22, %v3203_v28  ;;  %v5333_v36 = vcombine.high %v3206_v29, %v3210_v30  ;;  %v5334_v43 = vcombine.low %v3207_v31, %v3211_v32  ;;  %v3266_v22 = vld [vmem:[#allocation5 + $0xef0] sm:$0xff]  ;;  %v3263_v28 = vld [vmem:[#allocation5 + $0xed8] sm:$0xff] }
 0x248   : > { %3988 = vmatpush1.bf16.msra.mxu0 %v5400_v42  ;;  %4031 = vmatpush1.bf16.msra.mxu1 %v5402_v44  ;;  %v5332_v42 = vcombine.low %v3206_v29, %v3210_v30  ;;  %v5341_v44 = vcombine.high %v3214_v37, %v3218_v39  ;;  %v3270_v30 = vld [vmem:[#allocation5 + $0xf10] sm:$0xff] }
 0x249   : > { %3989 = vmatprep.subr.bf16.mxu0 %v5409_v45  ;;  %4032 = vmatprep.subr.bf16.mxu1 %v5411_v46  ;;  %v5343_v45 = vcombine.high %v3215_v40, %v3219_v41  ;;  %v3222_v46 = vld [vmem:[#allocation5 + $0xd90] sm:$0xff]  ;;  %v3279_v41 = vld [vmem:[#allocation5 + $0xf58] sm:$0xff] }
 0x24a   : > { %v5349_v62 = vcombine.high %v3222_v46, %v3226_v47  ;;  %v3278_v39 = vld [vmem:[#allocation5 + $0xf50] sm:$0xff] }
 0x24b   : > { %v3282_v40 = vld [vmem:[#allocation5 + $0xf70] sm:$0xff] }
 0x24c   : > { %3990 = vmatpush1.bf16.msra.mxu0 %v5408_v49  ;;  %4033 = vmatpush1.bf16.msra.mxu1 %v5410_v63  ;;  %v3227_v49 = vld [vmem:[#allocation5 + $0xdb8] sm:$0xff] }
 0x24d   : > { %3991 = vmatprep.subr.bf16.mxu0 %v5417_v2  ;;  %4034 = vmatprep.subr.bf16.mxu1 %v5419_v52  ;;  %v5351_v1 = vcombine.high %v3223_v48, %v3227_v49  ;;  %v3231_v63 = vld [vmem:[#allocation5 + $0xdd8] sm:$0xff]  ;;  %v5348_v52 = vcombine.low %v3222_v46, %v3226_v47  ;;  %v5350_v54 = vcombine.low %v3223_v48, %v3227_v49  ;;  %v3286_v47 = vld [vmem:[#allocation5 + $0xf90] sm:$0xff] }
 0x24e   : > { %v3235_v2 = vld [vmem:[#allocation5 + $0xdf8] sm:$0xff]  ;;  %v3290_v48 = vld [vmem:[#allocation5 + $0xfb0] sm:$0xff] }
 0x24f   : > { %v5359_v58 = vcombine.high %v3231_v63, %v3235_v2  ;;  %v3287_v49 = vld [vmem:[#allocation5 + $0xf98] sm:$0xff] }
 0x250   : > { %3992 = vmatpush1.bf16.msra.mxu0 %v5416_v0  ;;  %4035 = vmatpush1.bf16.msra.mxu1 %v5418_v53  ;;  %v3242_v0 = vld [vmem:[#allocation5 + $0xe30] sm:$0xff]  ;;  %v5356_v53 = vcombine.low %v3230_v57, %v3234_v60 }
 0x251   : > { %4047 = vmatprep.subr.bf16.mxu0 %v5301_v5  ;;  %4090 = vmatprep.subr.bf16.mxu1 %v5303_v4  ;;  %v5358_v5 = vcombine.low %v3231_v63, %v3235_v2  ;;  %v5365_v4 = vcombine.high %v3238_v61, %v3242_v0  ;;  %v3294_v60 = vld [vmem:[#allocation5 + $0xfd0] sm:$0xff]  ;;  %v3295_v2 = vld [vmem:[#allocation5 + $0xfd8] sm:$0xff] }
 0x252   : > { %v3298_v63 = vld [vmem:[#allocation5 + $0xff0] sm:$0xff] }
 0x253   : > { %3994 = vmatmul.mubr.bf16.vlgmr.msra.gmra.mrb[0].mxu0 %v6359_v17  ;;  %4037 = vmatmul.mubr.bf16.vlgmr.msra.gmra.mrb[0].mxu1 %v6359_v17 }
 0x254   : > { %4048 = vmatpush1.bf16.msra.mxu0 %v5300_v8  ;;  %4091 = vmatpush1.bf16.msra.mxu1 %v5302_v9  ;;  %v3251_v8 = vld [vmem:[#allocation5 + $0xe78] sm:$0xff]  ;;  %v5364_v9 = vcombine.low %v3238_v61, %v3242_v0  ;;  %v5420_v0 = vcombine.low %v3294_v60, %v3298_v63 }
 0x255   : > { %4049 = vmatprep.subr.bf16.mxu0 %v5309_v23  ;;  %4092 = vmatprep.subr.bf16.mxu1 %v5311_v10  ;;  %v5366_v23 = vcombine.low %v3239_v14, %v3243_v38  ;;  %v5373_v10 = vcombine.high %v3246_v3, %v3250_v6  ;;  %v5375_v11 = vcombine.high %v3247_v7, %v3251_v8  ;;  %v5746_v38 = vld [vmem:[#allocation7 + $0x40] sm:$0xff]  }
 0x256   : > { %4079 = vmatprep.mubr.bf16.mxu0 %v6346_v59  ;;  %4122 = vmatprep.mubr.bf16.mxu1 %v6346_v59  ;;  %v5335_v59 = vcombine.high %v3207_v31, %v3211_v32  ;;  %v3274_v31 = vld [vmem:[#allocation5 + $0xf30] sm:$0xff]  ;;  %v3271_v32 = vld [vmem:[#allocation5 + $0xf18] sm:$0xff] }
 0x258   : > { %4050 = vmatpush1.bf16.msra.mxu0 %v5308_v16  ;;  %4093 = vmatpush1.bf16.msra.mxu1 %v5310_v18  ;;  %v3259_v16 = vld [vmem:[#allocation5 + $0xeb8] sm:$0xff]  ;;  %v5372_v18 = vcombine.low %v3246_v3, %v3250_v6  ;;  %v5751_v3 = vld [vmem:[#allocation7 + $0xc8] sm:$0xff]  }
 0x259   : > { %4051 = vmatprep.subr.bf16.mxu0 %v5317_v19  ;;  %4094 = vmatprep.subr.bf16.mxu1 %v5319_v35  ;;  %v5374_v19 = vcombine.low %v3247_v7, %v3251_v8  ;;  %v5381_v35 = vcombine.high %v3254_v12, %v3258_v13  ;;  %v5383_v20 = vcombine.high %v3255_v56, %v3259_v16  ;;  %v5752_v6 = vld [vmem:[#allocation7 + $0x8] sm:$0xff]   ;;  %v5754_v8 = vld [vmem:[#allocation7 + $0x50] sm:$0xff]  }
 0x25a   : > { %v5753_v7 = vld [vmem:[#allocation7 + $0x88] sm:$0xff]  }
 0x25c   : > { %4052 = vmatpush1.bf16.msra.mxu0 %v5316_v24  ;;  %4095 = vmatpush1.bf16.msra.mxu1 %v5318_v25  ;;  %v3267_v24 = vld [vmem:[#allocation5 + $0xef8] sm:$0xff]  ;;  %v5380_v25 = vcombine.low %v3254_v12, %v3258_v13 }
 0x25d   : > { %4053 = vmatprep.subr.bf16.mxu0 %v5325_v26  ;;  %4096 = vmatprep.subr.bf16.mxu1 %v5327_v27  ;;  %v5382_v26 = vcombine.low %v3255_v56, %v3259_v16  ;;  %v5389_v27 = vcombine.high %v3262_v21, %v3266_v22  ;;  %v5391_v29 = vcombine.high %v3263_v28, %v3267_v24  ;;  %v5760_v12 = vld [vmem:[#allocation7 + $0x18] sm:$0xff]   ;;  %v5762_v56 = vld [vmem:[#allocation7 + $0x60] sm:$0xff]  }
 0x25e   : > { %v5761_v13 = vld [vmem:[#allocation7 + $0x98] sm:$0xff]   ;;  %v5763_v16 = vld [vmem:[#allocation7 + $0xe0] sm:$0xff]  }
 0x260   : > { %4054 = vmatpush1.bf16.msra.mxu0 %v5324_v33  ;;  %4097 = vmatpush1.bf16.msra.mxu1 %v5326_v34  ;;  %v3275_v33 = vld [vmem:[#allocation5 + $0xf38] sm:$0xff]  ;;  %v5388_v34 = vcombine.low %v3262_v21, %v3266_v22  ;;  %v5768_v21 = vld [vmem:[#allocation7 + $0x28] sm:$0xff]  }
 0x261   : > { %4055 = vmatprep.subr.bf16.mxu0 %v5333_v36  ;;  %4098 = vmatprep.subr.bf16.mxu1 %v5335_v59  ;;  %v5390_v36 = vcombine.low %v3263_v28, %v3267_v24  ;;  %v5397_v59 = vcombine.high %v3270_v30, %v3274_v31  ;;  %v5399_v37 = vcombine.high %v3271_v32, %v3275_v33  ;;  %v5769_v22 = vld [vmem:[#allocation7 + $0xa8] sm:$0xff]   ;;  %v5770_v28 = vld [vmem:[#allocation7 + $0x70] sm:$0xff]  }
 0x262   : > { %v5771_v24 = vld [vmem:[#allocation7 + $0xf0] sm:$0xff]  }
 0x264   : > { %4056 = vmatpush1.bf16.msra.mxu0 %v5332_v42  ;;  %4099 = vmatpush1.bf16.msra.mxu1 %v5334_v43  ;;  %v3283_v42 = vld [vmem:[#allocation5 + $0xf78] sm:$0xff]  ;;  %v5396_v43 = vcombine.low %v3270_v30, %v3274_v31 }
 0x265   : > { %4057 = vmatprep.subr.bf16.mxu0 %v5341_v44  ;;  %4100 = vmatprep.subr.bf16.mxu1 %v5343_v45  ;;  %v5398_v44 = vcombine.low %v3271_v32, %v3275_v33  ;;  %v5405_v45 = vcombine.high %v3278_v39, %v3282_v40  ;;  %v5407_v46 = vcombine.high %v3279_v41, %v3283_v42  ;;  %v5776_v30 = vld [vmem:[#allocation7 + $0x38] sm:$0xff]   ;;  %v4521_v32 = vld [vmem:[#allocation8] sm:$0xff]  ;;  %v4522_v33 = vld [vmem:[#allocation8 + $0x8] sm:$0xff] }
 0x266   : > { %v5777_v31 = vld [vmem:[#allocation7 + $0xb8] sm:$0xff]  }
 0x268   : > { %4058 = vmatpush1.bf16.msra.mxu0 %v5340_v50  ;;  %4101 = vmatpush1.bf16.msra.mxu1 %v5342_v51  ;;  %v3291_v50 = vld [vmem:[#allocation5 + $0xfb8] sm:$0xff]  ;;  %v5404_v51 = vcombine.low %v3278_v39, %v3282_v40 }
 0x269   : > { %4059 = vmatprep.subr.bf16.mxu0 %v5349_v62  ;;  %4102 = vmatprep.subr.bf16.mxu1 %v5351_v1  ;;  %v5406_v62 = vcombine.low %v3279_v41, %v3283_v42  ;;  %v5413_v1 = vcombine.high %v3286_v47, %v3290_v48  ;;  %v5415_v57 = vcombine.high %v3287_v49, %v3291_v50 }
 0x26c   : > { %4060 = vmatpush1.bf16.msra.mxu0 %v5348_v52  ;;  %4103 = vmatpush1.bf16.msra.mxu1 %v5350_v54  ;;  %v3299_v52 = vld [vmem:[#allocation5 + $0xff8] sm:$0xff]  ;;  %v5412_v54 = vcombine.low %v3286_v47, %v3290_v48 }
 0x26d   : > { %4061 = vmatprep.subr.bf16.mxu0 %v5357_v55  ;;  %4104 = vmatprep.subr.bf16.mxu1 %v5359_v58  ;;  %v5414_v55 = vcombine.low %v3287_v49, %v3291_v50  ;;  %v5421_v58 = vcombine.high %v3294_v60, %v3298_v63  ;;  %v5423_v61 = vcombine.high %v3295_v2, %v3299_v52 }
 0x26e   : > { %v5422_v14 = vcombine.low %v3295_v2, %v3299_v52 }
 0x270   : > { %4062 = vmatpush1.bf16.msra.mxu0 %v5356_v53  ;;  %4105 = vmatpush1.bf16.msra.mxu1 %v5358_v5  ;;  %v5747_v53 = vld [vmem:[#allocation7 + $0xc0] sm:$0xff]  }
 0x271   : > { %4063 = vmatprep.subr.bf16.mxu0 %v5365_v4  ;;  %4106 = vmatprep.subr.bf16.mxu1 %v5367_v15  ;;  %v5748_v5 = vld [vmem:[#allocation7] sm:$0xff]   ;;  %v5750_v15 = vld [vmem:[#allocation7 + $0x48] sm:$0xff]  }
 0x272   : > { %v5749_v4 = vld [vmem:[#allocation7 + $0x80] sm:$0xff]  }
 0x274   : > { %4064 = vmatpush1.bf16.msra.mxu0 %v5364_v9  ;;  %4107 = vmatpush1.bf16.msra.mxu1 %v5366_v23  ;;  %v5755_v9 = vld [vmem:[#allocation7 + $0xd0] sm:$0xff]  }
 0x275   : > { %4065 = vmatprep.subr.bf16.mxu0 %v5373_v10  ;;  %4108 = vmatprep.subr.bf16.mxu1 %v5375_v11  ;;  %v5756_v23 = vld [vmem:[#allocation7 + $0x10] sm:$0xff]   ;;  %v5758_v10 = vld [vmem:[#allocation7 + $0x58] sm:$0xff]  }
 0x276   : > { %v5759_v11 = vld [vmem:[#allocation7 + $0xd8] sm:$0xff]  }
 0x278   : > { %4066 = vmatpush1.bf16.msra.mxu0 %v5372_v18  ;;  %4109 = vmatpush1.bf16.msra.mxu1 %v5374_v19  ;;  %v5764_v18 = vld [vmem:[#allocation7 + $0x20] sm:$0xff]  }
 0x279   : > { %4067 = vmatprep.subr.bf16.mxu0 %v5381_v35  ;;  %4110 = vmatprep.subr.bf16.mxu1 %v5383_v20  ;;  %v5765_v19 = vld [vmem:[#allocation7 + $0xa0] sm:$0xff]   ;;  %v5766_v35 = vld [vmem:[#allocation7 + $0x68] sm:$0xff]  }
 0x27a   : > { %v5767_v20 = vld [vmem:[#allocation7 + $0xe8] sm:$0xff]  }
 0x27c   : > { %4068 = vmatpush1.bf16.msra.mxu0 %v5380_v25  ;;  %4111 = vmatpush1.bf16.msra.mxu1 %v5382_v26  ;;  %v5772_v25 = vld [vmem:[#allocation7 + $0x30] sm:$0xff]  }
 0x27d   : > { %4069 = vmatprep.subr.bf16.mxu0 %v5389_v27  ;;  %4112 = vmatprep.subr.bf16.mxu1 %v5391_v29  ;;  %v5773_v26 = vld [vmem:[#allocation7 + $0xb0] sm:$0xff]   ;;  %v5774_v27 = vld [vmem:[#allocation7 + $0x78] sm:$0xff]  }
 0x27e   : > { %v5775_v29 = vld [vmem:[#allocation7 + $0xf8] sm:$0xff]  }
 0x280   : > { %4070 = vmatpush1.bf16.msra.mxu0 %v5388_v34  ;;  %4113 = vmatpush1.bf16.msra.mxu1 %v5390_v36  ;;  %v5560_v34 = vpack.c.bf16 %v4522_v33, %v4521_v32  ;;  %v4535_v33 = vld [vmem:[#allocation8 + $0x70] sm:$0xff] }
 0x281   : > { %4071 = vmatprep.subr.bf16.mxu0 %v5397_v59  ;;  %4114 = vmatprep.subr.bf16.mxu1 %v5399_v37 }
 0x284   : > { %4072 = vmatpush1.bf16.msra.mxu0 %v5396_v43  ;;  %4115 = vmatpush1.bf16.msra.mxu1 %v5398_v44 }
 0x285   : > { %4073 = vmatprep.subr.bf16.mxu0 %v5405_v45  ;;  %4116 = vmatprep.subr.bf16.mxu1 %v5407_v46 }
 0x288   : > { %4074 = vmatpush1.bf16.msra.mxu0 %v5404_v51  ;;  %4117 = vmatpush1.bf16.msra.mxu1 %v5406_v62 }
 0x289   : > { %4075 = vmatprep.subr.bf16.mxu0 %v5413_v1  ;;  %4118 = vmatprep.subr.bf16.mxu1 %v5415_v57 }
 0x28c   : > { %4076 = vmatpush1.bf16.msra.mxu0 %v5412_v54  ;;  %4119 = vmatpush1.bf16.msra.mxu1 %v5414_v55 }
 0x28d   : > { %4077 = vmatprep.subr.bf16.mxu0 %v5421_v58  ;;  %4120 = vmatprep.subr.bf16.mxu1 %v5423_v61 }
 0x290   : > { %4078 = vmatpush1.bf16.msra.mxu0 %v5420_v0  ;;  %4121 = vmatpush1.bf16.msra.mxu1 %v5422_v14 }
 0x291   : > { %5463 = vmatprep.subr.bf16.mxu0 %v5746_v38  ;;  %5485 = vmatprep.subr.bf16.mxu1 %v5747_v53 }
 0x293   : > { %4080 = vmatmul.mubr.bf16.vlgmr.msra.gmra.mrb[4].mxu0 %v6359_v17  ;;  %4123 = vmatmul.mubr.bf16.vlgmr.msra.gmra.mrb[4].mxu1 %v6359_v17  ;;  %v5757_v17 = vld [vmem:[#allocation7 + $0x90] sm:$0xff]  }
 0x294   : > { %5464 = vmatpush3.bf16.msra.mxu0 %v5748_v5  ;;  %5486 = vmatpush3.bf16.msra.mxu1 %v5749_v4 }
 0x295   : > { %5465 = vmatprep.subr.bf16.mxu0 %v5750_v15  ;;  %5487 = vmatprep.subr.bf16.mxu1 %v5751_v3 }
 0x298   : > { %5466 = vmatpush3.bf16.msra.mxu0 %v5752_v6  ;;  %5488 = vmatpush3.bf16.msra.mxu1 %v5753_v7 }
 0x299   : > { %5467 = vmatprep.subr.bf16.mxu0 %v5754_v8  ;;  %5489 = vmatprep.subr.bf16.mxu1 %v5755_v9 }
 0x29c   : > { %5468 = vmatpush3.bf16.msra.mxu0 %v5756_v23  ;;  %5490 = vmatpush3.bf16.msra.mxu1 %v5757_v17  ;;  %v4523_v23 = vld [vmem:[#allocation8 + $0x10] sm:$0xff]  ;;  %v4524_v17 = vld [vmem:[#allocation8 + $0x18] sm:$0xff] }
 0x29d   : > { %5469 = vmatprep.subr.bf16.mxu0 %v5758_v10  ;;  %5491 = vmatprep.subr.bf16.mxu1 %v5759_v11 }
 0x2a0   : > { %5470 = vmatpush3.bf16.msra.mxu0 %v5760_v12  ;;  %5492 = vmatpush3.bf16.msra.mxu1 %v5761_v13 }
 0x2a1   : > { %5471 = vmatprep.subr.bf16.mxu0 %v5762_v56  ;;  %5493 = vmatprep.subr.bf16.mxu1 %v5763_v16  ;;  %v5564_v16 = vpack.c.bf16 %v4524_v17, %v4523_v23 }
 0x2a4   : > { %5472 = vmatpush3.bf16.msra.mxu0 %v5764_v18  ;;  %5494 = vmatpush3.bf16.msra.mxu1 %v5765_v19  ;;  %v4525_v18 = vld [vmem:[#allocation8 + $0x20] sm:$0xff]  ;;  %v4526_v19 = vld [vmem:[#allocation8 + $0x28] sm:$0xff] }
 0x2a5   : > { %5473 = vmatprep.subr.bf16.mxu0 %v5766_v35  ;;  %5495 = vmatprep.subr.bf16.mxu1 %v5767_v20  ;;  %v5568_v35 = vpack.c.bf16 %v4526_v19, %v4525_v18  ;;  %v4527_v20 = vld [vmem:[#allocation8 + $0x30] sm:$0xff] }
 0x2a8   : > { %5474 = vmatpush3.bf16.msra.mxu0 %v5768_v21  ;;  %5496 = vmatpush3.bf16.msra.mxu1 %v5769_v22  ;;  %v4528_v21 = vld [vmem:[#allocation8 + $0x38] sm:$0xff] }
 0x2a9   : > { %5475 = vmatprep.subr.bf16.mxu0 %v5770_v28  ;;  %5497 = vmatprep.subr.bf16.mxu1 %v5771_v24  ;;  %v5572_v22 = vpack.c.bf16 %v4528_v21, %v4527_v20  ;;  %v4529_v28 = vld [vmem:[#allocation8 + $0x40] sm:$0xff]  ;;  %v4530_v24 = vld [vmem:[#allocation8 + $0x48] sm:$0xff] }
 0x2ac   : > { %5476 = vmatpush3.bf16.msra.mxu0 %v5772_v25  ;;  %5498 = vmatpush3.bf16.msra.mxu1 %v5773_v26  ;;  %v5576_v25 = vpack.c.bf16 %v4530_v24, %v4529_v28  ;;  %v4531_v26 = vld [vmem:[#allocation8 + $0x50] sm:$0xff] }
 0x2ad   : > { %5477 = vmatprep.subr.bf16.mxu0 %v5774_v27  ;;  %5499 = vmatprep.subr.bf16.mxu1 %v5775_v29  ;;  %v4532_v27 = vld [vmem:[#allocation8 + $0x58] sm:$0xff] }
 0x2ae   : > { %v5580_v29 = vpack.c.bf16 %v4532_v27, %v4531_v26 }
 0x2b0   : > { %5478 = vmatpush3.bf16.msra.mxu0 %v5776_v30  ;;  %5500 = vmatpush3.bf16.msra.mxu1 %v5777_v31  ;;  %v4533_v30 = vld [vmem:[#allocation8 + $0x60] sm:$0xff]  ;;  %v4534_v31 = vld [vmem:[#allocation8 + $0x68] sm:$0xff] }
 0x2b1   : > { %5561 = vmatprep.subr.bf16.mxu0 %v5560_v34  ;;  %v5584_v32 = vpack.c.bf16 %v4534_v31, %v4533_v30 }
 0x326   : > { %v3995_v36 = vpop.f32.mrb[0].mxu0  ;;  %v4038_v59 = vpop.f32.mrb[0].mxu1 }
 0x327   : > { %v3997_v37 = vpop.f32.mrb[1].mxu0  ;;  %v4040_v39 = vpop.f32.mrb[1].mxu1  ;;  %v4149_v44 = vmul.f32 %v3995_v36, %v3995_v36  ;;  %v4151_v46 = vmul.f32 %v4038_v59, %v4038_v59 }
 0x328   : > { %v3999_v40 = vpop.f32.mrb[2].mxu0  ;;  %v4042_v41 = vpop.f32.mrb[2].mxu1  ;;  %v4150_v47 = vmul.f32 %v3997_v37, %v3997_v37  ;;  %v4152_v48 = vmul.f32 %v4040_v39, %v4040_v39 }
 0x329   : > { %v4001_v42 = vpop.f32.mrb[3].mxu0  ;;  %v4044_v43 = vpop.f32.mrb[3].mxu1  ;;  %v4153_v62 = vmul.f32 %v3999_v40, %v3999_v40  ;;  %v4155_v1 = vmul.f32 %v4042_v41, %v4042_v41 }
 0x32a   : > { %v4154_v52 = vmul.f32 %v4001_v42, %v4001_v42  ;;  %v4156_v15 = vmul.f32 %v4044_v43, %v4044_v43 }
 0x366   : > { %v4081_v45 = vpop.f32.mrb[4].mxu0  ;;  %v4124_v50 = vpop.f32.mrb[4].mxu1 }
 0x367   : > { %v4157_v49 = vmul.f32 %v4081_v45, %v4081_v45  ;;  %v4083_v51 = vpop.f32.mrb[5].mxu0  ;;  %v4159_v57 = vmul.f32 %v4124_v50, %v4124_v50  ;;  %v4126_v63 = vpop.f32.mrb[5].mxu1 }
 0x368   : > { %v4158_v60 = vmul.f32 %v4083_v51, %v4083_v51  ;;  %v4085_v2 = vpop.f32.mrb[6].mxu0  ;;  %v4160_v55 = vmul.f32 %v4126_v63, %v4126_v63  ;;  %v4128_v61 = vpop.f32.mrb[6].mxu1 }
 0x369   : > { %v4165_v54 = vadd.f32 %v4157_v49, %v4149_v44  ;;  %v4161_v58 = vmul.f32 %v4085_v2, %v4085_v2  ;;  %v4087_v0 = vpop.f32.mrb[7].mxu0  ;;  %v4167_v14 = vadd.f32 %v4159_v57, %v4151_v46  ;;  %v4163_v53 = vmul.f32 %v4128_v61, %v4128_v61  ;;  %v4130_v4 = vpop.f32.mrb[7].mxu1 }
 0x36a   : > { %v4166_v38 = vadd.f32 %v4158_v60, %v4150_v47  ;;  %v4162_v5 = vmul.f32 %v4087_v0, %v4087_v0  ;;  %v4168_v3 = vadd.f32 %v4160_v55, %v4152_v48  ;;  %v4164_v7 = vmul.f32 %v4130_v4, %v4130_v4 }
 0x36b   : > { %v4169_v6 = vadd.f32 %v4161_v58, %v4153_v62  ;;  %v4171_v8 = vadd.f32 %v4163_v53, %v4155_v1  ;;  %v4612_v2 = vlaneseq }
 0x36c   : > { %v4170_v9 = vadd.f32 %v4162_v5, %v4154_v52  ;;  %v4172_v11 = vadd.f32 %v4164_v7, %v4156_v15 }
 0x36d   : > { %v4173_v10 = vpack.c.bf16 %v4169_v6, %v4165_v54  ;;  %v4175_v12 = vpack.c.bf16 %v4171_v8, %v4167_v14  ;;  %v4613_v52 = vshrl.u32 %v4612_v2, 7 }
 0x36e   : > { %v4174_v13 = vpack.c.bf16 %v4170_v9, %v4166_v38  ;;  %v4176_v56 = vpack.c.bf16 %v4172_v11, %v4168_v3 }
 0x36f   : > { %v4614_v54 = vadd.s32 8, %v4613_v52  ;;  %v4618_v58 = vadd.s32 4294967292, %v4613_v52 }
 0x370   : > { %4465 = vmatprep.mubr.bf16.mxu0 %v4174_v13  ;;  %4506 = vmatprep.mubr.bf16.mxu1 %v4176_v56 }
 0x371   : > { %4466 = vmatmul.mubr.bf16.vlgmr.msra.gmra.mrb[8].mxu0 %v4173_v10  ;;  %4507 = vmatmul.mubr.bf16.vlgmr.msra.gmra.mrb[8].mxu1 %v4175_v12  ;;  %v4619_v55 = vadd.s32 4294967292, %v4614_v54  ;;  %vm4620_vm4 = vcmp.ge.s32.totalorder %v4618_v58, 0 }
 0x372   : > { %5563 = vmatpush3.bf16.msra.mxu0 %v5560_v34  ;;  %v4536_v34 = vld [vmem:[#allocation8 + $0x78] sm:$0xff] }
 0x373   : > { %5565 = vmatprep.subr.bf16.mxu0 %v5564_v16  ;;  %v5588_v36 = vpack.c.bf16 %v4536_v34, %v4535_v33  ;;  %vm4623_vm3 = vcmp.lt.s32.totalorder %v4619_v55, 8 }
 0x376   : > { %5567 = vmatpush3.bf16.msra.mxu0 %v5564_v16 }
 0x377   : > { %5569 = vmatprep.subr.bf16.mxu0 %v5568_v35 }
 0x37a   : > { %5571 = vmatpush3.bf16.msra.mxu0 %v5568_v35 }
 0x37b   : > { %5573 = vmatprep.subr.bf16.mxu0 %v5572_v22 }
 0x37e   : > { %5575 = vmatpush3.bf16.msra.mxu0 %v5572_v22 }
 0x37f   : > { %5577 = vmatprep.subr.bf16.mxu0 %v5576_v25 }
 0x382   : > { %5579 = vmatpush3.bf16.msra.mxu0 %v5576_v25 }
 0x383   : > { %5581 = vmatprep.subr.bf16.mxu0 %v5580_v29 }
 0x386   : > { %5583 = vmatpush3.bf16.msra.mxu0 %v5580_v29 }
 0x387   : > { %5585 = vmatprep.subr.bf16.mxu0 %v5584_v32 }
 0x38a   : > { %5587 = vmatpush3.bf16.msra.mxu0 %v5584_v32 }
 0x38b   : > { %5589 = vmatprep.subr.bf16.mxu0 %v5588_v36 }
 0x38e   : > { %5591 = vmatpush3.bf16.msra.mxu0 %v5588_v36 }
 0x444   : > { %v5479_v59 = vpop.f32.mrb[8].mxu0  ;;  %v5501_v37 = vpop.f32.mrb[8].mxu1 }
 0x445   : > { %v5480_v39 = vpop.f32.mrb[9].mxu0  ;;  %v5502_v41 = vpop.f32.mrb[9].mxu1 }
 0x446   : > { %v5481_v40 = vadd.f32 %v5480_v39, %v5479_v59  ;;  %v5482_v42 = vpop.f32.mrb[10].mxu0  ;;  %v5503_v43 = vadd.f32 %v5502_v41, %v5501_v37  ;;  %v5504_v44 = vpop.f32.mrb[10].mxu1 }
 0x447   : > { %v5483_v45 = vpop.f32.mrb[11].mxu0  ;;  %v5505_v47 = vpop.f32.mrb[11].mxu1 }
 0x448   : > { %v5484_v46 = vadd.f32 %v5483_v45, %v5482_v42  ;;  %v4509_v48 = vadd.f32 %v5503_v43, %v5481_v40  ;;  %v5506_v49 = vadd.f32 %v5505_v47, %v5504_v44 }
 0x44a   : > { %v4515_v50 = vmax.f32 %v4509_v48, 1e-05  ;;  %v4512_v51 = vadd.f32 %v5506_v49, %v5484_v46 }
 0x44c   : > { %5778 = vlog2.f32 %v4515_v50  ;;  %v4516_v62 = vmax.f32 %v4512_v51, 1e-05 }
 0x44e   : > { %5780 = vlog2.f32 %v4516_v62 }
 0x456   : > { %v5779_v1 = vpop.eup %5778 }
 0x457   : > { %v4518_v57 = vmul.f32 0.6931472, %v5779_v1 }
 0x458   : > { %v5781_v60 = vpop.eup %5780 }
 0x459   : > { %v4520_v63 = vmul.f32 0.6931472, %v5781_v60  ;;  %5557 = vmatprep.mubr.f32.mxu0 %v4518_v57 }
 0x45b   : > { %5558 = vmatmul.mubr.f32.vlgmr.msra.gmra.mrb[12].mxu0 %v4520_v63 }
 0x52e   : > { %v5559_v61 = vpop.f32.mrb[12].mxu0 }
 0x52f   : > { %v6367_v0 = vsel %vm4623_vm3, %v5559_v61, 0.0  ;;  %v4603_v14 = vpop.f32.mrb[13].mxu0 }
 0x530   : > { %v6369_v38 = vsel %vm4620_vm4, %v4603_v14, 0.0  ;;  %v4658_v53 = vmul.f32 -0.1, %v6367_v0  ;;  %v4685_v3 = vmul.f32 0.1, %v6367_v0 }
 0x531   : > { %v4657_v5 = vmul.f32 -0.1, %v6369_v38  ;;  %v4684_v15 = vmul.f32 0.1, %v6369_v38  ;;  %v4701_v7 = vmul.f32 0.2, %v6369_v38 }
 0x532   : > { %v4662_v4 = vrot.slane %v4658_v53, 1  ;;  %v4702_v8 = vmul.f32 0.2, %v6367_v0  ;;  %v4643_v9 = vmul.f32 -0.2, %v6369_v38  ;;  %v4689_v17 = vrot.slane %v4685_v3, 3 }
 0x533   : > { %v4661_v6 = vrot.slane %v4657_v5, 1  ;;  %v4688_v23 = vrot.slane %v4684_v15, 3  ;;  %v4705_v11 = vrot.slane %v4701_v7, 4  ;;  %v4644_v13 = vmul.f32 -0.2, %v6367_v0 }
 0x534   : > { %v4706_v12 = vrot.slane %v4702_v8, 4  ;;  %v4647_v16 = vmul.f32 0.01, %v6369_v38  ;;  %v4648_v18 = vmul.f32 0.01, %v6367_v0  ;;  %v4679_v41 = vrot.slane %v4657_v5, 4 }
 0x535   : > { %v4663_v10 = vsel %vm2334_vm1, %v4661_v6, %v4662_v4  ;;  %v4690_v19 = vsel %vm4672_vm5, %v4688_v23, %v4689_v17  ;;  %v4667_v35 = vadd.f32 %v4662_v4, %v4644_v13  ;;  %v4632_v20 = vmul.f32 0.04, %v6369_v38 }
 0x536   : > { %v4666_v56 = vadd.f32 %v4663_v10, %v4643_v9  ;;  %v4668_v21 = vmul.f32 -0.04, %v6369_v38  ;;  %v4669_v22 = vmul.f32 -0.04, %v6367_v0  ;;  %v4634_v24 = vmul.f32 0.04, %v6367_v0 }
 0x537   : > { %v4707_v25 = vsel %vm4678_vm6, %v4705_v11, %v4706_v12  ;;  %v4694_v26 = vadd.f32 %v4689_v17, %v4667_v35  ;;  %v4638_v27 = vrot.slane %v4632_v20, 1  ;;  %v4652_v30 = vrot.slane %v4647_v16, 2 }
 0x538   : > { %v4693_v28 = vadd.f32 %v4690_v19, %v4666_v56  ;;  %v4653_v31 = vrot.slane %v4648_v18, 2  ;;  %v4639_v32 = vrot.slane %v4634_v24, 1  ;;  %v4673_v34 = vrot.slane %v4668_v21, 3 }
 0x539   : > { %v4711_v33 = vadd.f32 %v4706_v12, %v4694_v26  ;;  %v4674_v36 = vrot.slane %v4669_v22, 3  ;;  %v4680_v42 = vrot.slane %v4658_v53, 4  ;;  %v4696_v46 = vrot.slane %v4668_v21, 5 }
 0x53a   : > { %v4710_v29 = vadd.f32 %v4707_v25, %v4693_v28  ;;  %v4640_v37 = vsel %vm2334_vm1, %v4638_v27, %v4639_v32  ;;  %v4654_v40 = vsel %vm4651_vm7, %v4652_v30, %v4653_v31  ;;  %v4697_v47 = vrot.slane %v4669_v22, 5 }
 0x53b   : > { %v4642_v39 = vadd.f32 %v4640_v37, %v4632_v20  ;;  %v4728_v43 = vrot.slane %v4711_v33, 6  ;;  %v4675_v45 = vsel %vm4672_vm5, %v4673_v34, %v4674_v36  ;;  %v4713_v50 = vrot.slane %v4647_v16, 6 }
 0x53c   : > { %v4727_v59 = vrot.slane %v4710_v29, 6  ;;  %v4714_v51 = vrot.slane %v4648_v18, 6  ;;  %v4681_v62 = vsel %vm4678_vm6, %v4679_v41, %v4680_v42  ;;  %v4698_v57 = vsel %vm4695_vm9, %v4696_v46, %v4697_v47 }
 0x53d   : > { %v4656_v44 = vadd.f32 %v4654_v40, %v4642_v39  ;;  %v4719_v60 = vrot.slane %v4632_v20, 7  ;;  %v4720_v63 = vrot.slane %v4634_v24, 7 }
 0x53e   : > { %4730 = vrot.lane.b32.xlu0 %v4727_v59, %s6000_s23  ;;  %v4729_v48 = vsel %vm4712_vm8, %v4727_v59, %v4728_v43  ;;  %v4715_v52 = vsel %vm4712_vm8, %v4713_v50, %v4714_v51 }
 0x53f   : > { %v4677_v49 = vadd.f32 %v4675_v45, %v4656_v44  ;;  %v4721_v55 = vsel %vm4718_vm10, %v4719_v60, %v4720_v63 }
 0x541   : > { %v4683_v1 = vadd.f32 %v4681_v62, %v4677_v49 }
 0x542   : > { %4732 = vrot.lane.b32.xlu0 %v4729_v48, %s6000_s23 }
 0x543   : > { %v4700_v2 = vadd.f32 %v4698_v57, %v4683_v1 }
 0x545   : > { %v4717_v54 = vadd.f32 %v4715_v52, %v4700_v2 }
 0x547   : > { %v4723_v58 = vadd.f32 %v4721_v55, %v4717_v54 }
 0x549   : > { %v4724_v61 = vadd.f32 %v4723_v58, %v4634_v24 }
 0x54b   : > { %v4737_v14 = vrot.slane %v4724_v61, 4 }
 0x54d   : > { %4738 = vrot.lane.b32.xlu1 %v4737_v14, %s6001_s25 }
 0x5b0   : > { %v4731_v53 = vpop.permute.xlu0 %4730 }
 0x5b1   : > { %v4742_v5 = vsel %vm4741_vm11, %v6369_v38, %v4731_v53 }
 0x5b2   : > { %v4751_v3 = vrot.slane %v4742_v5, 4 }
 0x5b4   : > { %v4733_v4 = vpop.permute.xlu0 %4732 }
 0x5b5   : > { %v4743_v15 = vsel %vm4741_vm11, %v6367_v0, %v4733_v4 }
 0x5b6   : > { %v4752_v6 = vrot.slane %v4743_v15, 4 }
 0x5b8   : > { %v4753_v7 = vsel %vm4678_vm6, %v4751_v3, %v4752_v6 }
 0x5b9   : > { %4759 = vst [vmem:[%s277_s22] sm:$0xff] %v4753_v7 }
 0x5bf   : > { %v4739_v8 = vpop.permute.xlu1 %4738 }
 0x5c0   : > { %v4745_v9 = vsel %vm4744_vm12, %v4731_v53, %v4739_v8  ;;  %v4746_v23 = vsel %vm4744_vm12, %v4733_v4, %v4739_v8 }
 0x5c1   : > { %v4754_v17 = vrot.slane %v4745_v9, 4  ;;  %v4755_v38 = vrot.slane %v4746_v23, 4 }
 0x5c3   : > { %v4756_v0 = vsel %vm4678_vm6, %v4754_v17, %v4755_v38 }
 0x5c4   : > { %4761 = vst.msk [vmem:[%s277_s22 + $0x8] sm:$0xff] %vm4760_vm13, %v4756_v0 }
 0x5c5   : > { %5911 = shalt.err (!%p5908_p0)
}
 0x5c6   : > { %s5912_s5 = scalar_lea.hbm %s6401_s28, 256  ;;  %s5916_s21 = scalar_lea.hbm %s6455_s4, 512 }
 0x5c7   : > { %p5913_p4 = scmp.ne.s32.totalorder %s6401_s28, %s5912_s5  ;;  %p5917_p12 = scmp.lt.u32.totalorder %s6401_s28, %s6455_s4 }
 0x5c8   : > { %p5918_p1 = scmp.lt.u32.totalorder %s5916_s21, %s5912_s5  ;;  %p5920_p13 = scmp.lt.u32.totalorder %s5912_s5, %s6401_s28 }
 0x5c9   : > { %p5914_p2 = pnand %p5913_p4, %p6179_p10 }
 0x5ca   : > { %p5919_p11 = por %p5918_p1, %p5917_p12 }
 0x5cb   : > { %p5915_p8 = pneg %p5914_p2 }
 0x5cc   : > { %p5921_p6 = por %p5920_p13, %p5919_p11 }
 0x5ce   : > { %p5922_p3 = pnand %p5921_p6, %p5915_p8 }
 0x5d0   : > { %5925 = shalt.err (!%p5922_p3)
}
 0x5d1   : > { %5654 = dma.vmem_to_hbm [thread:$0]  (%p6179_p10), %s6403_s24, 256, %s6401_s28, %s4763_s18  }
 0x5d2 PF: > { %s4791_s27 = sand.u32 1, %s5968_s15   ;;  %p6475_p5 = scmp.ne.s32.totalorder %s6464_s26, 0 }
 0x5d3   : > { %p6476_p7 = scmp.ge.s32.totalorder %s5988_s20, 2  ;;  %s4792_s22 = scalar_lea.sflag [#allocation4], %s4791_s27 }
 0x5d5   : > { %p5671_p9 = pnand %p6476_p7, %p6475_p5 }
 0x5d7   : > { %5963 = dma.done.wait (!%p5671_p9), %s4792_s22, 256  }
 0x5d8   : > { %5965 = vsyncadd (!%p5671_p9), %s4792_s22, 4294967040  ;;  %s22_s20 = sadd.s32 1, %s5988_s20   ;;  %s6477_s15 = smov %s5972_s16 }
 0x5d9   : > { %p19_p0 = scmp.ge.s32.totalorder %s22_s20, 4   ;;  %s6478_s16 = smov %s5976_s17 }
 0x5da   : > { %s6479_s17 = smov %s6191_s13  ;;  %s6480_s18 = smov %s5984_s19 }
 0x5db   : > { %s6481_s19 = smov %s6483_s7  ;;  %21 = sbr.rel (!%p19_p0) target bundleno = 10 (0xa), region = 96 }
 0x5e2   :  { %4797 = vsyncpa [#allocation3], 1 }
 0x5e3   :  { %4799 = vsyncpa [#allocation3 + $0x1], 1 }
 0x5e4   :  { %4800 = vsyncpa [#allocation6], 1 }
 0x5e5   :  { %4801 = vsyncpa [#allocation9], 1 }
 0x5e6   :  { %4802 = vsyncpa [#allocation4], 1 }
 0x5e7   :  { %4804 = vsyncpa [#allocation4 + $0x1], 1 }

</bundles_post_ra>
